<compile_context>
chip_gen: v6e
topology: v6e:2x2x1
jax: 0.10.0
libtpu: 0.0.40
codegen_flags: <defaults>
</compile_context>

<pallas_src>
import functools

import jax
import jax.numpy as jnp
import numpy as np
from jax.experimental import pallas as pl
from jax.experimental.pallas import tpu as pltpu

# ----------------------------- configuration -------------------------------
ATOM_FDIM = 32                       # atom feature dim
BOND_ONLY_FDIM = 16
BOND_FDIM = BOND_ONLY_FDIM + ATOM_FDIM   # chemprop: bond_fdim += atom_fdim (bond messages)
HIDDEN = 32                          # args.hidden_size
FFN_HIDDEN = 32                      # args.ffn_hidden_size
OUTPUT_DIM = 4                       # args.output_dim
DEPTH = 3                            # args.depth
NUM_ATOMS = 16                       # per graph block, includes padding atom 0
NUM_BONDS = 23                       # per graph block, includes padding bond 0
B_PAD = 24                           # bond rows padded to sublane multiple of 8
MAX_NB = 6                           # max incoming bonds per atom
A_SCOPE = [(1, 5), (6, 6), (12, 4)]  # (a_start, a_size) per molecule
NUM_MOLS = len(A_SCOPE)

BLOCKS_PER_STEP = 8                  # graph blocks stacked block-diagonally per grid step
NUM_SUPER = 4                        # grid length (multiple of 2, >= 4 for v7x megacore)
TOTAL_BLOCKS = NUM_SUPER * BLOCKS_PER_STEP

A_S = BLOCKS_PER_STEP * NUM_ATOMS    # 128 atom rows per super-block
B_S = BLOCKS_PER_STEP * B_PAD        # 192 bond rows per super-block
M_S = BLOCKS_PER_STEP * NUM_MOLS     # 24 molecule rows per super-block
OUT_PACKED = 128                     # lane-dense packed output width


# ------------------------------- the kernel --------------------------------
def mpnn_kernel(f_atoms_ref, f_bonds_ref, g_ref, a2b_ref, pool_ref,
                wi_ref, wh_ref, wo_a_ref, wo_h_ref, bo_ref,
                w1_ref, b1_ref, w2_ref, b2_ref,
                out_ref, *, depth):
    f32, bf16 = jnp.float32, jnp.bfloat16

    f_bonds = f_bonds_ref[...]                 # (B_S, bond_fdim)  bf16
    g = g_ref[...]                             # (B_S, B_S) bf16, block-diag G = b2a@a2b - rev
    wh = wh_ref[...]                           # bf16, hoisted out of the unrolled loop

    # input = W_i(f_bonds); message = act(input)          (W_i has no bias)
    inp = jnp.dot(f_bonds, wi_ref[...], preferred_element_type=f32)   # f32 accum
    message = jnp.maximum(inp, 0.0)                                   # f32 on VPU

    # message passing on directed bonds:
    #   message <- act(input + W_h(G @ message))   (dropout = identity at inference)
    for _ in range(depth - 1):
        m = jnp.dot(g, message.astype(bf16), preferred_element_type=f32)
        message = jnp.maximum(
            inp + jnp.dot(m.astype(bf16), wh, preferred_element_type=f32), 0.0)

    # readout: a_message = index_select_ND(message, a2b).sum(1)  ==  a2b_mat @ message
    a_message = jnp.dot(a2b_ref[...], message.astype(bf16), preferred_element_type=f32)
    # atom_hiddens = act(W_o(cat([f_atoms, a_message], dim=1)))  (split-weight form)
    atom_hiddens = (jnp.dot(f_atoms_ref[...], wo_a_ref[...], preferred_element_type=f32)
                    + jnp.dot(a_message.astype(bf16), wo_h_ref[...],
                              preferred_element_type=f32)
                    + bo_ref[...])
    atom_hiddens = jnp.maximum(atom_hiddens, 0.0)

    # per-molecule mean pooling (1/a_size already folded into the pool matrix)
    mol_vecs = jnp.dot(pool_ref[...], atom_hiddens.astype(bf16),
                       preferred_element_type=f32)

    # FFN head (2 layers): Linear -> ReLU -> Linear, then sigmoid
    h = jnp.maximum(jnp.dot(mol_vecs.astype(bf16), w1_ref[...],
                            preferred_element_type=f32) + b1_ref[...], 0.0)
    logits = jnp.dot(h.astype(bf16), w2_ref[...],
                     preferred_element_type=f32) + b2_ref[...]
    probs = pl.reciprocal(1.0 + jnp.exp(-logits), approx=True)        # sigmoid via EUP

    # lane-dense packed output slab: [probs | mol_vecs | zero pad] -> one full-width store
    n_rows = mol_vecs.shape[0]
    pad = jnp.zeros((n_rows, OUT_PACKED - OUTPUT_DIM - HIDDEN), f32)
    out_ref[...] = jnp.concatenate([probs, mol_vecs, pad], axis=-1)


# ------------------------------- the wrapper --------------------------------
def message_passing_network(f_atoms, f_bonds, g_mat, a2b_mat, pool_scaled,
                            params, depth=DEPTH):
    nsup, a_s, _ = f_atoms.shape
    b_s = f_bonds.shape[1]
    m_s = pool_scaled.shape[1]

    weight_keys = ("wi", "wh", "wo_a", "wo_h", "bo", "w1", "b1", "w2", "b2")
    weights = [params[k] for k in weight_keys]
    args = (f_atoms, f_bonds, g_mat, a2b_mat, pool_scaled, *weights)

    def build(weight_mode):
        def blk_spec(rows, cols):
            # per-super-block tensors: stream one (squeezed) block per grid step
            return pl.BlockSpec((None, rows, cols), lambda i: (i, 0, 0))

        def const_spec(a):
            # weights/biases: constant block index -> DMA'd once, VMEM-resident;
            # single-buffered when the installed build supports pipeline_mode.
            kw = {} if weight_mode is None else {"pipeline_mode": weight_mode}
            return pl.BlockSpec(a.shape, lambda i, nd=a.ndim: (0,) * nd, **kw)

        in_specs = [
            blk_spec(a_s, ATOM_FDIM),      # f_atoms
            blk_spec(b_s, BOND_FDIM),      # f_bonds
            blk_spec(b_s, b_s),            # G (block-diagonal)
            blk_spec(a_s, b_s),            # a2b (block-diagonal)
            blk_spec(m_s, a_s),            # pool_scaled (block-diagonal)
        ] + [const_spec(w) for w in weights]

        return pl.pallas_call(
            functools.partial(mpnn_kernel, depth=depth),
            grid=(nsup,),
            in_specs=in_specs,
            out_specs=pl.BlockSpec((None, m_s, OUT_PACKED), lambda i: (i, 0, 0)),
            out_shape=jax.ShapeDtypeStruct((nsup, m_s, OUT_PACKED), jnp.float32),
            compiler_params=pltpu.CompilerParams(
                dimension_semantics=("parallel",)),   # shards super-blocks across v7x's 2 TCs
        )

    try:
        packed = build(pl.Buffered(1))(*args)   # don't double-buffer constant weights
        jax.block_until_ready(packed)
    except Exception:                            # pipeline_mode unsupported on this build
        packed = build(None)(*args)

    out = packed[..., :OUTPUT_DIM]                       # sigmoid(ffn(e))
    e = packed[..., OUTPUT_DIM:OUTPUT_DIM + HIDDEN]      # encoder output e (mol_vecs)
    return out, e


# ----------------------------------- main -----------------------------------
if __name__ == "__main__":
    key = jax.random.PRNGKey(0)
    ks = jax.random.split(key, 16)

    # --- synthetic BatchMolGraph connectivity per graph block (deterministic) ---
    def build_block(seed):
        rng = np.random.default_rng(seed)
        b2a = np.zeros((NUM_BONDS,), np.int32)
        b2a[1:] = rng.integers(1, NUM_ATOMS, NUM_BONDS - 1)
        b_target = np.zeros((NUM_BONDS,), np.int32)
        b_target[1:] = rng.integers(1, NUM_ATOMS, NUM_BONDS - 1)
        b2revb = np.zeros((NUM_BONDS,), np.int32)
        for k in range(1, NUM_BONDS - 1, 2):
            b2revb[k] = k + 1
            b2revb[k + 1] = k
        a2b_idx = np.zeros((NUM_ATOMS, MAX_NB), np.int32)   # incoming bonds, padded with bond 0
        for a in range(1, NUM_ATOMS):
            incoming = [b for b in range(1, NUM_BONDS) if b_target[b] == a][:MAX_NB]
            a2b_idx[a, :len(incoming)] = incoming

        # dense gather matrices (glue)
        a2b_mat = np.zeros((NUM_ATOMS, NUM_BONDS), np.float32)
        for a in range(NUM_ATOMS):
            for j in range(MAX_NB):
                a2b_mat[a, a2b_idx[a, j]] += 1.0
        a2b_mat[:, 0] = 0.0   # padding bond never contributes
        b2a_mat = np.zeros((NUM_BONDS, NUM_ATOMS), np.float32)
        b2a_mat[np.arange(NUM_BONDS), b2a] = 1.0
        rev_mat = np.zeros((NUM_BONDS, NUM_BONDS), np.float32)
        rev_mat[np.arange(NUM_BONDS), b2revb] = 1.0

        # single precomputed propagation matrix: message <- G @ message per depth step
        g = b2a_mat @ a2b_mat - rev_mat
        g_pad = np.zeros((B_PAD, B_PAD), np.float32)
        g_pad[:NUM_BONDS, :NUM_BONDS] = g
        a2b_pad = np.zeros((NUM_ATOMS, B_PAD), np.float32)
        a2b_pad[:, :NUM_BONDS] = a2b_mat

        # mean-pool matrix with 1/a_size folded in
        pool_scaled = np.zeros((NUM_MOLS, NUM_ATOMS), np.float32)
        for i, (st, sz) in enumerate(A_SCOPE):
            pool_scaled[i, st:st + sz] = 1.0 / max(sz, 1)

        return a2b_idx, b2a, b2revb, g_pad, a2b_pad, pool_scaled

    blocks = [build_block(seed) for seed in range(TOTAL_BLOCKS)]

    # --- assemble super-blocks: block-diagonal G / a2b / pool, stacked features ---
    g_all = np.zeros((NUM_SUPER, B_S, B_S), np.float32)
    a2b_all = np.zeros((NUM_SUPER, A_S, B_S), np.float32)
    pool_all = np.zeros((NUM_SUPER, M_S, A_S), np.float32)
    for s in range(NUM_SUPER):
        for j in range(BLOCKS_PER_STEP):
            blk = blocks[s * BLOCKS_PER_STEP + j]
            g_all[s, j * B_PAD:(j + 1) * B_PAD, j * B_PAD:(j + 1) * B_PAD] = blk[3]
            a2b_all[s, j * NUM_ATOMS:(j + 1) * NUM_ATOMS,
                    j * B_PAD:(j + 1) * B_PAD] = blk[4]
            pool_all[s, j * NUM_MOLS:(j + 1) * NUM_MOLS,
                     j * NUM_ATOMS:(j + 1) * NUM_ATOMS] = blk[5]

    # --- features (row 0 of atoms/bonds is the zero-padding row; bond rows padded) ---
    f_atoms_blocks = jax.random.normal(ks[0], (TOTAL_BLOCKS, NUM_ATOMS, ATOM_FDIM), jnp.float32)
    f_atoms_blocks = f_atoms_blocks.at[:, 0].set(0.0)
    f_bonds_core = jax.random.normal(ks[1], (TOTAL_BLOCKS, NUM_BONDS, BOND_FDIM), jnp.float32)
    f_bonds_core = f_bonds_core.at[:, 0].set(0.0)
    f_bonds_blocks = jnp.zeros((TOTAL_BLOCKS, B_PAD, BOND_FDIM), jnp.float32)
    f_bonds_blocks = f_bonds_blocks.at[:, :NUM_BONDS].set(f_bonds_core)

    # stack per super-block; bf16 at the MXU boundary (f32 reference kept separately)
    f_atoms_s = f_atoms_blocks.reshape(NUM_SUPER, A_S, ATOM_FDIM).astype(jnp.bfloat16)
    f_bonds_s = f_bonds_blocks.reshape(NUM_SUPER, B_S, BOND_FDIM).astype(jnp.bfloat16)
    g_s = jnp.asarray(g_all, dtype=jnp.bfloat16)
    a2b_s = jnp.asarray(a2b_all, dtype=jnp.bfloat16)
    pool_s = jnp.asarray(pool_all, dtype=jnp.bfloat16)

    # --- deterministic parameters (weights stored pre-transposed: (in, out)) ---
    def w(k, shape, scale=0.1):
        return (scale * jax.random.normal(k, shape)).astype(jnp.float32)

    params_f32 = dict(
        wi=w(ks[4], (BOND_FDIM, HIDDEN)),        # W_i, bias=False
        wh=w(ks[5], (HIDDEN, HIDDEN)),           # W_h, bias=False
        wo_a=w(ks[6], (ATOM_FDIM, HIDDEN)),      # W_o columns acting on f_atoms
        wo_h=w(ks[7], (HIDDEN, HIDDEN)),         # W_o columns acting on a_message
        bo=w(ks[8], (1, HIDDEN)),                # W_o bias
        w1=w(ks[9], (HIDDEN, FFN_HIDDEN)),       # FFN layer 1
        b1=w(ks[10], (1, FFN_HIDDEN)),
        w2=w(ks[11], (FFN_HIDDEN, OUTPUT_DIM)),  # FFN layer 2
        b2=w(ks[12], (1, OUTPUT_DIM)),
    )
    _MXU_WEIGHTS = {"wi", "wh", "wo_a", "wo_h", "w1", "w2"}   # biases stay f32 (VPU adds)
    params_kernel = {k: (v.astype(jnp.bfloat16) if k in _MXU_WEIGHTS else v)
                     for k, v in params_f32.items()}

    # --- run Pallas kernel ---
    out, e = message_passing_network(f_atoms_s, f_bonds_s, g_s, a2b_s, pool_s,
                                     params_kernel, DEPTH)
    jax.block_until_ready((out, e))

    # --- pure-JAX f32 reference with real gather semantics (correctness check) ---
    def ref_block(f_atoms_b, f_bonds_b, a2b_idx, b2a, b2revb):
        a2b_idx = jnp.asarray(a2b_idx)
        b2a = jnp.asarray(b2a)
        b2revb = jnp.asarray(b2revb)
        inp = f_bonds_b @ params_f32["wi"]
        message = jnp.maximum(inp, 0.0)
        for _ in range(DEPTH - 1):
            a_message = message[a2b_idx].sum(1)
            rev_message = message[b2revb]
            message = a_message[b2a] - rev_message
            message = jnp.maximum(inp + message @ params_f32["wh"], 0.0)
        a_message = message[a2b_idx].sum(1)
        atom_hiddens = jnp.maximum(
            f_atoms_b @ params_f32["wo_a"] + a_message @ params_f32["wo_h"]
            + params_f32["bo"], 0.0)
        mol_vecs = jnp.stack(
            [atom_hiddens[st:st + sz].sum(0) / sz for st, sz in A_SCOPE])
        h = jnp.maximum(mol_vecs @ params_f32["w1"] + params_f32["b1"], 0.0)
        logits = h @ params_f32["w2"] + params_f32["b2"]
        return jax.nn.sigmoid(logits), mol_vecs

    out_refs, e_refs = [], []
    for blk in range(TOTAL_BLOCKS):
        a2b_idx, b2a, b2revb = blocks[blk][0], blocks[blk][1], blocks[blk][2]
        o_r, e_r = ref_block(f_atoms_blocks[blk], f_bonds_core[blk], a2b_idx, b2a, b2revb)
        out_refs.append(o_r)
        e_refs.append(e_r)
    out_expected = jnp.stack(out_refs)   # (TOTAL_BLOCKS, NUM_MOLS, OUTPUT_DIM)
    e_expected = jnp.stack(e_refs)       # (TOTAL_BLOCKS, NUM_MOLS, HIDDEN)

    assert out.shape == (NUM_SUPER, M_S, OUTPUT_DIM) and e.shape == (NUM_SUPER, M_S, HIDDEN)
    out_blocks = np.asarray(out).reshape(TOTAL_BLOCKS, NUM_MOLS, OUTPUT_DIM)
    e_blocks = np.asarray(e).reshape(TOTAL_BLOCKS, NUM_MOLS, HIDDEN)

    # bf16 MXU operands + approx reciprocal -> loosened tolerance (reference is pure f32)
    np.testing.assert_allclose(out_blocks, np.asarray(out_expected), atol=2e-2, rtol=2e-2)
    np.testing.assert_allclose(e_blocks, np.asarray(e_expected), atol=2e-2, rtol=2e-2)

    print("KERNEL_OK")
</pallas_src>

<mosaic_0001>
module attributes {stable_mosaic.version = 11 : i64} {
  func.func @mpnn_kernel(%arg0: i32, %arg1: memref<1x128x32xbf16, #tpu.memory_space<vmem>>, %arg2: memref<1x192x48xbf16, #tpu.memory_space<vmem>>, %arg3: memref<1x192x192xbf16, #tpu.memory_space<vmem>>, %arg4: memref<1x128x192xbf16, #tpu.memory_space<vmem>>, %arg5: memref<1x24x128xbf16, #tpu.memory_space<vmem>>, %arg6: memref<48x32xbf16, #tpu.memory_space<vmem>>, %arg7: memref<32x32xbf16, #tpu.memory_space<vmem>>, %arg8: memref<32x32xbf16, #tpu.memory_space<vmem>>, %arg9: memref<32x32xbf16, #tpu.memory_space<vmem>>, %arg10: memref<1x32xf32, #tpu.memory_space<vmem>>, %arg11: memref<32x32xbf16, #tpu.memory_space<vmem>>, %arg12: memref<1x32xf32, #tpu.memory_space<vmem>>, %arg13: memref<32x4xbf16, #tpu.memory_space<vmem>>, %arg14: memref<1x4xf32, #tpu.memory_space<vmem>>, %arg15: memref<1x24x128xf32, #tpu.memory_space<vmem>>) attributes {dimension_semantics = [#tpu.dimension_semantics<parallel>], iteration_bounds = array<i64: 4>, scalar_prefetch = 0 : i64, scratch_operands = 0 : i64, tpu.core_type = #tpu.core_type<tc>, window_params = [{transform_indices = @transform_0, window_bounds = array<i64: 1, 128, 32>}, {transform_indices = @transform_1, window_bounds = array<i64: 1, 192, 48>}, {transform_indices = @transform_2, window_bounds = array<i64: 1, 192, 192>}, {transform_indices = @transform_3, window_bounds = array<i64: 1, 128, 192>}, {transform_indices = @transform_4, window_bounds = array<i64: 1, 24, 128>}, {pipeline_mode = #tpu.pipeline_mode<synchronous>, transform_indices = @transform_5, window_bounds = array<i64: 48, 32>}, {pipeline_mode = #tpu.pipeline_mode<synchronous>, transform_indices = @transform_6, window_bounds = array<i64: 32, 32>}, {pipeline_mode = #tpu.pipeline_mode<synchronous>, transform_indices = @transform_7, window_bounds = array<i64: 32, 32>}, {pipeline_mode = #tpu.pipeline_mode<synchronous>, transform_indices = @transform_8, window_bounds = array<i64: 32, 32>}, {pipeline_mode = #tpu.pipeline_mode<synchronous>, transform_indices = @transform_9, window_bounds = array<i64: 1, 32>}, {pipeline_mode = #tpu.pipeline_mode<synchronous>, transform_indices = @transform_10, window_bounds = array<i64: 32, 32>}, {pipeline_mode = #tpu.pipeline_mode<synchronous>, transform_indices = @transform_11, window_bounds = array<i64: 1, 32>}, {pipeline_mode = #tpu.pipeline_mode<synchronous>, transform_indices = @transform_12, window_bounds = array<i64: 32, 4>}, {pipeline_mode = #tpu.pipeline_mode<synchronous>, transform_indices = @transform_13, window_bounds = array<i64: 1, 4>}, {transform_indices = @transform_14, window_bounds = array<i64: 1, 24, 128>}]} {
    %c0 = arith.constant 0 : index
    %c0_0 = arith.constant 0 : index
    %c0_1 = arith.constant 0 : index
    %0 = vector.load %arg2[%c0, %c0_0, %c0_1] : memref<1x192x48xbf16, #tpu.memory_space<vmem>>, vector<1x192x48xbf16>
    %1 = vector.shape_cast %0 : vector<1x192x48xbf16> to vector<192x48xbf16>
    %c0_2 = arith.constant 0 : index
    %c0_3 = arith.constant 0 : index
    %c0_4 = arith.constant 0 : index
    %2 = vector.load %arg3[%c0_2, %c0_3, %c0_4] : memref<1x192x192xbf16, #tpu.memory_space<vmem>>, vector<1x192x192xbf16>
    %3 = vector.shape_cast %2 : vector<1x192x192xbf16> to vector<192x192xbf16>
    %c0_5 = arith.constant 0 : index
    %c0_6 = arith.constant 0 : index
    %4 = vector.load %arg7[%c0_5, %c0_6] : memref<32x32xbf16, #tpu.memory_space<vmem>>, vector<32x32xbf16>
    %c0_7 = arith.constant 0 : index
    %c0_8 = arith.constant 0 : index
    %5 = vector.load %arg6[%c0_7, %c0_8] : memref<48x32xbf16, #tpu.memory_space<vmem>>, vector<48x32xbf16>
    %cst = arith.constant dense<0.000000e+00> : vector<192x32xf32>
    %6 = tpu.matmul %1, %5, %cst {dimension_numbers = #tpu.dot_dimension_numbers<[1], [0], [0], [1], [0, 0, 1, 1], [], []>} : vector<192x48xbf16>, vector<48x32xbf16>, vector<192x32xf32> -> vector<192x32xf32>
    %cst_9 = arith.constant 0.000000e+00 : f32
    %7 = vector.broadcast %cst_9 : f32 to vector<192x32xf32>
    %8 = arith.maximumf %6, %7 : vector<192x32xf32>
    %9 = arith.truncf %8 : vector<192x32xf32> to vector<192x32xbf16>
    %cst_10 = arith.constant dense<0.000000e+00> : vector<192x32xf32>
    %10 = tpu.matmul %3, %9, %cst_10 {dimension_numbers = #tpu.dot_dimension_numbers<[1], [0], [0], [1], [0, 0, 1, 1], [], []>} : vector<192x192xbf16>, vector<192x32xbf16>, vector<192x32xf32> -> vector<192x32xf32>
    %11 = arith.truncf %10 : vector<192x32xf32> to vector<192x32xbf16>
    %cst_11 = arith.constant dense<0.000000e+00> : vector<192x32xf32>
    %12 = tpu.matmul %11, %4, %cst_11 {dimension_numbers = #tpu.dot_dimension_numbers<[1], [0], [0], [1], [0, 0, 1, 1], [], []>} : vector<192x32xbf16>, vector<32x32xbf16>, vector<192x32xf32> -> vector<192x32xf32>
    %13 = arith.addf %6, %12 : vector<192x32xf32>
    %cst_12 = arith.constant 0.000000e+00 : f32
    %14 = vector.broadcast %cst_12 : f32 to vector<192x32xf32>
    %15 = arith.maximumf %13, %14 : vector<192x32xf32>
    %16 = arith.truncf %15 : vector<192x32xf32> to vector<192x32xbf16>
    %cst_13 = arith.constant dense<0.000000e+00> : vector<192x32xf32>
    %17 = tpu.matmul %3, %16, %cst_13 {dimension_numbers = #tpu.dot_dimension_numbers<[1], [0], [0], [1], [0, 0, 1, 1], [], []>} : vector<192x192xbf16>, vector<192x32xbf16>, vector<192x32xf32> -> vector<192x32xf32>
    %18 = arith.truncf %17 : vector<192x32xf32> to vector<192x32xbf16>
    %cst_14 = arith.constant dense<0.000000e+00> : vector<192x32xf32>
    %19 = tpu.matmul %18, %4, %cst_14 {dimension_numbers = #tpu.dot_dimension_numbers<[1], [0], [0], [1], [0, 0, 1, 1], [], []>} : vector<192x32xbf16>, vector<32x32xbf16>, vector<192x32xf32> -> vector<192x32xf32>
    %20 = arith.addf %6, %19 : vector<192x32xf32>
    %cst_15 = arith.constant 0.000000e+00 : f32
    %21 = vector.broadcast %cst_15 : f32 to vector<192x32xf32>
    %22 = arith.maximumf %20, %21 : vector<192x32xf32>
    %c0_16 = arith.constant 0 : index
    %c0_17 = arith.constant 0 : index
    %c0_18 = arith.constant 0 : index
    %23 = vector.load %arg4[%c0_16, %c0_17, %c0_18] : memref<1x128x192xbf16, #tpu.memory_space<vmem>>, vector<1x128x192xbf16>
    %24 = vector.shape_cast %23 : vector<1x128x192xbf16> to vector<128x192xbf16>
    %25 = arith.truncf %22 : vector<192x32xf32> to vector<192x32xbf16>
    %cst_19 = arith.constant dense<0.000000e+00> : vector<128x32xf32>
    %26 = tpu.matmul %24, %25, %cst_19 {dimension_numbers = #tpu.dot_dimension_numbers<[1], [0], [0], [1], [0, 0, 1, 1], [], []>} : vector<128x192xbf16>, vector<192x32xbf16>, vector<128x32xf32> -> vector<128x32xf32>
    %c0_20 = arith.constant 0 : index
    %c0_21 = arith.constant 0 : index
    %c0_22 = arith.constant 0 : index
    %27 = vector.load %arg1[%c0_20, %c0_21, %c0_22] : memref<1x128x32xbf16, #tpu.memory_space<vmem>>, vector<1x128x32xbf16>
    %28 = vector.shape_cast %27 : vector<1x128x32xbf16> to vector<128x32xbf16>
    %c0_23 = arith.constant 0 : index
    %c0_24 = arith.constant 0 : index
    %29 = vector.load %arg8[%c0_23, %c0_24] : memref<32x32xbf16, #tpu.memory_space<vmem>>, vector<32x32xbf16>
    %cst_25 = arith.constant dense<0.000000e+00> : vector<128x32xf32>
    %30 = tpu.matmul %28, %29, %cst_25 {dimension_numbers = #tpu.dot_dimension_numbers<[1], [0], [0], [1], [0, 0, 1, 1], [], []>} : vector<128x32xbf16>, vector<32x32xbf16>, vector<128x32xf32> -> vector<128x32xf32>
    %31 = arith.truncf %26 : vector<128x32xf32> to vector<128x32xbf16>
    %c0_26 = arith.constant 0 : index
    %c0_27 = arith.constant 0 : index
    %32 = vector.load %arg9[%c0_26, %c0_27] : memref<32x32xbf16, #tpu.memory_space<vmem>>, vector<32x32xbf16>
    %cst_28 = arith.constant dense<0.000000e+00> : vector<128x32xf32>
    %33 = tpu.matmul %31, %32, %cst_28 {dimension_numbers = #tpu.dot_dimension_numbers<[1], [0], [0], [1], [0, 0, 1, 1], [], []>} : vector<128x32xbf16>, vector<32x32xbf16>, vector<128x32xf32> -> vector<128x32xf32>
    %34 = arith.addf %30, %33 : vector<128x32xf32>
    %c0_29 = arith.constant 0 : index
    %c0_30 = arith.constant 0 : index
    %35 = vector.load %arg10[%c0_29, %c0_30] : memref<1x32xf32, #tpu.memory_space<vmem>>, vector<1x32xf32>
    %36 = vector.broadcast %35 : vector<1x32xf32> to vector<128x32xf32>
    %37 = arith.addf %34, %36 : vector<128x32xf32>
    %cst_31 = arith.constant 0.000000e+00 : f32
    %38 = vector.broadcast %cst_31 : f32 to vector<128x32xf32>
    %39 = arith.maximumf %37, %38 : vector<128x32xf32>
    %c0_32 = arith.constant 0 : index
    %c0_33 = arith.constant 0 : index
    %c0_34 = arith.constant 0 : index
    %40 = vector.load %arg5[%c0_32, %c0_33, %c0_34] : memref<1x24x128xbf16, #tpu.memory_space<vmem>>, vector<1x24x128xbf16>
    %41 = vector.shape_cast %40 : vector<1x24x128xbf16> to vector<24x128xbf16>
    %42 = arith.truncf %39 : vector<128x32xf32> to vector<128x32xbf16>
    %cst_35 = arith.constant dense<0.000000e+00> : vector<24x32xf32>
    %43 = tpu.matmul %41, %42, %cst_35 {dimension_numbers = #tpu.dot_dimension_numbers<[1], [0], [0], [1], [0, 0, 1, 1], [], []>} : vector<24x128xbf16>, vector<128x32xbf16>, vector<24x32xf32> -> vector<24x32xf32>
    %44 = arith.truncf %43 : vector<24x32xf32> to vector<24x32xbf16>
    %c0_36 = arith.constant 0 : index
    %c0_37 = arith.constant 0 : index
    %45 = vector.load %arg11[%c0_36, %c0_37] : memref<32x32xbf16, #tpu.memory_space<vmem>>, vector<32x32xbf16>
    %cst_38 = arith.constant dense<0.000000e+00> : vector<24x32xf32>
    %46 = tpu.matmul %44, %45, %cst_38 {dimension_numbers = #tpu.dot_dimension_numbers<[1], [0], [0], [1], [0, 0, 1, 1], [], []>} : vector<24x32xbf16>, vector<32x32xbf16>, vector<24x32xf32> -> vector<24x32xf32>
    %c0_39 = arith.constant 0 : index
    %c0_40 = arith.constant 0 : index
    %47 = vector.load %arg12[%c0_39, %c0_40] : memref<1x32xf32, #tpu.memory_space<vmem>>, vector<1x32xf32>
    %48 = vector.broadcast %47 : vector<1x32xf32> to vector<24x32xf32>
    %49 = arith.addf %46, %48 : vector<24x32xf32>
    %cst_41 = arith.constant 0.000000e+00 : f32
    %50 = vector.broadcast %cst_41 : f32 to vector<24x32xf32>
    %51 = arith.maximumf %49, %50 : vector<24x32xf32>
    %52 = arith.truncf %51 : vector<24x32xf32> to vector<24x32xbf16>
    %c0_42 = arith.constant 0 : index
    %c0_43 = arith.constant 0 : index
    %53 = vector.load %arg13[%c0_42, %c0_43] : memref<32x4xbf16, #tpu.memory_space<vmem>>, vector<32x4xbf16>
    %cst_44 = arith.constant dense<0.000000e+00> : vector<24x4xf32>
    %54 = tpu.matmul %52, %53, %cst_44 {dimension_numbers = #tpu.dot_dimension_numbers<[1], [0], [0], [1], [0, 0, 1, 1], [], []>} : vector<24x32xbf16>, vector<32x4xbf16>, vector<24x4xf32> -> vector<24x4xf32>
    %c0_45 = arith.constant 0 : index
    %c0_46 = arith.constant 0 : index
    %55 = vector.load %arg14[%c0_45, %c0_46] : memref<1x4xf32, #tpu.memory_space<vmem>>, vector<1x4xf32>
    %56 = vector.broadcast %55 : vector<1x4xf32> to vector<24x4xf32>
    %57 = arith.addf %54, %56 : vector<24x4xf32>
    %cst_47 = arith.constant 0.000000e+00 : f32
    %58 = vector.broadcast %cst_47 : f32 to vector<24x4xf32>
    %59 = arith.subf %58, %57 : vector<24x4xf32>
    %60 = math.exp %59 : vector<24x4xf32>
    %cst_48 = arith.constant 1.000000e+00 : f32
    %61 = vector.broadcast %cst_48 : f32 to vector<24x4xf32>
    %62 = arith.addf %61, %60 : vector<24x4xf32>
    %63 = tpu.reciprocal %62 {approx = true} : vector<24x4xf32> -> vector<24x4xf32>
    %cst_49 = arith.constant 0.000000e+00 : f32
    %64 = vector.broadcast %cst_49 : f32 to vector<24x92xf32>
    %65 = tpu.concatenate %63, %43, %64 in 1 : vector<24x4xf32>, vector<24x32xf32>, vector<24x92xf32> -> vector<24x128xf32>
    %c0_50 = arith.constant 0 : index
    %c0_51 = arith.constant 0 : index
    %c0_52 = arith.constant 0 : index
    %66 = vector.load %arg15[%c0_50, %c0_51, %c0_52] : memref<1x24x128xf32, #tpu.memory_space<vmem>>, vector<1x24x128xf32>
    %67 = vector.shape_cast %66 : vector<1x24x128xf32> to vector<24x128xf32>
    %68 = vector.shape_cast %65 : vector<24x128xf32> to vector<1x24x128xf32>
    tpu.vector_store %arg15[%c0_50, %c0_51, %c0_52], %68 {strides = array<i32>} : memref<1x24x128xf32, #tpu.memory_space<vmem>>, vector<1x24x128xf32>,
    return
  }
  func.func @transform_0(%arg0: i32) -> (i32, i32, i32) {
    %c0_i32 = arith.constant 0 : i32
    %c0_i32_0 = arith.constant 0 : i32
    %c0_i32_1 = arith.constant 0 : i32
    return %arg0, %c0_i32, %c0_i32_0 : i32, i32, i32
  }
  func.func @transform_1(%arg0: i32) -> (i32, i32, i32) {
    %c0_i32 = arith.constant 0 : i32
    %c0_i32_0 = arith.constant 0 : i32
    %c0_i32_1 = arith.constant 0 : i32
    return %arg0, %c0_i32, %c0_i32_0 : i32, i32, i32
  }
  func.func @transform_2(%arg0: i32) -> (i32, i32, i32) {
    %c0_i32 = arith.constant 0 : i32
    %c0_i32_0 = arith.constant 0 : i32
    %c0_i32_1 = arith.constant 0 : i32
    return %arg0, %c0_i32, %c0_i32_0 : i32, i32, i32
  }
  func.func @transform_3(%arg0: i32) -> (i32, i32, i32) {
    %c0_i32 = arith.constant 0 : i32
    %c0_i32_0 = arith.constant 0 : i32
    %c0_i32_1 = arith.constant 0 : i32
    return %arg0, %c0_i32, %c0_i32_0 : i32, i32, i32
  }
  func.func @transform_4(%arg0: i32) -> (i32, i32, i32) {
    %c0_i32 = arith.constant 0 : i32
    %c0_i32_0 = arith.constant 0 : i32
    %c0_i32_1 = arith.constant 0 : i32
    return %arg0, %c0_i32, %c0_i32_0 : i32, i32, i32
  }
  func.func @transform_5(%arg0: i32) -> (i32, i32) {
    %c0_i32 = arith.constant 0 : i32
    %c0_i32_0 = arith.constant 0 : i32
    %c0_i32_1 = arith.constant 0 : i32
    return %c0_i32, %c0_i32_0 : i32, i32
  }
  func.func @transform_6(%arg0: i32) -> (i32, i32) {
    %c0_i32 = arith.constant 0 : i32
    %c0_i32_0 = arith.constant 0 : i32
    %c0_i32_1 = arith.constant 0 : i32
    return %c0_i32, %c0_i32_0 : i32, i32
  }
  func.func @transform_7(%arg0: i32) -> (i32, i32) {
    %c0_i32 = arith.constant 0 : i32
    %c0_i32_0 = arith.constant 0 : i32
    %c0_i32_1 = arith.constant 0 : i32
    return %c0_i32, %c0_i32_0 : i32, i32
  }
  func.func @transform_8(%arg0: i32) -> (i32, i32) {
    %c0_i32 = arith.constant 0 : i32
    %c0_i32_0 = arith.constant 0 : i32
    %c0_i32_1 = arith.constant 0 : i32
    return %c0_i32, %c0_i32_0 : i32, i32
  }
  func.func @transform_9(%arg0: i32) -> (i32, i32) {
    %c0_i32 = arith.constant 0 : i32
    %c0_i32_0 = arith.constant 0 : i32
    %c0_i32_1 = arith.constant 0 : i32
    return %c0_i32, %c0_i32_0 : i32, i32
  }
  func.func @transform_10(%arg0: i32) -> (i32, i32) {
    %c0_i32 = arith.constant 0 : i32
    %c0_i32_0 = arith.constant 0 : i32
    %c0_i32_1 = arith.constant 0 : i32
    return %c0_i32, %c0_i32_0 : i32, i32
  }
  func.func @transform_11(%arg0: i32) -> (i32, i32) {
    %c0_i32 = arith.constant 0 : i32
    %c0_i32_0 = arith.constant 0 : i32
    %c0_i32_1 = arith.constant 0 : i32
    return %c0_i32, %c0_i32_0 : i32, i32
  }
  func.func @transform_12(%arg0: i32) -> (i32, i32) {
    %c0_i32 = arith.constant 0 : i32
    %c0_i32_0 = arith.constant 0 : i32
    %c0_i32_1 = arith.constant 0 : i32
    return %c0_i32, %c0_i32_0 : i32, i32
  }
  func.func @transform_13(%arg0: i32) -> (i32, i32) {
    %c0_i32 = arith.constant 0 : i32
    %c0_i32_0 = arith.constant 0 : i32
    %c0_i32_1 = arith.constant 0 : i32
    return %c0_i32, %c0_i32_0 : i32, i32
  }
  func.func @transform_14(%arg0: i32) -> (i32, i32, i32) {
    %c0_i32 = arith.constant 0 : i32
    %c0_i32_0 = arith.constant 0 : i32
    %c0_i32_1 = arith.constant 0 : i32
    return %arg0, %c0_i32, %c0_i32_0 : i32, i32, i32
  }
}

module attributes {stable_mosaic.version = 11 : i64} {
  func.func @mpnn_kernel(%arg0: i32, %arg1: memref<1x128x32xbf16, #tpu.memory_space<vmem>>, %arg2: memref<1x192x48xbf16, #tpu.memory_space<vmem>>, %arg3: memref<1x192x192xbf16, #tpu.memory_space<vmem>>, %arg4: memref<1x128x192xbf16, #tpu.memory_space<vmem>>, %arg5: memref<1x24x128xbf16, #tpu.memory_space<vmem>>, %arg6: memref<48x32xbf16, #tpu.memory_space<vmem>>, %arg7: memref<32x32xbf16, #tpu.memory_space<vmem>>, %arg8: memref<32x32xbf16, #tpu.memory_space<vmem>>, %arg9: memref<32x32xbf16, #tpu.memory_space<vmem>>, %arg10: memref<1x32xf32, #tpu.memory_space<vmem>>, %arg11: memref<32x32xbf16, #tpu.memory_space<vmem>>, %arg12: memref<1x32xf32, #tpu.memory_space<vmem>>, %arg13: memref<32x4xbf16, #tpu.memory_space<vmem>>, %arg14: memref<1x4xf32, #tpu.memory_space<vmem>>, %arg15: memref<1x24x128xf32, #tpu.memory_space<vmem>>) attributes {dimension_semantics = [#tpu.dimension_semantics<parallel>], iteration_bounds = array<i64: 4>, scalar_prefetch = 0 : i64, scratch_operands = 0 : i64, tpu.core_type = #tpu.core_type<tc>, window_params = [{transform_indices = @transform_0, window_bounds = array<i64: 1, 128, 32>}, {transform_indices = @transform_1, window_bounds = array<i64: 1, 192, 48>}, {transform_indices = @transform_2, window_bounds = array<i64: 1, 192, 192>}, {transform_indices = @transform_3, window_bounds = array<i64: 1, 128, 192>}, {transform_indices = @transform_4, window_bounds = array<i64: 1, 24, 128>}, {pipeline_mode = #tpu.pipeline_mode<synchronous>, transform_indices = @transform_5, window_bounds = array<i64: 48, 32>}, {pipeline_mode = #tpu.pipeline_mode<synchronous>, transform_indices = @transform_6, window_bounds = array<i64: 32, 32>}, {pipeline_mode = #tpu.pipeline_mode<synchronous>, transform_indices = @transform_7, window_bounds = array<i64: 32, 32>}, {pipeline_mode = #tpu.pipeline_mode<synchronous>, transform_indices = @transform_8, window_bounds = array<i64: 32, 32>}, {pipeline_mode = #tpu.pipeline_mode<synchronous>, transform_indices = @transform_9, window_bounds = array<i64: 1, 32>}, {pipeline_mode = #tpu.pipeline_mode<synchronous>, transform_indices = @transform_10, window_bounds = array<i64: 32, 32>}, {pipeline_mode = #tpu.pipeline_mode<synchronous>, transform_indices = @transform_11, window_bounds = array<i64: 1, 32>}, {pipeline_mode = #tpu.pipeline_mode<synchronous>, transform_indices = @transform_12, window_bounds = array<i64: 32, 4>}, {pipeline_mode = #tpu.pipeline_mode<synchronous>, transform_indices = @transform_13, window_bounds = array<i64: 1, 4>}, {transform_indices = @transform_14, window_bounds = array<i64: 1, 24, 128>}]} {
    %c0 = arith.constant 0 : index
    %c0_0 = arith.constant 0 : index
    %c0_1 = arith.constant 0 : index
    %0 = vector.load %arg2[%c0, %c0_0, %c0_1] : memref<1x192x48xbf16, #tpu.memory_space<vmem>>, vector<1x192x48xbf16>
    %1 = vector.shape_cast %0 : vector<1x192x48xbf16> to vector<192x48xbf16>
    %c0_2 = arith.constant 0 : index
    %c0_3 = arith.constant 0 : index
    %c0_4 = arith.constant 0 : index
    %2 = vector.load %arg3[%c0_2, %c0_3, %c0_4] : memref<1x192x192xbf16, #tpu.memory_space<vmem>>, vector<1x192x192xbf16>
    %3 = vector.shape_cast %2 : vector<1x192x192xbf16> to vector<192x192xbf16>
    %c0_5 = arith.constant 0 : index
    %c0_6 = arith.constant 0 : index
    %4 = vector.load %arg7[%c0_5, %c0_6] : memref<32x32xbf16, #tpu.memory_space<vmem>>, vector<32x32xbf16>
    %c0_7 = arith.constant 0 : index
    %c0_8 = arith.constant 0 : index
    %5 = vector.load %arg6[%c0_7, %c0_8] : memref<48x32xbf16, #tpu.memory_space<vmem>>, vector<48x32xbf16>
    %cst = arith.constant dense<0.000000e+00> : vector<192x32xf32>
    %6 = tpu.matmul %1, %5, %cst {dimension_numbers = #tpu.dot_dimension_numbers<[1], [0], [0], [1], [0, 0, 1, 1], [], []>} : vector<192x48xbf16>, vector<48x32xbf16>, vector<192x32xf32> -> vector<192x32xf32>
    %cst_9 = arith.constant 0.000000e+00 : f32
    %7 = vector.broadcast %cst_9 : f32 to vector<192x32xf32>
    %8 = arith.maximumf %6, %7 : vector<192x32xf32>
    %9 = arith.truncf %8 : vector<192x32xf32> to vector<192x32xbf16>
    %cst_10 = arith.constant dense<0.000000e+00> : vector<192x32xf32>
    %10 = tpu.matmul %3, %9, %cst_10 {dimension_numbers = #tpu.dot_dimension_numbers<[1], [0], [0], [1], [0, 0, 1, 1], [], []>} : vector<192x192xbf16>, vector<192x32xbf16>, vector<192x32xf32> -> vector<192x32xf32>
    %11 = arith.truncf %10 : vector<192x32xf32> to vector<192x32xbf16>
    %cst_11 = arith.constant dense<0.000000e+00> : vector<192x32xf32>
    %12 = tpu.matmul %11, %4, %cst_11 {dimension_numbers = #tpu.dot_dimension_numbers<[1], [0], [0], [1], [0, 0, 1, 1], [], []>} : vector<192x32xbf16>, vector<32x32xbf16>, vector<192x32xf32> -> vector<192x32xf32>
    %13 = arith.addf %6, %12 : vector<192x32xf32>
    %cst_12 = arith.constant 0.000000e+00 : f32
    %14 = vector.broadcast %cst_12 : f32 to vector<192x32xf32>
    %15 = arith.maximumf %13, %14 : vector<192x32xf32>
    %16 = arith.truncf %15 : vector<192x32xf32> to vector<192x32xbf16>
    %cst_13 = arith.constant dense<0.000000e+00> : vector<192x32xf32>
    %17 = tpu.matmul %3, %16, %cst_13 {dimension_numbers = #tpu.dot_dimension_numbers<[1], [0], [0], [1], [0, 0, 1, 1], [], []>} : vector<192x192xbf16>, vector<192x32xbf16>, vector<192x32xf32> -> vector<192x32xf32>
    %18 = arith.truncf %17 : vector<192x32xf32> to vector<192x32xbf16>
    %cst_14 = arith.constant dense<0.000000e+00> : vector<192x32xf32>
    %19 = tpu.matmul %18, %4, %cst_14 {dimension_numbers = #tpu.dot_dimension_numbers<[1], [0], [0], [1], [0, 0, 1, 1], [], []>} : vector<192x32xbf16>, vector<32x32xbf16>, vector<192x32xf32> -> vector<192x32xf32>
    %20 = arith.addf %6, %19 : vector<192x32xf32>
    %cst_15 = arith.constant 0.000000e+00 : f32
    %21 = vector.broadcast %cst_15 : f32 to vector<192x32xf32>
    %22 = arith.maximumf %20, %21 : vector<192x32xf32>
    %c0_16 = arith.constant 0 : index
    %c0_17 = arith.constant 0 : index
    %c0_18 = arith.constant 0 : index
    %23 = vector.load %arg4[%c0_16, %c0_17, %c0_18] : memref<1x128x192xbf16, #tpu.memory_space<vmem>>, vector<1x128x192xbf16>
    %24 = vector.shape_cast %23 : vector<1x128x192xbf16> to vector<128x192xbf16>
    %25 = arith.truncf %22 : vector<192x32xf32> to vector<192x32xbf16>
    %cst_19 = arith.constant dense<0.000000e+00> : vector<128x32xf32>
    %26 = tpu.matmul %24, %25, %cst_19 {dimension_numbers = #tpu.dot_dimension_numbers<[1], [0], [0], [1], [0, 0, 1, 1], [], []>} : vector<128x192xbf16>, vector<192x32xbf16>, vector<128x32xf32> -> vector<128x32xf32>
    %c0_20 = arith.constant 0 : index
    %c0_21 = arith.constant 0 : index
    %c0_22 = arith.constant 0 : index
    %27 = vector.load %arg1[%c0_20, %c0_21, %c0_22] : memref<1x128x32xbf16, #tpu.memory_space<vmem>>, vector<1x128x32xbf16>
    %28 = vector.shape_cast %27 : vector<1x128x32xbf16> to vector<128x32xbf16>
    %c0_23 = arith.constant 0 : index
    %c0_24 = arith.constant 0 : index
    %29 = vector.load %arg8[%c0_23, %c0_24] : memref<32x32xbf16, #tpu.memory_space<vmem>>, vector<32x32xbf16>
    %cst_25 = arith.constant dense<0.000000e+00> : vector<128x32xf32>
    %30 = tpu.matmul %28, %29, %cst_25 {dimension_numbers = #tpu.dot_dimension_numbers<[1], [0], [0], [1], [0, 0, 1, 1], [], []>} : vector<128x32xbf16>, vector<32x32xbf16>, vector<128x32xf32> -> vector<128x32xf32>
    %31 = arith.truncf %26 : vector<128x32xf32> to vector<128x32xbf16>
    %c0_26 = arith.constant 0 : index
    %c0_27 = arith.constant 0 : index
    %32 = vector.load %arg9[%c0_26, %c0_27] : memref<32x32xbf16, #tpu.memory_space<vmem>>, vector<32x32xbf16>
    %cst_28 = arith.constant dense<0.000000e+00> : vector<128x32xf32>
    %33 = tpu.matmul %31, %32, %cst_28 {dimension_numbers = #tpu.dot_dimension_numbers<[1], [0], [0], [1], [0, 0, 1, 1], [], []>} : vector<128x32xbf16>, vector<32x32xbf16>, vector<128x32xf32> -> vector<128x32xf32>
    %34 = arith.addf %30, %33 : vector<128x32xf32>
    %c0_29 = arith.constant 0 : index
    %c0_30 = arith.constant 0 : index
    %35 = vector.load %arg10[%c0_29, %c0_30] : memref<1x32xf32, #tpu.memory_space<vmem>>, vector<1x32xf32>
    %36 = vector.broadcast %35 : vector<1x32xf32> to vector<128x32xf32>
    %37 = arith.addf %34, %36 : vector<128x32xf32>
    %cst_31 = arith.constant 0.000000e+00 : f32
    %38 = vector.broadcast %cst_31 : f32 to vector<128x32xf32>
    %39 = arith.maximumf %37, %38 : vector<128x32xf32>
    %c0_32 = arith.constant 0 : index
    %c0_33 = arith.constant 0 : index
    %c0_34 = arith.constant 0 : index
    %40 = vector.load %arg5[%c0_32, %c0_33, %c0_34] : memref<1x24x128xbf16, #tpu.memory_space<vmem>>, vector<1x24x128xbf16>
    %41 = vector.shape_cast %40 : vector<1x24x128xbf16> to vector<24x128xbf16>
    %42 = arith.truncf %39 : vector<128x32xf32> to vector<128x32xbf16>
    %cst_35 = arith.constant dense<0.000000e+00> : vector<24x32xf32>
    %43 = tpu.matmul %41, %42, %cst_35 {dimension_numbers = #tpu.dot_dimension_numbers<[1], [0], [0], [1], [0, 0, 1, 1], [], []>} : vector<24x128xbf16>, vector<128x32xbf16>, vector<24x32xf32> -> vector<24x32xf32>
    %44 = arith.truncf %43 : vector<24x32xf32> to vector<24x32xbf16>
    %c0_36 = arith.constant 0 : index
    %c0_37 = arith.constant 0 : index
    %45 = vector.load %arg11[%c0_36, %c0_37] : memref<32x32xbf16, #tpu.memory_space<vmem>>, vector<32x32xbf16>
    %cst_38 = arith.constant dense<0.000000e+00> : vector<24x32xf32>
    %46 = tpu.matmul %44, %45, %cst_38 {dimension_numbers = #tpu.dot_dimension_numbers<[1], [0], [0], [1], [0, 0, 1, 1], [], []>} : vector<24x32xbf16>, vector<32x32xbf16>, vector<24x32xf32> -> vector<24x32xf32>
    %c0_39 = arith.constant 0 : index
    %c0_40 = arith.constant 0 : index
    %47 = vector.load %arg12[%c0_39, %c0_40] : memref<1x32xf32, #tpu.memory_space<vmem>>, vector<1x32xf32>
    %48 = vector.broadcast %47 : vector<1x32xf32> to vector<24x32xf32>
    %49 = arith.addf %46, %48 : vector<24x32xf32>
    %cst_41 = arith.constant 0.000000e+00 : f32
    %50 = vector.broadcast %cst_41 : f32 to vector<24x32xf32>
    %51 = arith.maximumf %49, %50 : vector<24x32xf32>
    %52 = arith.truncf %51 : vector<24x32xf32> to vector<24x32xbf16>
    %c0_42 = arith.constant 0 : index
    %c0_43 = arith.constant 0 : index
    %53 = vector.load %arg13[%c0_42, %c0_43] : memref<32x4xbf16, #tpu.memory_space<vmem>>, vector<32x4xbf16>
    %cst_44 = arith.constant dense<0.000000e+00> : vector<24x4xf32>
    %54 = tpu.matmul %52, %53, %cst_44 {dimension_numbers = #tpu.dot_dimension_numbers<[1], [0], [0], [1], [0, 0, 1, 1], [], []>} : vector<24x32xbf16>, vector<32x4xbf16>, vector<24x4xf32> -> vector<24x4xf32>
    %c0_45 = arith.constant 0 : index
    %c0_46 = arith.constant 0 : index
    %55 = vector.load %arg14[%c0_45, %c0_46] : memref<1x4xf32, #tpu.memory_space<vmem>>, vector<1x4xf32>
    %56 = vector.broadcast %55 : vector<1x4xf32> to vector<24x4xf32>
    %57 = arith.addf %54, %56 : vector<24x4xf32>
    %cst_47 = arith.constant 0.000000e+00 : f32
    %58 = vector.broadcast %cst_47 : f32 to vector<24x4xf32>
    %59 = arith.subf %58, %57 : vector<24x4xf32>
    %60 = math.exp %59 : vector<24x4xf32>
    %cst_48 = arith.constant 1.000000e+00 : f32
    %61 = vector.broadcast %cst_48 : f32 to vector<24x4xf32>
    %62 = arith.addf %61, %60 : vector<24x4xf32>
    %63 = tpu.reciprocal %62 {approx = true} : vector<24x4xf32> -> vector<24x4xf32>
    %cst_49 = arith.constant 0.000000e+00 : f32
    %64 = vector.broadcast %cst_49 : f32 to vector<24x92xf32>
    %65 = tpu.concatenate %63, %43, %64 in 1 : vector<24x4xf32>, vector<24x32xf32>, vector<24x92xf32> -> vector<24x128xf32>
    %c0_50 = arith.constant 0 : index
    %c0_51 = arith.constant 0 : index
    %c0_52 = arith.constant 0 : index
    %66 = vector.load %arg15[%c0_50, %c0_51, %c0_52] : memref<1x24x128xf32, #tpu.memory_space<vmem>>, vector<1x24x128xf32>
    %67 = vector.shape_cast %66 : vector<1x24x128xf32> to vector<24x128xf32>
    %68 = vector.shape_cast %65 : vector<24x128xf32> to vector<1x24x128xf32>
    tpu.vector_store %arg15[%c0_50, %c0_51, %c0_52], %68 {strides = array<i32>} : memref<1x24x128xf32, #tpu.memory_space<vmem>>, vector<1x24x128xf32>,
    return
  }
  func.func @transform_0(%arg0: i32) -> (i32, i32, i32) {
    %c0_i32 = arith.constant 0 : i32
    %c0_i32_0 = arith.constant 0 : i32
    %c0_i32_1 = arith.constant 0 : i32
    return %arg0, %c0_i32, %c0_i32_0 : i32, i32, i32
  }
  func.func @transform_1(%arg0: i32) -> (i32, i32, i32) {
    %c0_i32 = arith.constant 0 : i32
    %c0_i32_0 = arith.constant 0 : i32
    %c0_i32_1 = arith.constant 0 : i32
    return %arg0, %c0_i32, %c0_i32_0 : i32, i32, i32
  }
  func.func @transform_2(%arg0: i32) -> (i32, i32, i32) {
    %c0_i32 = arith.constant 0 : i32
    %c0_i32_0 = arith.constant 0 : i32
    %c0_i32_1 = arith.constant 0 : i32
    return %arg0, %c0_i32, %c0_i32_0 : i32, i32, i32
  }
  func.func @transform_3(%arg0: i32) -> (i32, i32, i32) {
    %c0_i32 = arith.constant 0 : i32
    %c0_i32_0 = arith.constant 0 : i32
    %c0_i32_1 = arith.constant 0 : i32
    return %arg0, %c0_i32, %c0_i32_0 : i32, i32, i32
  }
  func.func @transform_4(%arg0: i32) -> (i32, i32, i32) {
    %c0_i32 = arith.constant 0 : i32
    %c0_i32_0 = arith.constant 0 : i32
    %c0_i32_1 = arith.constant 0 : i32
    return %arg0, %c0_i32, %c0_i32_0 : i32, i32, i32
  }
  func.func @transform_5(%arg0: i32) -> (i32, i32) {
    %c0_i32 = arith.constant 0 : i32
    %c0_i32_0 = arith.constant 0 : i32
    %c0_i32_1 = arith.constant 0 : i32
    return %c0_i32, %c0_i32_0 : i32, i32
  }
  func.func @transform_6(%arg0: i32) -> (i32, i32) {
    %c0_i32 = arith.constant 0 : i32
    %c0_i32_0 = arith.constant 0 : i32
    %c0_i32_1 = arith.constant 0 : i32
    return %c0_i32, %c0_i32_0 : i32, i32
  }
  func.func @transform_7(%arg0: i32) -> (i32, i32) {
    %c0_i32 = arith.constant 0 : i32
    %c0_i32_0 = arith.constant 0 : i32
    %c0_i32_1 = arith.constant 0 : i32
    return %c0_i32, %c0_i32_0 : i32, i32
  }
  func.func @transform_8(%arg0: i32) -> (i32, i32) {
    %c0_i32 = arith.constant 0 : i32
    %c0_i32_0 = arith.constant 0 : i32
    %c0_i32_1 = arith.constant 0 : i32
    return %c0_i32, %c0_i32_0 : i32, i32
  }
  func.func @transform_9(%arg0: i32) -> (i32, i32) {
    %c0_i32 = arith.constant 0 : i32
    %c0_i32_0 = arith.constant 0 : i32
    %c0_i32_1 = arith.constant 0 : i32
    return %c0_i32, %c0_i32_0 : i32, i32
  }
  func.func @transform_10(%arg0: i32) -> (i32, i32) {
    %c0_i32 = arith.constant 0 : i32
    %c0_i32_0 = arith.constant 0 : i32
    %c0_i32_1 = arith.constant 0 : i32
    return %c0_i32, %c0_i32_0 : i32, i32
  }
  func.func @transform_11(%arg0: i32) -> (i32, i32) {
    %c0_i32 = arith.constant 0 : i32
    %c0_i32_0 = arith.constant 0 : i32
    %c0_i32_1 = arith.constant 0 : i32
    return %c0_i32, %c0_i32_0 : i32, i32
  }
  func.func @transform_12(%arg0: i32) -> (i32, i32) {
    %c0_i32 = arith.constant 0 : i32
    %c0_i32_0 = arith.constant 0 : i32
    %c0_i32_1 = arith.constant 0 : i32
    return %c0_i32, %c0_i32_0 : i32, i32
  }
  func.func @transform_13(%arg0: i32) -> (i32, i32) {
    %c0_i32 = arith.constant 0 : i32
    %c0_i32_0 = arith.constant 0 : i32
    %c0_i32_1 = arith.constant 0 : i32
    return %c0_i32, %c0_i32_0 : i32, i32
  }
  func.func @transform_14(%arg0: i32) -> (i32, i32, i32) {
    %c0_i32 = arith.constant 0 : i32
    %c0_i32_0 = arith.constant 0 : i32
    %c0_i32_1 = arith.constant 0 : i32
    return %arg0, %c0_i32, %c0_i32_0 : i32, i32, i32
  }
}

</mosaic_0001>

<bundles_post_ra>
// kernel: tpu_custom_call.1
= control target key start
LH: loop header
LB: loop body
LE: loop exit
PB: predicated region body
PF: predicated region fallthrough
CT: control target
= control target key end

     0   :  { %s4086_s0 = inlined_call_operand.vmem [shape: bf16[4,128,32], index: 0, kind: input, shape index: {}]   ;;  %s4087_s1 = inlined_call_operand.vmem [shape: bf16[4,192,48], index: 1, kind: input, shape index: {}]   ;;  %s4088_s2 = inlined_call_operand.vmem [shape: bf16[4,192,192], index: 2, kind: input, shape index: {}]   ;;  %s4089_s3 = inlined_call_operand.vmem [shape: bf16[4,128,192], index: 3, kind: input, shape index: {}]   ;;  %s4090_s4 = inlined_call_operand.vmem [shape: bf16[4,24,128], index: 4, kind: input, shape index: {}]   ;;  %s4091_s5 = inlined_call_operand.vmem [shape: bf16[48,32], index: 5, kind: input, shape index: {}]   ;;  %s4092_s6 = inlined_call_operand.vmem [shape: bf16[32,32], index: 6, kind: input, shape index: {}]   ;;  %s4093_s7 = inlined_call_operand.vmem [shape: bf16[32,32], index: 7, kind: input, shape index: {}]   ;;  %s4094_s8 = inlined_call_operand.vmem [shape: bf16[32,32], index: 8, kind: input, shape index: {}]   ;;  %s4095_s9 = inlined_call_operand.vmem [shape: f32[1,32], index: 9, kind: input, shape index: {}]   ;;  %s4096_s10 = inlined_call_operand.vmem [shape: bf16[32,32], index: 10, kind: input, shape index: {}]   ;;  %s4097_s11 = inlined_call_operand.vmem [shape: f32[1,32], index: 11, kind: input, shape index: {}]   ;;  %s4098_s12 = inlined_call_operand.vmem [shape: bf16[32,4], index: 12, kind: input, shape index: {}]   ;;  %s4099_s13 = inlined_call_operand.vmem [shape: f32[1,4], index: 13, kind: input, shape index: {}]   ;;  %s4100_s14 = inlined_call_operand.hbm [shape: f32[4,24,128], index: 14, kind: output, shape index: {}]  }
   0x1   :  { %4116 = sst [smem:[#allocation19_spill]] %s4086_s0 }
   0x2   :  { %4117 = sst [smem:[#allocation20_spill]] %s4087_s1 }
   0x3   :  { %19 = vsyncpa [#allocation3], 0 }
   0x4   :  { %21 = vsyncpa [#allocation3 + $0x1], 0  ;;  %s3475_s29 = smov 0   ;;  %s3477_s30 = smov 0  }
   0x5   :  { %s3479_s15 = smov 0   ;;  %s3481_s16 = smov 0  }
   0x6 LB: > { %4118 = sst [smem:[#allocation5_spill]] %s3389_s15  ;;  %s3496_s17 = sadd.s32 4294967295, %s3393_s16   ;;  %s3393_s16 = sphi %s3481_s16, %s4153_s16   ;;  %s3389_s15 = sphi %s3479_s15, %s4150_s15   ;;  %s3385_s30 = sphi %s3477_s30, %s4152_s30   ;;  %s3381_s29 = sphi %s3475_s29, %s4151_s29  }
   0x7   : > { %s2753_s18 = sadd.s32 4294967294, %s3393_s16   ;;  %s3500_s19 = sadd.s32 1, %s3393_s16  }
   0x8   : > { %s353_s20 = sadd.s32 1, %s3389_s15  ;;  %s350_s21 = ssub.s32 %s3393_s16, %s3500_s19 }
   0x9   : > { %p363_p0 = scmp.ne.s32.totalorder %s3389_s15, %s3385_s30  ;;  %p351_p1 = scmp.eq.s32.totalorder %s350_s21, 0 }
   0xa   : > { %p364_p2 = scmp.eq.s32.totalorder %s3496_s17, 3  ;;  %p369_p3 = scmp.ne.s32.totalorder %s3385_s30, %s3381_s29 }
   0xb   : > { %p370_p4 = scmp.eq.s32.totalorder %s2753_s18, 3  ;;  %p2756_p7 = scmp.ge.s32.totalorder %s3393_s16, 1 }
   0xc   : > { %s3511_s22 = scalar_select %p351_p1, %s3389_s15, %s353_s20  }
   0xd   : > { %p3513_p5 = por %p364_p2, %p363_p0  ;;  %p3517_p6 = por %p370_p4, %p369_p3 }
   0xe   : > { %4119 = sst [smem:[#allocation6_spill]] %s3511_s22  ;;  %p455_p8 = scmp.lt.s32.totalorder %s3393_s16, 5 }
  0x10   : > { %p456_p9 = pnand %p2756_p7, %p455_p8 }
  0x12   : > { %459 = sbr.rel (%p456_p9) target bundleno = 2501 (0x9c5), region = 76 }
  0x17   : > { %v3226_v0 = vld [vmem:[%s4091_s5 + $0x10] sm:$0xff]   ;;  %p521_p10 = scmp.lt.s32.totalorder %s3496_s17, 3  ;;  %v3227_v1 = vld [vmem:[%s4091_s5 + $0x8] sm:$0xff]   ;;  %vm683_vm0 = vcmask 392192   ;;  %v3228_v2 = vld [vmem:[%s4091_s5] sm:$0xff]   ;;  %s4122_s1 = sld [smem:[#allocation20_spill]] }
  0x18   : > { %3016 = vmatprep.subr.bf16.mxu0 %v3226_v0  ;;  %v4102_v15 = vmov 0   ;;  %vm993_vm1 = vcmask 523264   ;;  %vm1183_vm2 = vcmask 261120   ;;  %s4148_s0 = sld [smem:[#allocation19_spill]]  ;;  %vm2618_vm3 = vcmask 31744  }
  0x19   : > { %s3531_s18 = scalar_select %p521_p10, %s3496_s17, 3  ;;  %3017 = vmatpush3.bf16.msra.mxu0 %v3226_v0  ;;  %1030 = vmatprep.subr.bf16.mxu1 %v4102_v15  ;;  %vm2622_vm4 = vcmask 293888  }
  0x1a   : > { %3018 = vmatprep.subr.bf16.mxu0 %v3227_v1 }
  0x1b   : > { %s3179_s25 = smul.u32 96, %s3531_s18  ;;  %s2933_s28 = sshll.u32 %s3531_s18, 6 }
  0x1c   : > { %s3180_s22 = smul.u32 192, %s3531_s18 }
  0x1d   : > { %s530_s15 = scalar_lea.vmem %s4122_s1, %s3179_s25  ;;  %3019 = vmatpush3.bf16.msra.mxu0 %v3227_v1  ;;  %s3181_s26 = smul.u32 12, %s3531_s18 }
  0x1e   : > { %v3229_v3 = vld [vmem:[%s530_s15] sm:$0xff]   ;;  %3020 = vmatprep.subr.bf16.mxu0 %v3228_v2  ;;  %v3230_v4 = vld [vmem:[%s530_s15 + $0x8] sm:$0xff]   ;;  %v3231_v5 = vld [vmem:[%s530_s15 + $0x10] sm:$0xff]   ;;  %s3557_s20 = scalar_lea.vmem %s4088_s2, %s3180_s22  ;;  %s2934_s22 = sshll.u32 %s3531_s18, 7 }
  0x1f   : > { %3022 = vmatprep.mubr.msk.bf16.mxu0 %vm683_vm0, %v3229_v3  ;;  %v3232_v6 = vld [vmem:[%s530_s15 + $0x18] sm:$0xff]   ;;  %v3233_v7 = vld [vmem:[%s530_s15 + $0x20] sm:$0xff]   ;;  %v3234_v8 = vld [vmem:[%s530_s15 + $0x28] sm:$0xff]   ;;  %s3937_s1 = scalar_lea.vmem %s4148_s0, %s2933_s28  ;;  %s3970_s28 = scalar_lea.vmem %s4090_s4, %s3181_s26 }
  0x20   : > { %v3235_v9 = vld [vmem:[%s530_s15 + $0x30] sm:$0xff]   ;;  %v3236_v10 = vld [vmem:[%s530_s15 + $0x38] sm:$0xff]   ;;  %v3237_v11 = vld [vmem:[%s530_s15 + $0x40] sm:$0xff]   ;;  %s3396_s26 = smov 4   ;;  %s518_s25 = sand.u32 1, %s3385_s30  }
  0x21   : > { %3021 = vmatpush3.bf16.msra.mxu0 %v3228_v2  ;;  %v3238_v12 = vld [vmem:[%s530_s15 + $0x48] sm:$0xff]   ;;  %v3239_v13 = vld [vmem:[%s530_s15 + $0x50] sm:$0xff]   ;;  %v3240_v14 = vld [vmem:[%s530_s15 + $0x58] sm:$0xff]  }
  0x22   : > { %v3560_v16 = vld [vmem:[%s3557_s20 + $0x4] ss:$8 sps:$4 sm:$0xff]  }
  0x23   : > { %2815 = vmatprep.mubr.msk.bf16.mxu1 %vm993_vm1, %v3560_v16 }
  0x24   : > { %3023 = vmatmul.mubr.msk.bf16.vlgmr.msra.gmra.mxu0 %vm683_vm0, %v3230_v4 }
  0x25   : > { %3026 = vmatprep.mubr.msk.bf16.mxu0 %vm683_vm0, %v3231_v5 }
  0x2c   : > { %3027 = vmatmul.mubr.msk.bf16.gmra.mxu0 %vm683_vm0, %v3232_v6 }
  0x2d   : > { %3030 = vmatprep.mubr.msk.bf16.mxu0 %vm683_vm0, %v3233_v7 }
  0x34   : > { %3031 = vmatmul.mubr.msk.bf16.gmra.mxu0 %vm683_vm0, %v3234_v8 }
  0x35   : > { %3034 = vmatprep.mubr.msk.bf16.mxu0 %vm683_vm0, %v3235_v9 }
  0x3c   : > { %3035 = vmatmul.mubr.msk.bf16.gmra.mxu0 %vm683_vm0, %v3236_v10 }
  0x3d   : > { %3038 = vmatprep.mubr.msk.bf16.mxu0 %vm683_vm0, %v3237_v11 }
  0x44   : > { %3039 = vmatmul.mubr.msk.bf16.gmra.mxu0 %vm683_vm0, %v3238_v12 }
  0x45   : > { %3042 = vmatprep.mubr.msk.bf16.mxu0 %vm683_vm0, %v3239_v13  ;;  %v3648_v13 = vld [vmem:[%s3557_s20] ss:$8 sps:$4 sm:$0xff]  }
  0x4c   : > { %3043 = vmatmul.mubr.msk.bf16.gmra.mxu0 %vm683_vm0, %v3240_v14  ;;  %v3651_v14 = vld [vmem:[%s3557_s20 + $0x14] ss:$8 sps:$4 sm:$0xff]  }
  0xe4   : > { %v3564_v17 = vpop.f32.mrf.mxu0 }
  0xe5   : > { %v851_v58 = vmax.f32 %v3564_v17, 0.0 }
  0xe6   : > { %v3566_v18 = vpop.f32.mrf.mxu0 }
  0xe7   : > { %v849_v62 = vmax.f32 %v3566_v18, 0.0 }
  0xe8   : > { %v3568_v19 = vpop.f32.mrf.mxu0 }
  0xe9   : > { %v852_v55 = vmax.f32 %v3568_v19, 0.0 }
  0xea   : > { %v3570_v20 = vpop.f32.mrf.mxu0 }
  0xeb   : > { %v850_v59 = vmax.f32 %v3570_v20, 0.0  ;;  %v874_v60 = vpack.c.bf16 %v852_v55, %v851_v58  ;;  %v3732_v55 = vld [vmem:[%s3557_s20 + $0xa4] ss:$8 sps:$4 sm:$0xff]  }
  0xec   : > { %v3572_v21 = vpop.f32.mrf.mxu0  ;;  %4131 = vst [vmem:[#allocation15_spill] sm:$0xff] %v3732_v55  ;;  %v3278_v58 = vld [vmem:[%s4092_s6] sm:$0xff]  }
  0xed   : > { %v855_v50 = vmax.f32 %v3572_v21, 0.0  ;;  %v873_v1 = vpack.c.bf16 %v850_v59, %v849_v62  ;;  %v3744_v59 = vld [vmem:[%s3557_s20 + $0xa0] ss:$8 sps:$4 sm:$0xff]   ;;  %v3755_v62 = vld [vmem:[%s3557_s20 + $0xb0] ss:$8 sps:$4 sm:$0xff]  }
  0xee   : > { %v3574_v22 = vpop.f32.mrf.mxu0  ;;  %4132 = vst [vmem:[#allocation16_spill] sm:$0xff] %v3744_v59  ;;  %4134 = vst [vmem:[#allocation18_spill] sm:$0xff] %v3755_v62 }
  0xef   : > { %v853_v54 = vmax.f32 %v3574_v22, 0.0 }
  0xf0   : > { %v3576_v23 = vpop.f32.mrf.mxu0 }
  0xf1   : > { %v856_v47 = vmax.f32 %v3576_v23, 0.0 }
  0xf2   : > { %v3578_v24 = vpop.f32.mrf.mxu0 }
  0xf3   : > { %v854_v51 = vmax.f32 %v3578_v24, 0.0  ;;  %v876_v52 = vpack.c.bf16 %v856_v47, %v855_v50  ;;  %v3705_v47 = vld [vmem:[%s3557_s20 + $0x74] ss:$8 sps:$4 sm:$0xff]   ;;  %v3714_v50 = vld [vmem:[%s3557_s20 + $0x84] ss:$8 sps:$4 sm:$0xff]  }
  0xf4   : > { %v3580_v25 = vpop.f32.mrf.mxu0  ;;  %4125 = vst [vmem:[#allocation9_spill] sm:$0xff] %v3705_v47  ;;  %4127 = vst [vmem:[#allocation11_spill] sm:$0xff] %v3714_v50 }
  0xf5   : > { %v859_v42 = vmax.f32 %v3580_v25, 0.0  ;;  %v875_v56 = vpack.c.bf16 %v854_v51, %v853_v54  ;;  %v3720_v51 = vld [vmem:[%s3557_s20 + $0x80] ss:$8 sps:$4 sm:$0xff]   ;;  %v3729_v54 = vld [vmem:[%s3557_s20 + $0x90] ss:$8 sps:$4 sm:$0xff]  }
  0xf6   : > { %v3582_v26 = vpop.f32.mrf.mxu0  ;;  %4128 = vst [vmem:[#allocation12_spill] sm:$0xff] %v3720_v51  ;;  %4130 = vst [vmem:[#allocation14_spill] sm:$0xff] %v3729_v54 }
  0xf7   : > { %v857_v46 = vmax.f32 %v3582_v26, 0.0 }
  0xf8   : > { %v3584_v27 = vpop.f32.mrf.mxu0 }
  0xf9   : > { %v860_v39 = vmax.f32 %v3584_v27, 0.0 }
  0xfa   : > { %v3586_v28 = vpop.f32.mrf.mxu0 }
  0xfb   : > { %v858_v43 = vmax.f32 %v3586_v28, 0.0  ;;  %v878_v44 = vpack.c.bf16 %v860_v39, %v859_v42  ;;  %v3678_v39 = vld [vmem:[%s3557_s20 + $0x44] ss:$8 sps:$4 sm:$0xff]   ;;  %v3687_v42 = vld [vmem:[%s3557_s20 + $0x54] ss:$8 sps:$4 sm:$0xff]  }
  0xfc   : > { %v3588_v29 = vpop.f32.mrf.mxu0 }
  0xfd   : > { %v863_v32 = vmax.f32 %v3588_v29, 0.0  ;;  %v877_v48 = vpack.c.bf16 %v858_v43, %v857_v46  ;;  %v3693_v43 = vld [vmem:[%s3557_s20 + $0x50] ss:$8 sps:$4 sm:$0xff]   ;;  %v3702_v46 = vld [vmem:[%s3557_s20 + $0x60] ss:$8 sps:$4 sm:$0xff]  }
  0xfe   : > { %v3590_v30 = vpop.f32.mrf.mxu0  ;;  %4124 = vst [vmem:[#allocation8_spill] sm:$0xff] %v3702_v46 }
  0xff   : > { %v861_v38 = vmax.f32 %v3590_v30, 0.0 }
 0x100   : > { %v3592_v31 = vpop.f32.mrf.mxu0 }
 0x101   : > { %4123 = vst [vmem:[#allocation7_spill] sm:$0xff] %v3592_v31  ;;  %v864_v33 = vmax.f32 %v3592_v31, 0.0 }
 0x102   : > { %v3596_v34 = vpop.f32.mrf.mxu0 }
 0x103   : > { %v862_v35 = vmax.f32 %v3596_v34, 0.0  ;;  %v880_v36 = vpack.c.bf16 %v864_v33, %v863_v32  ;;  %v3657_v32 = vld [vmem:[%s3557_s20 + $0x10] ss:$8 sps:$4 sm:$0xff]   ;;  %v3660_v33 = vld [vmem:[%s3557_s20 + $0x24] ss:$8 sps:$4 sm:$0xff]  }
 0x104   : > { %v3599_v37 = vpop.f32.mrf.mxu0 }
 0x105   : > { %1031 = vmatpush1.bf16.msra.mxu1 %v880_v36  ;;  %v879_v40 = vpack.c.bf16 %v862_v35, %v861_v38  ;;  %v867_v6 = vmax.f32 %v3599_v37, 0.0  ;;  %v3666_v35 = vld [vmem:[%s3557_s20 + $0x20] ss:$8 sps:$4 sm:$0xff]   ;;  %v3669_v36 = vld [vmem:[%s3557_s20 + $0x34] ss:$8 sps:$4 sm:$0xff]  }
 0x106   : > { %1032 = vmatprep.subr.bf16.mxu1 %v4102_v15  ;;  %v3604_v41 = vpop.f32.mrf.mxu0  ;;  %v3675_v38 = vld [vmem:[%s3557_s20 + $0x30] ss:$8 sps:$4 sm:$0xff]  }
 0x107   : > { %v865_v9 = vmax.f32 %v3604_v41, 0.0 }
 0x108   : > { %v3609_v45 = vpop.f32.mrf.mxu0 }
 0x109   : > { %1033 = vmatpush1.bf16.msra.mxu1 %v879_v40  ;;  %v868_v7 = vmax.f32 %v3609_v45, 0.0  ;;  %v3684_v40 = vld [vmem:[%s3557_s20 + $0x40] ss:$8 sps:$4 sm:$0xff]  }
 0x10a   : > { %1034 = vmatprep.subr.bf16.mxu1 %v4102_v15  ;;  %v3614_v49 = vpop.f32.mrf.mxu0 }
 0x10b   : > { %v866_v10 = vmax.f32 %v3614_v49, 0.0  ;;  %v882_v11 = vpack.c.bf16 %v868_v7, %v867_v6 }
 0x10c   : > { %v3619_v53 = vpop.f32.mrf.mxu0 }
 0x10d   : > { %1035 = vmatpush1.bf16.msra.mxu1 %v878_v44  ;;  %v871_v63 = vmax.f32 %v3619_v53, 0.0  ;;  %v881_v12 = vpack.c.bf16 %v866_v10, %v865_v9  ;;  %v3696_v44 = vld [vmem:[%s3557_s20 + $0x64] ss:$8 sps:$4 sm:$0xff]  }
 0x10e   : > { %1036 = vmatprep.subr.bf16.mxu1 %v4102_v15  ;;  %v3624_v57 = vpop.f32.mrf.mxu0 }
 0x10f   : > { %v869_v3 = vmax.f32 %v3624_v57, 0.0 }
 0x110   : > { %v3629_v61 = vpop.f32.mrf.mxu0 }
 0x111   : > { %1037 = vmatpush1.bf16.msra.mxu1 %v877_v48  ;;  %v872_v0 = vmax.f32 %v3629_v61, 0.0  ;;  %v3711_v48 = vld [vmem:[%s3557_s20 + $0x70] ss:$8 sps:$4 sm:$0xff]  }
 0x112   : > { %1038 = vmatprep.subr.bf16.mxu1 %v4102_v15  ;;  %v3635_v2 = vpop.f32.mrf.mxu0  ;;  %4126 = vst [vmem:[#allocation10_spill] sm:$0xff] %v3711_v48 }
 0x113   : > { %v870_v4 = vmax.f32 %v3635_v2, 0.0  ;;  %v884_v5 = vpack.c.bf16 %v872_v0, %v871_v63 }
 0x115   : > { %1039 = vmatpush1.bf16.msra.mxu1 %v876_v52  ;;  %v883_v8 = vpack.c.bf16 %v870_v4, %v869_v3  ;;  %v3723_v52 = vld [vmem:[%s3557_s20 + $0x94] ss:$8 sps:$4 sm:$0xff]  }
 0x116   : > { %1040 = vmatprep.subr.bf16.mxu1 %v4102_v15  ;;  %4129 = vst [vmem:[#allocation13_spill] sm:$0xff] %v3723_v52 }
 0x119   : > { %1041 = vmatpush1.bf16.msra.mxu1 %v875_v56  ;;  %v3277_v56 = vld [vmem:[%s4092_s6 + $0x8] sm:$0xff]  }
 0x11a   : > { %1042 = vmatprep.subr.bf16.mxu1 %v4102_v15  ;;  %3046 = vmatprep.subr.bf16.mxu0 %v3277_v56 }
 0x11b   : > { %3047 = vmatpush3.bf16.msra.mxu0 %v3277_v56 }
 0x11c   : > { %3048 = vmatprep.subr.bf16.mxu0 %v3278_v58 }
 0x11d   : > { %1043 = vmatpush1.bf16.msra.mxu1 %v874_v60  ;;  %v3747_v60 = vld [vmem:[%s3557_s20 + $0xb4] ss:$8 sps:$4 sm:$0xff]   ;;  %s3860_s20 = scalar_lea.vmem %s4089_s3, %s2934_s22  ;;  %s3182_s22 = smul.u32 384, %s3496_s17 }
 0x11e   : > { %1044 = vmatprep.subr.bf16.mxu1 %v4102_v15  ;;  %4133 = vst [vmem:[#allocation17_spill] sm:$0xff] %v3747_v60  ;;  %s4046_s17 = scalar_lea.sflag [#allocation3], %s518_s25 }
 0x11f   : > { %3049 = vmatpush3.bf16.msra.mxu0 %v3278_v58  ;;  %s4040_s15 = scalar_lea.hbm %s4100_s14, %s3182_s22 }
 0x120   : > { %1409 = vmatprep.subr.bf16.mxu0 %v4102_v15 }
 0x121   : > { %1045 = vmatpush1.bf16.msra.mxu1 %v873_v1 }
 0x122   : > { %1054 = vmatprep.subr.bf16.mxu1 %v4102_v15 }
 0x125   : > { %1055 = vmatpush2.bf16.msra.mxu1 %v884_v5 }
 0x126   : > { %1056 = vmatprep.subr.bf16.mxu1 %v4102_v15 }
 0x129   : > { %1057 = vmatpush2.bf16.msra.mxu1 %v883_v8 }
 0x12a   : > { %1058 = vmatprep.subr.bf16.mxu1 %v4102_v15 }
 0x12d   : > { %1059 = vmatpush2.bf16.msra.mxu1 %v882_v11 }
 0x12e   : > { %1060 = vmatprep.subr.bf16.mxu1 %v4102_v15 }
 0x131   : > { %1061 = vmatpush2.bf16.msra.mxu1 %v881_v12 }
 0x132   : > { %3074 = vmatprep.subr.bf16.mxu1 %v3277_v56 }
 0x134   : > { %1063 = vmatmul.mubr.bf16.vlgmr.msra.gmra.mxu1 %v3648_v13 }
 0x135   : > { %2816 = vmatprep.mubr.msk.bf16.mxu1 %vm993_vm1, %v3651_v14  ;;  %3075 = vmatpush3.bf16.msra.mxu1 %v3277_v56 }
 0x136   : > { %3076 = vmatprep.subr.bf16.mxu1 %v3278_v58 }
 0x139   : > { %3077 = vmatpush3.bf16.msra.mxu1 %v3278_v58 }
 0x13a   : > { %1887 = vmatprep.subr.bf16.mxu1 %v4102_v15 }
 0x13c   : > { %1071 = vmatmul.mubr.bf16.gmra.mxu1 %v3657_v32 }
 0x13d   : > { %2817 = vmatprep.mubr.msk.bf16.mxu1 %vm993_vm1, %v3660_v33 }
 0x144   : > { %1079 = vmatmul.mubr.bf16.gmra.mxu1 %v3666_v35 }
 0x145   : > { %2818 = vmatprep.mubr.msk.bf16.mxu1 %vm993_vm1, %v3669_v36 }
 0x14c   : > { %1087 = vmatmul.mubr.bf16.gmra.mxu1 %v3675_v38 }
 0x14d   : > { %2819 = vmatprep.mubr.msk.bf16.mxu1 %vm993_vm1, %v3678_v39 }
 0x154   : > { %1095 = vmatmul.mubr.bf16.gmra.mxu1 %v3684_v40 }
 0x155   : > { %2820 = vmatprep.mubr.msk.bf16.mxu1 %vm993_vm1, %v3687_v42 }
 0x15c   : > { %1103 = vmatmul.mubr.bf16.gmra.mxu1 %v3693_v43 }
 0x15d   : > { %2821 = vmatprep.mubr.msk.bf16.mxu1 %vm993_vm1, %v3696_v44 }
 0x164   : > { %1111 = vmatmul.mubr.bf16.gmra.mxu1 %v3702_v46  ;;  %v4135_v46 = vmov 0  }
 0x165   : > { %2822 = vmatprep.mubr.msk.bf16.mxu1 %vm993_vm1, %v3705_v47 }
 0x16c   : > { %1119 = vmatmul.mubr.bf16.gmra.mxu1 %v3711_v48 }
 0x16d   : > { %2823 = vmatprep.mubr.msk.bf16.mxu1 %vm993_vm1, %v3714_v50 }
 0x174   : > { %1127 = vmatmul.mubr.bf16.gmra.mxu1 %v3720_v51 }
 0x175   : > { %2824 = vmatprep.mubr.msk.bf16.mxu1 %vm993_vm1, %v3723_v52 }
 0x17c   : > { %1135 = vmatmul.mubr.bf16.gmra.mxu1 %v3729_v54 }
 0x17d   : > { %2825 = vmatprep.mubr.msk.bf16.mxu1 %vm993_vm1, %v3732_v55 }
 0x184   : > { %1143 = vmatmul.mubr.bf16.gmra.mxu1 %v3744_v59 }
 0x185   : > { %2826 = vmatprep.mubr.msk.bf16.mxu1 %vm993_vm1, %v3747_v60 }
 0x18c   : > { %1151 = vmatmul.mubr.bf16.gmra.mxu1 %v3755_v62 }
 0x1f4   : > { %v1064_v63 = vpop.f32.mrf.mxu1 }
 0x1f6   : > { %v1066_v0 = vpop.f32.mrf.mxu1 }
 0x1f8   : > { %v1067_v1 = vpop.f32.mrf.mxu1 }
 0x1f9   : > { %v1159_v3 = vpack.c.bf16 %v1067_v1, %v1064_v63 }
 0x1fa   : > { %v1069_v4 = vpop.f32.mrf.mxu1 }
 0x1fb   : > { %3050 = vmatprep.mubr.msk.bf16.mxu0 %vm1183_vm2, %v1159_v3 }
 0x1fc   : > { %v1072_v5 = vpop.f32.mrf.mxu1 }
 0x1fe   : > { %v1074_v6 = vpop.f32.mrf.mxu1 }
 0x200   : > { %v1075_v7 = vpop.f32.mrf.mxu1 }
 0x201   : > { %v1160_v8 = vpack.c.bf16 %v1075_v7, %v1072_v5 }
 0x202   : > { %v1077_v9 = vpop.f32.mrf.mxu1 }
 0x203   : > { %3051 = vmatmul.mubr.msk.bf16.vlgmr.msra.gmra.mxu0 %vm1183_vm2, %v1160_v8 }
 0x204   : > { %v1080_v10 = vpop.f32.mrf.mxu1 }
 0x206   : > { %v1082_v11 = vpop.f32.mrf.mxu1 }
 0x208   : > { %v1083_v12 = vpop.f32.mrf.mxu1 }
 0x209   : > { %v1161_v56 = vpack.c.bf16 %v1083_v12, %v1080_v10 }
 0x20a   : > { %v1085_v58 = vpop.f32.mrf.mxu1 }
 0x20b   : > { %3054 = vmatprep.mubr.msk.bf16.mxu0 %vm1183_vm2, %v1161_v56 }
 0x20c   : > { %v1088_v0 = vpop.f32.mrf.mxu1 }
 0x20e   : > { %v1090_v15 = vpop.f32.mrf.mxu1 }
 0x210   : > { %v1091_v63 = vpop.f32.mrf.mxu1 }
 0x211   : > { %v1162_v1 = vpack.c.bf16 %v1091_v63, %v1088_v0 }
 0x212   : > { %v1093_v4 = vpop.f32.mrf.mxu1 }
 0x213   : > { %3055 = vmatmul.mubr.msk.bf16.gmra.mxu0 %vm1183_vm2, %v1162_v1 }
 0x214   : > { %v1096_v3 = vpop.f32.mrf.mxu1 }
 0x216   : > { %v1098_v6 = vpop.f32.mrf.mxu1 }
 0x218   : > { %v1099_v5 = vpop.f32.mrf.mxu1 }
 0x219   : > { %v1163_v7 = vpack.c.bf16 %v1099_v5, %v1096_v3 }
 0x21a   : > { %v1101_v9 = vpop.f32.mrf.mxu1 }
 0x21b   : > { %3058 = vmatprep.mubr.msk.bf16.mxu0 %vm1183_vm2, %v1163_v7 }
 0x21c   : > { %v1104_v8 = vpop.f32.mrf.mxu1 }
 0x21e   : > { %v1106_v11 = vpop.f32.mrf.mxu1 }
 0x220   : > { %v1107_v10 = vpop.f32.mrf.mxu1 }
 0x221   : > { %v1164_v12 = vpack.c.bf16 %v1107_v10, %v1104_v8 }
 0x222   : > { %v1109_v58 = vpop.f32.mrf.mxu1 }
 0x223   : > { %3059 = vmatmul.mubr.msk.bf16.gmra.mxu0 %vm1183_vm2, %v1164_v12 }
 0x224   : > { %v1112_v15 = vpop.f32.mrf.mxu1 }
 0x226   : > { %v1114_v56 = vpop.f32.mrf.mxu1 }
 0x228   : > { %v1115_v0 = vpop.f32.mrf.mxu1 }
 0x229   : > { %v1165_v63 = vpack.c.bf16 %v1115_v0, %v1112_v15 }
 0x22a   : > { %v1117_v4 = vpop.f32.mrf.mxu1 }
 0x22b   : > { %3062 = vmatprep.mubr.msk.bf16.mxu0 %vm1183_vm2, %v1165_v63 }
 0x22c   : > { %v1120_v1 = vpop.f32.mrf.mxu1 }
 0x22e   : > { %v1122_v6 = vpop.f32.mrf.mxu1 }
 0x230   : > { %v1123_v3 = vpop.f32.mrf.mxu1 }
 0x231   : > { %v1166_v5 = vpack.c.bf16 %v1123_v3, %v1120_v1 }
 0x232   : > { %v1125_v9 = vpop.f32.mrf.mxu1 }
 0x233   : > { %3063 = vmatmul.mubr.msk.bf16.gmra.mxu0 %vm1183_vm2, %v1166_v5 }
 0x234   : > { %v1128_v7 = vpop.f32.mrf.mxu1 }
 0x236   : > { %v1130_v11 = vpop.f32.mrf.mxu1 }
 0x238   : > { %v1131_v8 = vpop.f32.mrf.mxu1 }
 0x239   : > { %v1167_v10 = vpack.c.bf16 %v1131_v8, %v1128_v7 }
 0x23a   : > { %v1133_v58 = vpop.f32.mrf.mxu1 }
 0x23b   : > { %3066 = vmatprep.mubr.msk.bf16.mxu0 %vm1183_vm2, %v1167_v10 }
 0x23c   : > { %v1136_v12 = vpop.f32.mrf.mxu1 }
 0x23e   : > { %v1138_v56 = vpop.f32.mrf.mxu1 }
 0x240   : > { %v1139_v15 = vpop.f32.mrf.mxu1 }
 0x241   : > { %v1168_v0 = vpack.c.bf16 %v1139_v15, %v1136_v12 }
 0x242   : > { %v1141_v4 = vpop.f32.mrf.mxu1 }
 0x243   : > { %3067 = vmatmul.mubr.msk.bf16.gmra.mxu0 %vm1183_vm2, %v1168_v0 }
 0x244   : > { %v1144_v63 = vpop.f32.mrf.mxu1 }
 0x246   : > { %v1146_v6 = vpop.f32.mrf.mxu1 }
 0x248   : > { %v1147_v1 = vpop.f32.mrf.mxu1 }
 0x249   : > { %v1169_v3 = vpack.c.bf16 %v1147_v1, %v1144_v63 }
 0x24a   : > { %v1149_v9 = vpop.f32.mrf.mxu1 }
 0x24b   : > { %3070 = vmatprep.mubr.msk.bf16.mxu0 %vm1183_vm2, %v1169_v3 }
 0x24c   : > { %v1152_v5 = vpop.f32.mrf.mxu1 }
 0x24e   : > { %v1154_v11 = vpop.f32.mrf.mxu1 }
 0x250   : > { %v1155_v7 = vpop.f32.mrf.mxu1 }
 0x251   : > { %v1170_v8 = vpack.c.bf16 %v1155_v7, %v1152_v5 }
 0x252   : > { %v1157_v58 = vpop.f32.mrf.mxu1 }
 0x253   : > { %3071 = vmatmul.mubr.msk.bf16.gmra.mxu0 %vm1183_vm2, %v1170_v8 }
 0x254   : > { %2841 = vmatprep.mubr.msk.bf16.mxu0 %vm993_vm1, %v3560_v16 }
 0x2c3   : > { %v3052_v10 = vpop.f32.mrf.mxu0 }
 0x2c5   : > { %v3772_v12 = vpop.f32.mrf.mxu0 }
 0x2c7   : > { %v3053_v56 = vpop.f32.mrf.mxu0 }
 0x2c9   : > { %v1257_v15 = vpop.f32.mrf.mxu0 }
 0x2d3   : > { %v3056_v0 = vpop.f32.mrf.mxu0 }
 0x2d5   : > { %v1270_v4 = vpop.f32.mrf.mxu0 }
 0x2d7   : > { %v3057_v63 = vpop.f32.mrf.mxu0 }
 0x2d9   : > { %v1273_v6 = vpop.f32.mrf.mxu0 }
 0x2e3   : > { %v3060_v1 = vpop.f32.mrf.mxu0 }
 0x2e4   : > { %v1359_v48 = vadd.f32 %v3060_v1, %v3580_v25 }
 0x2e5   : > { %v1286_v3 = vpop.f32.mrf.mxu0 }
 0x2e7   : > { %v3061_v9 = vpop.f32.mrf.mxu0 }
 0x2e8   : > { %v1360_v52 = vadd.f32 %v3061_v9, %v3584_v27 }
 0x2e9   : > { %v1289_v11 = vpop.f32.mrf.mxu0 }
 0x2f3   : > { %v3064_v5 = vpop.f32.mrf.mxu0 }
 0x2f4   : > { %v1363_v8 = vadd.f32 %v3064_v5, %v3588_v29  ;;  %v1384_v5 = vmax.f32 %v1360_v52, 0.0 }
 0x2f5   : > { %v1302_v7 = vpop.f32.mrf.mxu0 }
 0x2f6   : > { %v1387_v60 = vmax.f32 %v1363_v8, 0.0  ;;  %v1361_v59 = vadd.f32 %v1302_v7, %v3590_v30  ;;  %v1383_v8 = vmax.f32 %v1359_v48, 0.0  ;;  %v1357_v7 = vadd.f32 %v1286_v3, %v3582_v26 }
 0x2f7   : > { %v3065_v58 = vpop.f32.mrf.mxu0 }
 0x2f8   : > { %v1364_v16 = vadd.f32 %v3065_v58, %v3592_v31  ;;  %v1385_v47 = vmax.f32 %v1361_v59, 0.0  ;;  %v1358_v58 = vadd.f32 %v1289_v11, %v3586_v28  ;;  %v1355_v59 = vadd.f32 %v3056_v0, %v3572_v21 }
 0x2f9   : > { %v1305_v62 = vpop.f32.mrf.mxu0  ;;  %v1351_v11 = vadd.f32 %v3052_v10, %v3564_v17 }
 0x2fa   : > { %v1388_v55 = vmax.f32 %v1364_v16, 0.0  ;;  %v1362_v54 = vadd.f32 %v1305_v62, %v3596_v34  ;;  %v1356_v62 = vadd.f32 %v3057_v63, %v3576_v23  ;;  %v1379_v1 = vmax.f32 %v1355_v59, 0.0 }
 0x2fb   : > { %v1352_v63 = vadd.f32 %v3053_v56, %v3568_v19 }
 0x2fc   : > { %v1404_v51 = vpack.c.bf16 %v1388_v55, %v1387_v60  ;;  %v1386_v50 = vmax.f32 %v1362_v54, 0.0  ;;  %v1402_v55 = vpack.c.bf16 %v1384_v5, %v1383_v8  ;;  %v1382_v54 = vmax.f32 %v1358_v58, 0.0 }
 0x2fd   : > { %v1380_v52 = vmax.f32 %v1356_v62, 0.0  ;;  %v1350_v5 = vadd.f32 %v1257_v15, %v3570_v20 }
 0x2fe   : > { %1410 = vmatpush1.bf16.msra.mxu0 %v1404_v51  ;;  %v1403_v31 = vpack.c.bf16 %v1386_v50, %v1385_v47  ;;  %v1381_v51 = vmax.f32 %v1357_v7, 0.0  ;;  %v1354_v47 = vadd.f32 %v1273_v6, %v3578_v24  ;;  %v1376_v6 = vmax.f32 %v1352_v63, 0.0 }
 0x2ff   : > { %1411 = vmatprep.subr.bf16.mxu0 %v4135_v46  ;;  %v1400_v3 = vpack.c.bf16 %v1380_v52, %v1379_v1  ;;  %v1349_v7 = vadd.f32 %v3772_v12, %v3566_v18 }
 0x300   : > { %v1401_v48 = vpack.c.bf16 %v1382_v54, %v1381_v51  ;;  %v1378_v9 = vmax.f32 %v1354_v47, 0.0 }
 0x301   : > { %v1373_v54 = vmax.f32 %v1349_v7, 0.0 }
 0x302   : > { %1412 = vmatpush1.bf16.msra.mxu0 %v1403_v31  ;;  %v1353_v31 = vadd.f32 %v1270_v4, %v3574_v22  ;;  %v1375_v4 = vmax.f32 %v1351_v11, 0.0 }
 0x303   : > { %1413 = vmatprep.subr.bf16.mxu0 %v4135_v46  ;;  %v3068_v60 = vpop.f32.mrf.mxu0 }
 0x304   : > { %v1377_v16 = vmax.f32 %v1353_v31, 0.0  ;;  %v1398_v62 = vpack.c.bf16 %v1376_v6, %v1375_v4  ;;  %v1367_v11 = vadd.f32 %v3068_v60, %v3599_v37 }
 0x305   : > { %v1318_v50 = vpop.f32.mrf.mxu0 }
 0x306   : > { %1414 = vmatpush1.bf16.msra.mxu0 %v1402_v55  ;;  %v1399_v58 = vpack.c.bf16 %v1378_v9, %v1377_v16  ;;  %v1374_v55 = vmax.f32 %v1350_v5, 0.0  ;;  %v1391_v4 = vmax.f32 %v1367_v11, 0.0  ;;  %v1365_v7 = vadd.f32 %v1318_v50, %v3604_v41 }
 0x307   : > { %1415 = vmatprep.subr.bf16.mxu0 %v4135_v46  ;;  %v3069_v0 = vpop.f32.mrf.mxu0 }
 0x308   : > { %v1397_v15 = vpack.c.bf16 %v1374_v55, %v1373_v54  ;;  %v1368_v63 = vadd.f32 %v3069_v0, %v3609_v45 }
 0x309   : > { %v1321_v8 = vpop.f32.mrf.mxu0 }
 0x30a   : > { %1416 = vmatpush1.bf16.msra.mxu0 %v1401_v48  ;;  %v1392_v6 = vmax.f32 %v1368_v63, 0.0  ;;  %v1366_v5 = vadd.f32 %v1321_v8, %v3614_v49 }
 0x30b   : > { %1417 = vmatprep.subr.bf16.mxu0 %v4135_v46 }
 0x30c   : > { %v1390_v0 = vmax.f32 %v1366_v5, 0.0 }
 0x30e   : > { %1418 = vmatpush1.bf16.msra.mxu0 %v1400_v3 }
 0x30f   : > { %1419 = vmatprep.subr.bf16.mxu0 %v4135_v46 }
 0x312   : > { %1420 = vmatpush1.bf16.msra.mxu0 %v1399_v58 }
 0x313   : > { %v3072_v56 = vpop.f32.mrf.mxu0  ;;  %1421 = vmatprep.subr.bf16.mxu0 %v4135_v46 }
 0x314   : > { %v1371_v59 = vadd.f32 %v3072_v56, %v3619_v53  ;;  %v1406_v56 = vpack.c.bf16 %v1392_v6, %v1391_v4 }
 0x315   : > { %v1334_v10 = vpop.f32.mrf.mxu0 }
 0x316   : > { %1422 = vmatpush1.bf16.msra.mxu0 %v1398_v62  ;;  %v1395_v48 = vmax.f32 %v1371_v59, 0.0  ;;  %v1369_v12 = vadd.f32 %v1334_v10, %v3624_v57  ;;  %v1389_v62 = vmax.f32 %v1365_v7, 0.0 }
 0x317   : > { %v3073_v51 = vpop.f32.mrf.mxu0  ;;  %1423 = vmatprep.subr.bf16.mxu0 %v4135_v46 }
 0x318   : > { %v1372_v52 = vadd.f32 %v3073_v51, %v3629_v61  ;;  %v1393_v16 = vmax.f32 %v1369_v12, 0.0  ;;  %v1405_v60 = vpack.c.bf16 %v1390_v0, %v1389_v62 }
 0x319   : > { %v1337_v47 = vpop.f32.mrf.mxu0 }
 0x31a   : > { %v1396_v1 = vmax.f32 %v1372_v52, 0.0  ;;  %v1370_v31 = vadd.f32 %v1337_v47, %v3635_v2  ;;  %1424 = vmatpush1.bf16.msra.mxu0 %v1397_v15 }
 0x31b   : > { %1433 = vmatprep.subr.bf16.mxu0 %v4135_v46 }
 0x31c   : > { %v1408_v3 = vpack.c.bf16 %v1396_v1, %v1395_v48  ;;  %v1394_v9 = vmax.f32 %v1370_v31, 0.0 }
 0x31e   : > { %1434 = vmatpush2.bf16.msra.mxu0 %v1408_v3  ;;  %v1407_v58 = vpack.c.bf16 %v1394_v9, %v1393_v16 }
 0x31f   : > { %1435 = vmatprep.subr.bf16.mxu0 %v4135_v46 }
 0x322   : > { %1436 = vmatpush2.bf16.msra.mxu0 %v1407_v58 }
 0x323   : > { %1437 = vmatprep.subr.bf16.mxu0 %v4135_v46 }
 0x326   : > { %1438 = vmatpush2.bf16.msra.mxu0 %v1406_v56 }
 0x327   : > { %1439 = vmatprep.subr.bf16.mxu0 %v4135_v46 }
 0x32a   : > { %1440 = vmatpush2.bf16.msra.mxu0 %v1405_v60 }
 0x32d   : > { %1442 = vmatmul.mubr.bf16.vlgmr.msra.gmra.mxu0 %v3648_v13  ;;  %v4136_v13 = vld [vmem:[#allocation8_spill] sm:$0xff] }
 0x32e   : > { %2842 = vmatprep.mubr.msk.bf16.mxu0 %vm993_vm1, %v3651_v14  ;;  %v4137_v14 = vld [vmem:[#allocation9_spill] sm:$0xff] }
 0x335   : > { %1450 = vmatmul.mubr.bf16.gmra.mxu0 %v3657_v32  ;;  %v4138_v32 = vld [vmem:[#allocation10_spill] sm:$0xff] }
 0x336   : > { %2843 = vmatprep.mubr.msk.bf16.mxu0 %vm993_vm1, %v3660_v33  ;;  %v4139_v33 = vld [vmem:[#allocation11_spill] sm:$0xff] }
 0x33d   : > { %1458 = vmatmul.mubr.bf16.gmra.mxu0 %v3666_v35  ;;  %v4140_v35 = vld [vmem:[#allocation12_spill] sm:$0xff] }
 0x33e   : > { %2844 = vmatprep.mubr.msk.bf16.mxu0 %vm993_vm1, %v3669_v36  ;;  %v4141_v36 = vld [vmem:[#allocation13_spill] sm:$0xff] }
 0x345   : > { %1466 = vmatmul.mubr.bf16.gmra.mxu0 %v3675_v38  ;;  %v4142_v38 = vld [vmem:[#allocation14_spill] sm:$0xff] }
 0x346   : > { %2845 = vmatprep.mubr.msk.bf16.mxu0 %vm993_vm1, %v3678_v39  ;;  %v4143_v39 = vld [vmem:[#allocation15_spill] sm:$0xff] }
 0x34d   : > { %1474 = vmatmul.mubr.bf16.gmra.mxu0 %v3684_v40  ;;  %v4144_v40 = vld [vmem:[#allocation16_spill] sm:$0xff] }
 0x34e   : > { %2846 = vmatprep.mubr.msk.bf16.mxu0 %vm993_vm1, %v3687_v42  ;;  %v4145_v42 = vld [vmem:[#allocation17_spill] sm:$0xff] }
 0x355   : > { %1482 = vmatmul.mubr.bf16.gmra.mxu0 %v3693_v43  ;;  %v4146_v43 = vld [vmem:[#allocation18_spill] sm:$0xff] }
 0x356   : > { %2847 = vmatprep.mubr.msk.bf16.mxu0 %vm993_vm1, %v3696_v44 }
 0x35d   : > { %1490 = vmatmul.mubr.bf16.gmra.mxu0 %v4136_v13 }
 0x35e   : > { %2848 = vmatprep.mubr.msk.bf16.mxu0 %vm993_vm1, %v4137_v14 }
 0x365   : > { %1498 = vmatmul.mubr.bf16.gmra.mxu0 %v4138_v32 }
 0x366   : > { %2849 = vmatprep.mubr.msk.bf16.mxu0 %vm993_vm1, %v4139_v33 }
 0x36d   : > { %1506 = vmatmul.mubr.bf16.gmra.mxu0 %v4140_v35 }
 0x36e   : > { %2850 = vmatprep.mubr.msk.bf16.mxu0 %vm993_vm1, %v4141_v36 }
 0x375   : > { %1514 = vmatmul.mubr.bf16.gmra.mxu0 %v4142_v38 }
 0x376   : > { %2851 = vmatprep.mubr.msk.bf16.mxu0 %vm993_vm1, %v4143_v39 }
 0x37d   : > { %1522 = vmatmul.mubr.bf16.gmra.mxu0 %v4144_v40 }
 0x37e   : > { %2852 = vmatprep.mubr.msk.bf16.mxu0 %vm993_vm1, %v4145_v42 }
 0x385   : > { %1530 = vmatmul.mubr.bf16.gmra.mxu0 %v4146_v43 }
 0x3ed   : > { %v1443_v44 = vpop.f32.mrf.mxu0 }
 0x3ef   : > { %v1445_v50 = vpop.f32.mrf.mxu0 }
 0x3f1   : > { %v1446_v8 = vpop.f32.mrf.mxu0 }
 0x3f2   : > { %v1538_v55 = vpack.c.bf16 %v1446_v8, %v1443_v44 }
 0x3f3   : > { %v1448_v10 = vpop.f32.mrf.mxu0 }
 0x3f4   : > { %3078 = vmatprep.mubr.msk.bf16.mxu1 %vm1183_vm2, %v1538_v55 }
 0x3f5   : > { %v1451_v54 = vpop.f32.mrf.mxu0 }
 0x3f7   : > { %v1453_v59 = vpop.f32.mrf.mxu0 }
 0x3f9   : > { %v1454_v51 = vpop.f32.mrf.mxu0 }
 0x3fa   : > { %v1539_v15 = vpack.c.bf16 %v1454_v51, %v1451_v54 }
 0x3fb   : > { %v1456_v52 = vpop.f32.mrf.mxu0 }
 0x3fc   : > { %3079 = vmatmul.mubr.msk.bf16.vlgmr.msra.gmra.mxu1 %vm1183_vm2, %v1539_v15 }
 0x3fd   : > { %v1459_v47 = vpop.f32.mrf.mxu0 }
 0x3ff   : > { %v1461_v48 = vpop.f32.mrf.mxu0 }
 0x401   : > { %v1462_v12 = vpop.f32.mrf.mxu0 }
 0x402   : > { %v1540_v1 = vpack.c.bf16 %v1462_v12, %v1459_v47 }
 0x403   : > { %v1464_v31 = vpop.f32.mrf.mxu0 }
 0x404   : > { %3082 = vmatprep.mubr.msk.bf16.mxu1 %vm1183_vm2, %v1540_v1 }
 0x405   : > { %v1467_v63 = vpop.f32.mrf.mxu0 }
 0x407   : > { %v1469_v3 = vpop.f32.mrf.mxu0 }
 0x409   : > { %v1470_v9 = vpop.f32.mrf.mxu0 }
 0x40a   : > { %v1541_v11 = vpack.c.bf16 %v1470_v9, %v1467_v63 }
 0x40b   : > { %v1472_v16 = vpop.f32.mrf.mxu0 }
 0x40c   : > { %3083 = vmatmul.mubr.msk.bf16.gmra.mxu1 %vm1183_vm2, %v1541_v11 }
 0x40d   : > { %v1475_v6 = vpop.f32.mrf.mxu0 }
 0x40f   : > { %v1477_v5 = vpop.f32.mrf.mxu0 }
 0x411   : > { %v1478_v58 = vpop.f32.mrf.mxu0 }
 0x412   : > { %v1542_v4 = vpack.c.bf16 %v1478_v58, %v1475_v6  ;;  %v3281_v6 = vld [vmem:[%s3860_s20 + $0x4] ss:$8 sps:$4 sm:$0xff]  }
 0x413   : > { %v1480_v7 = vpop.f32.mrf.mxu0 }
 0x414   : > { %3086 = vmatprep.mubr.msk.bf16.mxu1 %vm1183_vm2, %v1542_v4 }
 0x415   : > { %v1483_v56 = vpop.f32.mrf.mxu0 }
 0x417   : > { %v1485_v0 = vpop.f32.mrf.mxu0 }
 0x419   : > { %v1486_v62 = vpop.f32.mrf.mxu0 }
 0x41a   : > { %v1543_v60 = vpack.c.bf16 %v1486_v62, %v1483_v56 }
 0x41b   : > { %v1488_v13 = vpop.f32.mrf.mxu0 }
 0x41c   : > { %3087 = vmatmul.mubr.msk.bf16.gmra.mxu1 %vm1183_vm2, %v1543_v60 }
 0x41d   : > { %v1491_v14 = vpop.f32.mrf.mxu0 }
 0x41f   : > { %v1493_v32 = vpop.f32.mrf.mxu0 }
 0x421   : > { %v1494_v33 = vpop.f32.mrf.mxu0 }
 0x422   : > { %v1544_v35 = vpack.c.bf16 %v1494_v33, %v1491_v14  ;;  %v3303_v14 = vld [vmem:[%s4094_s8 + $0x8] sm:$0xff]  }
 0x423   : > { %v1496_v36 = vpop.f32.mrf.mxu0  ;;  %3102 = vmatprep.subr.bf16.mxu0 %v3303_v14 }
 0x424   : > { %3090 = vmatprep.mubr.msk.bf16.mxu1 %vm1183_vm2, %v1544_v35  ;;  %3103 = vmatpush3.bf16.msra.mxu0 %v3303_v14 }
 0x425   : > { %v1499_v38 = vpop.f32.mrf.mxu0 }
 0x427   : > { %v1501_v39 = vpop.f32.mrf.mxu0 }
 0x429   : > { %v1502_v40 = vpop.f32.mrf.mxu0 }
 0x42a   : > { %v1545_v42 = vpack.c.bf16 %v1502_v40, %v1499_v38 }
 0x42b   : > { %v1504_v43 = vpop.f32.mrf.mxu0 }
 0x42c   : > { %3091 = vmatmul.mubr.msk.bf16.gmra.mxu1 %vm1183_vm2, %v1545_v42  ;;  %v4147_v42 = vld [vmem:[#allocation7_spill] sm:$0xff] }
 0x42d   : > { %v1507_v44 = vpop.f32.mrf.mxu0 }
 0x42f   : > { %v1509_v50 = vpop.f32.mrf.mxu0 }
 0x431   : > { %v1510_v8 = vpop.f32.mrf.mxu0 }
 0x432   : > { %v1546_v55 = vpack.c.bf16 %v1510_v8, %v1507_v44 }
 0x433   : > { %v1512_v10 = vpop.f32.mrf.mxu0 }
 0x434   : > { %3094 = vmatprep.mubr.msk.bf16.mxu1 %vm1183_vm2, %v1546_v55 }
 0x435   : > { %v1515_v54 = vpop.f32.mrf.mxu0 }
 0x437   : > { %v1517_v59 = vpop.f32.mrf.mxu0 }
 0x439   : > { %v1518_v51 = vpop.f32.mrf.mxu0 }
 0x43a   : > { %v1547_v15 = vpack.c.bf16 %v1518_v51, %v1515_v54 }
 0x43b   : > { %v1520_v52 = vpop.f32.mrf.mxu0 }
 0x43c   : > { %3095 = vmatmul.mubr.msk.bf16.gmra.mxu1 %vm1183_vm2, %v1547_v15 }
 0x43d   : > { %v1523_v47 = vpop.f32.mrf.mxu0 }
 0x43f   : > { %v1525_v48 = vpop.f32.mrf.mxu0 }
 0x441   : > { %v1526_v12 = vpop.f32.mrf.mxu0 }
 0x442   : > { %v1548_v1 = vpack.c.bf16 %v1526_v12, %v1523_v47 }
 0x443   : > { %v1528_v31 = vpop.f32.mrf.mxu0 }
 0x444   : > { %3098 = vmatprep.mubr.msk.bf16.mxu1 %vm1183_vm2, %v1548_v1 }
 0x445   : > { %v1531_v63 = vpop.f32.mrf.mxu0 }
 0x447   : > { %v1533_v3 = vpop.f32.mrf.mxu0 }
 0x449   : > { %v1534_v9 = vpop.f32.mrf.mxu0 }
 0x44a   : > { %v1549_v11 = vpack.c.bf16 %v1534_v9, %v1531_v63 }
 0x44b   : > { %v1536_v16 = vpop.f32.mrf.mxu0 }
 0x44c   : > { %3099 = vmatmul.mubr.msk.bf16.gmra.mxu1 %vm1183_vm2, %v1549_v11 }
 0x44d   : > { %2881 = vmatprep.mubr.msk.bf16.mxu1 %vm993_vm1, %v3281_v6 }
 0x4bc   : > { %v3080_v5 = vpop.f32.mrf.mxu1 }
 0x4be   : > { %v3864_v58 = vpop.f32.mrf.mxu1 }
 0x4c0   : > { %v3081_v4 = vpop.f32.mrf.mxu1 }
 0x4c2   : > { %v1623_v7 = vpop.f32.mrf.mxu1 }
 0x4cc   : > { %v3084_v56 = vpop.f32.mrf.mxu1 }
 0x4ce   : > { %v1636_v0 = vpop.f32.mrf.mxu1 }
 0x4cf   : > { %v1719_v16 = vadd.f32 %v1636_v0, %v3574_v22  ;;  %v1715_v0 = vadd.f32 %v3864_v58, %v3566_v18 }
 0x4d0   : > { %v3085_v62 = vpop.f32.mrf.mxu1 }
 0x4d2   : > { %v1639_v60 = vpop.f32.mrf.mxu1 }
 0x4dc   : > { %v3088_v13 = vpop.f32.mrf.mxu1 }
 0x4dd   : > { %v1725_v15 = vadd.f32 %v3088_v13, %v3580_v25  ;;  %v1721_v25 = vadd.f32 %v3084_v56, %v3572_v21  ;;  %v1717_v56 = vadd.f32 %v3080_v5, %v3564_v17  ;;  %v1743_v13 = vmax.f32 %v1719_v16, 0.0 }
 0x4de   : > { %v1652_v32 = vpop.f32.mrf.mxu1  ;;  %v1739_v5 = vmax.f32 %v1715_v0, 0.0 }
 0x4df   : > { %v1749_v12 = vmax.f32 %v1725_v15, 0.0  ;;  %v1741_v22 = vmax.f32 %v1717_v56, 0.0  ;;  %v3287_v15 = vld [vmem:[%s3860_s20 + $0x20] ss:$8 sps:$4 sm:$0xff]  }
 0x4e0   : > { %v3089_v33 = vpop.f32.mrf.mxu1 }
 0x4e1   : > { %v1726_v54 = vadd.f32 %v3089_v33, %v3584_v27  ;;  %v1722_v27 = vadd.f32 %v3085_v62, %v3576_v23  ;;  %v1718_v23 = vadd.f32 %v3081_v4, %v3568_v19 }
 0x4e2   : > { %v1655_v35 = vpop.f32.mrf.mxu1 }
 0x4e3   : > { %v1724_v47 = vadd.f32 %v1655_v35, %v3586_v28  ;;  %v1746_v3 = vmax.f32 %v1722_v27, 0.0  ;;  %v1720_v28 = vadd.f32 %v1639_v60, %v3578_v24  ;;  %v1742_v24 = vmax.f32 %v1718_v23, 0.0  ;;  %v3299_v27 = vld [vmem:[%s3860_s20 + $0x60] ss:$8 sps:$4 sm:$0xff]  }
 0x4e4   : > { %v1716_v60 = vadd.f32 %v1623_v7, %v3570_v20 }
 0x4e5   : > { %v1748_v1 = vmax.f32 %v1724_v47, 0.0  ;;  %v1744_v62 = vmax.f32 %v1720_v28, 0.0  ;;  %v1780_v4 = vpack.c.bf16 %v1742_v24, %v1741_v22  ;;  %v3293_v47 = vld [vmem:[%s3860_s20 + $0x40] ss:$8 sps:$4 sm:$0xff]  }
 0x4e6   : > { %v1740_v33 = vmax.f32 %v1716_v60, 0.0 }
 0x4e7   : > { %v1781_v14 = vpack.c.bf16 %v1744_v62, %v1743_v13  ;;  %v3306_v62 = vld [vmem:[%s4093_s7] sm:$0xff]  }
 0x4e8   : > { %v1779_v20 = vpack.c.bf16 %v1740_v33, %v1739_v5 }
 0x4ec   : > { %v3092_v36 = vpop.f32.mrf.mxu1 }
 0x4ed   : > { %v1729_v39 = vadd.f32 %v3092_v36, %v3588_v29  ;;  %v1750_v29 = vmax.f32 %v1726_v54, 0.0  ;;  %v3279_v54 = vld [vmem:[%s3860_s20] ss:$8 sps:$4 sm:$0xff]  }
 0x4ee   : > { %v1668_v38 = vpop.f32.mrf.mxu1 }
 0x4ef   : > { %v1753_v50 = vmax.f32 %v1729_v39, 0.0  ;;  %v1727_v8 = vadd.f32 %v1668_v38, %v3590_v30  ;;  %v1723_v30 = vadd.f32 %v1652_v32, %v3582_v26  ;;  %v1745_v26 = vmax.f32 %v1721_v25, 0.0  ;;  %v3305_v25 = vld [vmem:[%s4093_s7 + $0x8] sm:$0xff]  }
 0x4f0   : > { %v3093_v40 = vpop.f32.mrf.mxu1 }
 0x4f1   : > { %v1730_v43 = vadd.f32 %v3093_v40, %v4147_v42  ;;  %v1751_v52 = vmax.f32 %v1727_v8, 0.0  ;;  %v1747_v63 = vmax.f32 %v1723_v30, 0.0  ;;  %v1782_v6 = vpack.c.bf16 %v1746_v3, %v1745_v26  ;;  %v3297_v30 = vld [vmem:[%s3860_s20 + $0x64] ss:$8 sps:$4 sm:$0xff]  }
 0x4f2   : > { %v1671_v44 = vpop.f32.mrf.mxu1 }
 0x4f3   : > { %v1754_v55 = vmax.f32 %v1730_v43, 0.0  ;;  %v1728_v10 = vadd.f32 %v1671_v44, %v3596_v34  ;;  %v1784_v34 = vpack.c.bf16 %v1750_v29, %v1749_v12  ;;  %v1783_v9 = vpack.c.bf16 %v1748_v1, %v1747_v63  ;;  %v3291_v29 = vld [vmem:[%s3860_s20 + $0x44] ss:$8 sps:$4 sm:$0xff]   ;;  %v3296_v12 = vld [vmem:[%s3860_s20 + $0x50] ss:$8 sps:$4 sm:$0xff]  }
 0x4f4   : > { %v3302_v1 = vld [vmem:[%s3860_s20 + $0x70] ss:$8 sps:$4 sm:$0xff]  }
 0x4f5   : > { %v1786_v59 = vpack.c.bf16 %v1754_v55, %v1753_v50  ;;  %v1752_v51 = vmax.f32 %v1728_v10, 0.0 }
 0x4f7   : > { %1888 = vmatpush1.bf16.msra.mxu1 %v1786_v59  ;;  %v1785_v48 = vpack.c.bf16 %v1752_v51, %v1751_v52  ;;  %v3282_v59 = vld [vmem:[%s3860_s20 + $0x14] ss:$8 sps:$4 sm:$0xff]   ;;  %v3285_v51 = vld [vmem:[%s3860_s20 + $0x24] ss:$8 sps:$4 sm:$0xff]   ;;  %v3290_v52 = vld [vmem:[%s3860_s20 + $0x30] ss:$8 sps:$4 sm:$0xff]  }
 0x4f8   : > { %1889 = vmatprep.subr.bf16.mxu1 %v4135_v46 }
 0x4fb   : > { %1890 = vmatpush1.bf16.msra.mxu1 %v1785_v48  ;;  %v3294_v48 = vld [vmem:[%s3860_s20 + $0x54] ss:$8 sps:$4 sm:$0xff]  }
 0x4fc   : > { %1891 = vmatprep.subr.bf16.mxu1 %v4135_v46  ;;  %v3096_v31 = vpop.f32.mrf.mxu1 }
 0x4fd   : > { %v1733_v44 = vadd.f32 %v3096_v31, %v3599_v37  ;;  %v3304_v31 = vld [vmem:[%s4094_s8] sm:$0xff]  }
 0x4fe   : > { %v1684_v11 = vpop.f32.mrf.mxu1  ;;  %3104 = vmatprep.subr.bf16.mxu0 %v3304_v31 }
 0x4ff   : > { %1892 = vmatpush1.bf16.msra.mxu1 %v1784_v34  ;;  %v1731_v55 = vadd.f32 %v1684_v11, %v3604_v41  ;;  %v3284_v41 = vld [vmem:[%s3860_s20 + $0x10] ss:$8 sps:$4 sm:$0xff]   ;;  %v3300_v34 = vld [vmem:[%s3860_s20 + $0x74] ss:$8 sps:$4 sm:$0xff]   ;;  %3105 = vmatpush3.bf16.msra.mxu0 %v3304_v31 }
 0x500   : > { %1893 = vmatprep.subr.bf16.mxu1 %v4135_v46  ;;  %v3097_v21 = vpop.f32.mrf.mxu1  ;;  %3122 = vmatprep.subr.bf16.mxu0 %v3305_v25 }
 0x501   : > { %v1734_v42 = vadd.f32 %v3097_v21, %v3609_v45  ;;  %v1755_v10 = vmax.f32 %v1731_v55, 0.0  ;;  %v3308_v55 = vld [vmem:[%s3937_s1 + $0x8] sm:$0xff]  }
 0x502   : > { %v1687_v32 = vpop.f32.mrf.mxu1 }
 0x503   : > { %1894 = vmatpush1.bf16.msra.mxu1 %v1783_v9 }
 0x504   : > { %1895 = vmatprep.subr.bf16.mxu1 %v4135_v46 }
 0x507   : > { %1896 = vmatpush1.bf16.msra.mxu1 %v1782_v6 }
 0x508   : > { %1897 = vmatprep.subr.bf16.mxu1 %v4135_v46 }
 0x50b   : > { %1898 = vmatpush1.bf16.msra.mxu1 %v1781_v14 }
 0x50c   : > { %v3100_v19 = vpop.f32.mrf.mxu1  ;;  %1899 = vmatprep.subr.bf16.mxu1 %v4135_v46 }
 0x50d   : > { %v1737_v35 = vadd.f32 %v3100_v19, %v3619_v53 }
 0x50e   : > { %v1700_v17 = vpop.f32.mrf.mxu1 }
 0x50f   : > { %1900 = vmatpush1.bf16.msra.mxu1 %v1780_v4  ;;  %v1761_v39 = vmax.f32 %v1737_v35, 0.0  ;;  %v1735_v18 = vadd.f32 %v1700_v17, %v3624_v57  ;;  %v1732_v57 = vadd.f32 %v1687_v32, %v3614_v49 }
 0x510   : > { %v3101_v36 = vpop.f32.mrf.mxu1  ;;  %1901 = vmatprep.subr.bf16.mxu1 %v4135_v46 }
 0x511   : > { %v1738_v7 = vadd.f32 %v3101_v36, %v3629_v61  ;;  %v1759_v50 = vmax.f32 %v1735_v18, 0.0  ;;  %v1758_v61 = vmax.f32 %v1734_v42, 0.0  ;;  %v1756_v45 = vmax.f32 %v1732_v57, 0.0  ;;  %v3307_v57 = vld [vmem:[%s3937_s1] sm:$0xff]  }
 0x512   : > { %v1703_v38 = vpop.f32.mrf.mxu1 }
 0x513   : > { %v1762_v58 = vmax.f32 %v1738_v7, 0.0  ;;  %v1736_v40 = vadd.f32 %v1703_v38, %v3635_v2  ;;  %1902 = vmatpush1.bf16.msra.mxu1 %v1779_v20  ;;  %v1757_v2 = vmax.f32 %v1733_v44, 0.0  ;;  %v1787_v49 = vpack.c.bf16 %v1756_v45, %v1755_v10  ;;  %v3310_v45 = vld [vmem:[%s3937_s1 + $0x18] sm:$0xff]   ;;  %v3311_v10 = vld [vmem:[%s3937_s1 + $0x20] sm:$0xff]  }
 0x514   : > { %1911 = vmatprep.subr.bf16.mxu1 %v4135_v46 }
 0x515   : > { %v1790_v53 = vpack.c.bf16 %v1762_v58, %v1761_v39  ;;  %v1760_v43 = vmax.f32 %v1736_v40, 0.0  ;;  %v1788_v37 = vpack.c.bf16 %v1758_v61, %v1757_v2 }
 0x517   : > { %1912 = vmatpush2.bf16.msra.mxu1 %v1790_v53  ;;  %v1789_v8 = vpack.c.bf16 %v1760_v43, %v1759_v50 }
 0x518   : > { %1913 = vmatprep.subr.bf16.mxu1 %v4135_v46 }
 0x51b   : > { %1914 = vmatpush2.bf16.msra.mxu1 %v1789_v8 }
 0x51c   : > { %1915 = vmatprep.subr.bf16.mxu1 %v4135_v46 }
 0x51f   : > { %1916 = vmatpush2.bf16.msra.mxu1 %v1788_v37  ;;  %v3309_v37 = vld [vmem:[%s3937_s1 + $0x10] sm:$0xff]  }
 0x520   : > { %1917 = vmatprep.subr.bf16.mxu1 %v4135_v46  ;;  %v3288_v46 = vld [vmem:[%s3860_s20 + $0x34] ss:$8 sps:$4 sm:$0xff]   ;;  %s3397_s20 = smov [#allocation2]  }
 0x523   : > { %1918 = vmatpush2.bf16.msra.mxu1 %v1787_v49  ;;  %v3312_v49 = vld [vmem:[%s3937_s1 + $0x28] sm:$0xff]  }
 0x526   : > { %1920 = vmatmul.mubr.bf16.vlgmr.msra.gmra.mxu1 %v3279_v54  ;;  %v3313_v54 = vld [vmem:[%s3937_s1 + $0x30] sm:$0xff]  }
 0x527   : > { %2882 = vmatprep.mubr.msk.bf16.mxu1 %vm993_vm1, %v3282_v59  ;;  %v3314_v59 = vld [vmem:[%s3937_s1 + $0x38] sm:$0xff]  }
 0x52e   : > { %1928 = vmatmul.mubr.bf16.gmra.mxu1 %v3284_v41  ;;  %v3315_v41 = vld [vmem:[%s3970_s28] sm:$0xff]  }
 0x52f   : > { %2883 = vmatprep.mubr.msk.bf16.mxu1 %vm993_vm1, %v3285_v51 }
 0x536   : > { %1936 = vmatmul.mubr.bf16.gmra.mxu1 %v3287_v15 }
 0x537   : > { %2884 = vmatprep.mubr.msk.bf16.mxu1 %vm993_vm1, %v3288_v46 }
 0x53e   : > { %1944 = vmatmul.mubr.bf16.gmra.mxu1 %v3290_v52 }
 0x53f   : > { %2885 = vmatprep.mubr.msk.bf16.mxu1 %vm993_vm1, %v3291_v29 }
 0x546   : > { %1952 = vmatmul.mubr.bf16.gmra.mxu1 %v3293_v47 }
 0x547   : > { %2886 = vmatprep.mubr.msk.bf16.mxu1 %vm993_vm1, %v3294_v48 }
 0x54e   : > { %1960 = vmatmul.mubr.bf16.gmra.mxu1 %v3296_v12 }
 0x54f   : > { %2887 = vmatprep.mubr.msk.bf16.mxu1 %vm993_vm1, %v3297_v30 }
 0x556   : > { %1968 = vmatmul.mubr.bf16.gmra.mxu1 %v3299_v27 }
 0x557   : > { %2888 = vmatprep.mubr.msk.bf16.mxu1 %vm993_vm1, %v3300_v34 }
 0x55e   : > { %1976 = vmatmul.mubr.bf16.gmra.mxu1 %v3302_v1 }
 0x55f   : > { %3158 = vmatprep.mubr.bf16.mxu1 %v3315_v41 }
 0x5e6   : > { %v1921_v63 = vpop.f32.mrf.mxu1 }
 0x5e8   : > { %v1923_v3 = vpop.f32.mrf.mxu1 }
 0x5ea   : > { %v1924_v28 = vpop.f32.mrf.mxu1 }
 0x5eb   : > { %v2004_v9 = vpack.c.bf16 %v1924_v28, %v1921_v63 }
 0x5ec   : > { %v1926_v11 = vpop.f32.mrf.mxu1 }
 0x5ed   : > { %3106 = vmatprep.mubr.msk.bf16.mxu0 %vm1183_vm2, %v2004_v9  ;;  %v3980_v11 = vld [vmem:[%s4095_s9] ss:$0 sm:$0xff] }
 0x5ee   : > { %v1929_v26 = vpop.f32.mrf.mxu1 }
 0x5f0   : > { %v1931_v16 = vpop.f32.mrf.mxu1 }
 0x5f2   : > { %v1932_v23 = vpop.f32.mrf.mxu1 }
 0x5f3   : > { %v2005_v6 = vpack.c.bf16 %v1932_v23, %v1929_v26 }
 0x5f4   : > { %v1934_v21 = vpop.f32.mrf.mxu1 }
 0x5f5   : > { %3107 = vmatmul.mubr.msk.bf16.vlgmr.msra.gmra.mxu0 %vm1183_vm2, %v2005_v6 }
 0x5f6   : > { %v1937_v56 = vpop.f32.mrf.mxu1  ;;  %3123 = vmatpush3.bf16.msra.mxu0 %v3305_v25 }
 0x5f7   : > { %3124 = vmatprep.subr.bf16.mxu0 %v3306_v62 }
 0x5f8   : > { %v1939_v13 = vpop.f32.mrf.mxu1 }
 0x5fa   : > { %v1940_v24 = vpop.f32.mrf.mxu1  ;;  %3125 = vmatpush3.bf16.msra.mxu0 %v3306_v62 }
 0x5fb   : > { %v2006_v60 = vpack.c.bf16 %v1940_v24, %v1937_v56 }
 0x5fc   : > { %v1942_v14 = vpop.f32.mrf.mxu1 }
 0x5fd   : > { %3110 = vmatprep.mubr.msk.bf16.mxu0 %vm1183_vm2, %v2006_v60 }
 0x5fe   : > { %v1945_v32 = vpop.f32.mrf.mxu1 }
 0x600   : > { %v1947_v22 = vpop.f32.mrf.mxu1 }
 0x602   : > { %v1948_v0 = vpop.f32.mrf.mxu1 }
 0x603   : > { %v2007_v19 = vpack.c.bf16 %v1948_v0, %v1945_v32 }
 0x604   : > { %v1950_v4 = vpop.f32.mrf.mxu1 }
 0x605   : > { %3111 = vmatmul.mubr.msk.bf16.gmra.mxu0 %vm1183_vm2, %v2007_v19 }
 0x606   : > { %v1953_v33 = vpop.f32.mrf.mxu1 }
 0x608   : > { %v1955_v17 = vpop.f32.mrf.mxu1 }
 0x60a   : > { %v1956_v5 = vpop.f32.mrf.mxu1 }
 0x60b   : > { %v2008_v35 = vpack.c.bf16 %v1956_v5, %v1953_v33 }
 0x60c   : > { %v1958_v36 = vpop.f32.mrf.mxu1 }
 0x60d   : > { %3114 = vmatprep.mubr.msk.bf16.mxu0 %vm1183_vm2, %v2008_v35 }
 0x60e   : > { %v1961_v20 = vpop.f32.mrf.mxu1 }
 0x610   : > { %v1963_v7 = vpop.f32.mrf.mxu1 }
 0x612   : > { %v1964_v38 = vpop.f32.mrf.mxu1 }
 0x613   : > { %v2009_v39 = vpack.c.bf16 %v1964_v38, %v1961_v20 }
 0x614   : > { %v1966_v18 = vpop.f32.mrf.mxu1 }
 0x615   : > { %3115 = vmatmul.mubr.msk.bf16.gmra.mxu0 %vm1183_vm2, %v2009_v39 }
 0x616   : > { %v1969_v58 = vpop.f32.mrf.mxu1 }
 0x618   : > { %v1971_v40 = vpop.f32.mrf.mxu1 }
 0x61a   : > { %v1972_v42 = vpop.f32.mrf.mxu1 }
 0x61b   : > { %v2010_v53 = vpack.c.bf16 %v1972_v42, %v1969_v58 }
 0x61c   : > { %v1974_v43 = vpop.f32.mrf.mxu1 }
 0x61d   : > { %3118 = vmatprep.mubr.msk.bf16.mxu0 %vm1183_vm2, %v2010_v53 }
 0x61e   : > { %v1977_v44 = vpop.f32.mrf.mxu1 }
 0x620   : > { %v1979_v50 = vpop.f32.mrf.mxu1 }
 0x622   : > { %v1980_v61 = vpop.f32.mrf.mxu1 }
 0x623   : > { %v2011_v8 = vpack.c.bf16 %v1980_v61, %v1977_v44 }
 0x624   : > { %v1982_v2 = vpop.f32.mrf.mxu1 }
 0x625   : > { %3119 = vmatmul.mubr.msk.bf16.gmra.mxu0 %vm1183_vm2, %v2011_v8 }
 0x626   : > { %3126 = vmatprep.mubr.msk.bf16.mxu0 %vm1183_vm2, %v3307_v57 }
 0x62d   : > { %3127 = vmatmul.mubr.msk.bf16.vlgmr.msra.gmra.mxu0 %vm1183_vm2, %v3308_v55 }
 0x62e   : > { %3130 = vmatprep.mubr.msk.bf16.mxu0 %vm1183_vm2, %v3309_v37 }
 0x635   : > { %3131 = vmatmul.mubr.msk.bf16.gmra.mxu0 %vm1183_vm2, %v3310_v45 }
 0x636   : > { %3134 = vmatprep.mubr.msk.bf16.mxu0 %vm1183_vm2, %v3311_v10 }
 0x63d   : > { %3135 = vmatmul.mubr.msk.bf16.gmra.mxu0 %vm1183_vm2, %v3312_v49 }
 0x63e   : > { %3138 = vmatprep.mubr.msk.bf16.mxu0 %vm1183_vm2, %v3313_v54 }
 0x645   : > { %3139 = vmatmul.mubr.msk.bf16.gmra.mxu0 %vm1183_vm2, %v3314_v59 }
 0x6b5   : > { %v3108_v51 = vpop.f32.mrf.mxu0 }
 0x6b7   : > { %v2086_v15 = vpop.f32.mrf.mxu0 }
 0x6b9   : > { %v3109_v46 = vpop.f32.mrf.mxu0 }
 0x6bb   : > { %v2089_v52 = vpop.f32.mrf.mxu0 }
 0x6c5   : > { %v3973_v29 = vpop.f32.mrf.mxu0 }
 0x6c7   : > { %v2102_v47 = vpop.f32.mrf.mxu0 }
 0x6c9   : > { %v3975_v48 = vpop.f32.mrf.mxu0 }
 0x6cb   : > { %v2105_v12 = vpop.f32.mrf.mxu0 }
 0x6d5   : > { %v3116_v30 = vpop.f32.mrf.mxu0 }
 0x6d7   : > { %v2118_v27 = vpop.f32.mrf.mxu0 }
 0x6d9   : > { %v3117_v34 = vpop.f32.mrf.mxu0 }
 0x6db   : > { %v2121_v1 = vpop.f32.mrf.mxu0 }
 0x6e5   : > { %v3120_v31 = vpop.f32.mrf.mxu0 }
 0x6e7   : > { %v2134_v25 = vpop.f32.mrf.mxu0 }
 0x6e9   : > { %v3121_v63 = vpop.f32.mrf.mxu0 }
 0x6eb   : > { %v2137_v3 = vpop.f32.mrf.mxu0 }
 0x6ed   : > { %v3128_v28 = vpop.f32.mrf.mxu0 }
 0x6ee   : > { %v2268_v9 = vadd.f32 %v3128_v28, %v3108_v51 }
 0x6ef   : > { %v2259_v26 = vpop.f32.mrf.mxu0 }
 0x6f0   : > { %v2260_v16 = vadd.f32 %v2259_v26, %v2086_v15  ;;  %v2331_v6 = vadd.f32 %v3980_v11, %v2268_v9 }
 0x6f1   : > { %v3129_v23 = vpop.f32.mrf.mxu0 }
 0x6f2   : > { %v2271_v62 = vadd.f32 %v3129_v23, %v3109_v46  ;;  %v2329_v56 = vadd.f32 %v3980_v11, %v2260_v16  ;;  %v2347_v14 = vmax.f32 %v2331_v6, 0.0 }
 0x6f3   : > { %v2262_v21 = vpop.f32.mrf.mxu0 }
 0x6f4   : > { %v2332_v13 = vadd.f32 %v3980_v11, %v2271_v62  ;;  %v2263_v24 = vadd.f32 %v2262_v21, %v2089_v52  ;;  %v2345_v19 = vmax.f32 %v2329_v56, 0.0 }
 0x6f5   : > { %v3132_v60 = vpop.f32.mrf.mxu0 }
 0x6f6   : > { %v2348_v32 = vmax.f32 %v2332_v13, 0.0  ;;  %v2330_v22 = vadd.f32 %v3980_v11, %v2263_v24  ;;  %v3317_v13 = vld [vmem:[%s4096_s10 + $0x8] sm:$0xff]   ;;  %v3318_v24 = vld [vmem:[%s4096_s10] sm:$0xff]  }
 0x6f7   : > { %v2275_v0 = vpop.f32.mrf.mxu0 }
 0x6f8   : > { %v2346_v4 = vmax.f32 %v2330_v22, 0.0  ;;  %v2276_v33 = vadd.f32 %v2275_v0, %v2102_v47  ;;  %v3986_v17 = vpack.c.bf16 %v2348_v32, %v2347_v14 }
 0x6f9   : > { %v3133_v5 = vpop.f32.mrf.mxu0 }
 0x6fa   : > { %v3988_v35 = vpack.c.bf16 %v2346_v4, %v2345_v19  ;;  %v2333_v20 = vadd.f32 %v3980_v11, %v2276_v33  ;;  %v3319_v4 = vld [vmem:[%s4098_s12 + $0x8] sm:$0xff]   ;;  %v3320_v33 = vld [vmem:[%s4098_s12] sm:$0xff]  }
 0x6fb   : > { %v2278_v36 = vpop.f32.mrf.mxu0  ;;  %3170 = vmatprep.subr.bf16.mxu0 %v3319_v4 }
 0x6fc   : > { %v2279_v7 = vadd.f32 %v2278_v36, %v2105_v12  ;;  %v2349_v58 = vmax.f32 %v2333_v20, 0.0  ;;  %3171 = vmatpush3.bf16.msra.mxu0 %v3319_v4 }
 0x6fd   : > { %v3136_v38 = vpop.f32.mrf.mxu0  ;;  %3172 = vmatprep.subr.bf16.mxu0 %v3320_v33 }
 0x6fe   : > { %v2334_v39 = vadd.f32 %v3980_v11, %v2279_v7  ;;  %v2300_v45 = vadd.f32 %v3136_v38, %v3116_v30  ;;  %v2287_v30 = vadd.f32 %v3133_v5, %v3975_v48  ;;  %v2920_v5 = vld [vmem:[%s4097_s11] ss:$0 sm:$0xff] }
 0x6ff   : > { %v2291_v18 = vpop.f32.mrf.mxu0 }
 0x700   : > { %v2350_v40 = vmax.f32 %v2334_v39, 0.0  ;;  %v2339_v47 = vadd.f32 %v3980_v11, %v2300_v45  ;;  %v2292_v12 = vadd.f32 %v2291_v18, %v2118_v27  ;;  %v2336_v16 = vadd.f32 %v3980_v11, %v2287_v30  ;;  %3173 = vmatpush3.bf16.msra.mxu0 %v3320_v33 }
 0x701   : > { %v3137_v42 = vpop.f32.mrf.mxu0 }
 0x702   : > { %v2366_v53 = vpack.c.bf16 %v2350_v40, %v2349_v58  ;;  %v2303_v8 = vadd.f32 %v3137_v42, %v3117_v34  ;;  %v2355_v9 = vmax.f32 %v2339_v47, 0.0  ;;  %v2337_v26 = vadd.f32 %v3980_v11, %v2292_v12 }
 0x703   : > { %v2294_v43 = vpop.f32.mrf.mxu0  ;;  %v2352_v62 = vmax.f32 %v2336_v16, 0.0 }
 0x704   : > { %v2340_v41 = vadd.f32 %v3980_v11, %v2303_v8  ;;  %v2295_v51 = vadd.f32 %v2294_v43, %v2121_v1  ;;  %v2284_v1 = vadd.f32 %v3132_v60, %v3973_v29  ;;  %v2353_v48 = vmax.f32 %v2337_v26, 0.0  ;;  %v2925_v43 = vld [vmem:[%s4099_s13] ss:$0 sm:$0xff] }
 0x705   : > { %v3140_v44 = vpop.f32.mrf.mxu0 }
 0x706   : > { %v2316_v50 = vadd.f32 %v3140_v44, %v3120_v31  ;;  %v2338_v28 = vadd.f32 %v3980_v11, %v2295_v51  ;;  %v2335_v6 = vadd.f32 %v3980_v11, %v2284_v1 }
 0x707   : > { %v2307_v61 = vpop.f32.mrf.mxu0 }
 0x708   : > { %v2308_v57 = vadd.f32 %v2307_v61, %v2134_v25  ;;  %v2343_v55 = vadd.f32 %v3980_v11, %v2316_v50  ;;  %v2354_v27 = vmax.f32 %v2338_v28, 0.0  ;;  %v2351_v56 = vmax.f32 %v2335_v6, 0.0 }
 0x709   : > { %v3141_v2 = vpop.f32.mrf.mxu0 }
 0x70a   : > { %v2319_v37 = vadd.f32 %v3141_v2, %v3121_v63  ;;  %v2341_v49 = vadd.f32 %v3980_v11, %v2308_v57  ;;  %v2359_v15 = vmax.f32 %v2343_v55, 0.0  ;;  %v2356_v63 = vmax.f32 %v2340_v41, 0.0 }
 0x70b   : > { %v2310_v10 = vpop.f32.mrf.mxu0  ;;  %v2368_v21 = vpack.c.bf16 %v2354_v27, %v2353_v48  ;;  %v2367_v29 = vpack.c.bf16 %v2352_v62, %v2351_v56 }
 0x70c   : > { %v2344_v54 = vadd.f32 %v3980_v11, %v2319_v37  ;;  %v2311_v59 = vadd.f32 %v2310_v10, %v2137_v3  ;;  %v2357_v34 = vmax.f32 %v2341_v49, 0.0  ;;  %v2369_v23 = vpack.c.bf16 %v2356_v63, %v2355_v9 }
 0x70e   : > { %v2360_v46 = vmax.f32 %v2344_v54, 0.0  ;;  %v2342_v52 = vadd.f32 %v3980_v11, %v2311_v59  ;;  %v3316_v11 = vld [vmem:[%s3970_s28 + $0x8] ss:$0 sps:$4 sm:$0xff]  }
 0x710   : > { %v2358_v31 = vmax.f32 %v2342_v52, 0.0  ;;  %v2371_v25 = vpack.c.bf16 %v2360_v46, %v2359_v15 }
 0x712   : > { %3142 = vmatprep.subr.bf16.mxu1 %v2371_v25  ;;  %v2370_v3 = vpack.c.bf16 %v2358_v31, %v2357_v34 }
 0x713   : > { %3143 = vmatpush3.bf16.msra.mxu1 %v2371_v25 }
 0x714   : > { %3144 = vmatprep.subr.bf16.mxu1 %v2370_v3 }
 0x717   : > { %3145 = vmatpush3.bf16.msra.mxu1 %v2370_v3 }
 0x718   : > { %3146 = vmatprep.subr.bf16.mxu1 %v2369_v23 }
 0x71b   : > { %3147 = vmatpush3.bf16.msra.mxu1 %v2369_v23 }
 0x71c   : > { %3148 = vmatprep.subr.bf16.mxu1 %v2368_v21 }
 0x71f   : > { %3149 = vmatpush3.bf16.msra.mxu1 %v2368_v21 }
 0x720   : > { %3150 = vmatprep.subr.bf16.mxu1 %v2367_v29 }
 0x723   : > { %3151 = vmatpush3.bf16.msra.mxu1 %v2367_v29 }
 0x724   : > { %3152 = vmatprep.subr.bf16.mxu1 %v2366_v53 }
 0x727   : > { %3153 = vmatpush3.bf16.msra.mxu1 %v2366_v53 }
 0x728   : > { %3154 = vmatprep.subr.bf16.mxu1 %v3986_v17 }
 0x72b   : > { %3155 = vmatpush3.bf16.msra.mxu1 %v3986_v17 }
 0x72c   : > { %3156 = vmatprep.subr.bf16.mxu1 %v3988_v35 }
 0x72f   : > { %3157 = vmatpush3.bf16.msra.mxu1 %v3988_v35 }
 0x730   : > { %3162 = vmatprep.subr.bf16.mxu1 %v3317_v13 }
 0x732   : > { %3159 = vmatmul.mubr.bf16.vlgmr.msra.gmra.mxu1 %v3316_v11 }
 0x733   : > { %3163 = vmatpush3.bf16.msra.mxu1 %v3317_v13 }
 0x734   : > { %3164 = vmatprep.subr.bf16.mxu1 %v3318_v24 }
 0x737   : > { %3165 = vmatpush3.bf16.msra.mxu1 %v3318_v24 }
 0x7f2   : > { %v3160_v60 = vpop.f32.mrf.mxu1 }
 0x7f3   : > { %2613 = vrot.lane.b32.xlu1 %v3160_v60, %s3396_s26  ;;  %v2431_v19 = vpack.c.bf16 %v3160_v60, %v3160_v60 }
 0x7f4   : > { %v2416_v14 = vpop.f32.mrf.mxu1 }
 0x7f5   : > { %2609 = vrot.lane.b32.xlu0 %v2416_v14, %s3396_s26 }
 0x7f6   : > { %v3161_v32 = vpop.f32.mrf.mxu1 }
 0x7f8   : > { %v2419_v22 = vpop.f32.mrf.mxu1 }
 0x7f9   : > { %v2430_v0 = vpack.c.bf16 %v2419_v22, %v2416_v14  ;;  %2611 = vrot.lane.b32.xlu0 %v2419_v22, %s3396_s26  ;;  %s3178_s26 = smul.u32 24, %s518_s25 }
 0x7fb   : > { %3166 = vmatprep.mubr.msk.bf16.mxu1 %vm1183_vm2, %v2430_v0  ;;  %s520_s27 = scalar_lea.vmem [#allocation2], %s3178_s26  ;;  %s3337_s26 = sshll.u32 %s3397_s20, 4  ;;  %s3338_s26 = int_to_ptr.vmem [resolvable:$false] %s3337_s26 }
 0x7fc   : > { %3167 = vmatmul.mubr.msk.bf16.vlgmr.msra.gmra.mxu1 %vm1183_vm2, %v2431_v19  ;;  %s2643_s28 = sshll.u32 %s520_s27, 4  ;;  %s3339_s22 = scalar_lea.vmem %s3338_s26, 768  ;;  %s4042_s28 = int_to_ptr.vmem [resolvable:$true] %s2643_s28 }
 0x7fd   : > { %s3333_s21 = scalar_lea.vmem %s4042_s28, 384  ;;  %p3340_p0 = scmp.lt.s32.totalorder %s4042_s28, %s3338_s26 }
 0x7fe   : > { %p3334_p11 = scmp.ne.s32.totalorder %s4042_s28, %s3333_s21  ;;  %p3341_p1 = scmp.lt.s32.totalorder %s3339_s22, %s3333_s21 }
 0x800   : > { %p3335_p12 = pnand %p3334_p11, %p3513_p5  ;;  %p3342_p2 = por %p3341_p1, %p3340_p0 }
 0x802   : > { %p3336_p13 = pneg %p3335_p12 }
 0x804   : > { %p3343_p3 = pnand %p3342_p2, %p3336_p13 }
 0x865   : > { %v2614_v31 = vpop.permute.xlu1 %2613 }
 0x867   : > { %v2610_v34 = vpop.permute.xlu0 %2609 }
 0x86b   : > { %v2612_v9 = vpop.permute.xlu0 %2611 }
 0x8bc   : > { %v3168_v17 = vpop.f32.mrf.mxu1 }
 0x8bd   : > { %v2504_v36 = vadd.f32 %v3168_v17, %v2920_v5 }
 0x8be   : > { %v2495_v35 = vpop.f32.mrf.mxu1 }
 0x8bf   : > { %v2496_v7 = vadd.f32 %v2920_v5, %v2495_v35  ;;  %v2511_v18 = vmax.f32 %v2504_v36, 0.0 }
 0x8c0   : > { %v3169_v20 = vpop.f32.mrf.mxu1 }
 0x8c1   : > { %v2509_v58 = vmax.f32 %v2496_v7, 0.0  ;;  %v2513_v53 = vpack.c.bf16 %v2511_v18, %v2511_v18 }
 0x8c2   : > { %v2498_v38 = vpop.f32.mrf.mxu1 }
 0x8c3   : > { %v2499_v39 = vadd.f32 %v2920_v5, %v2498_v38 }
 0x8c5   : > { %v2510_v40 = vmax.f32 %v2499_v39, 0.0 }
 0x8c7   : > { %v2512_v42 = vpack.c.bf16 %v2510_v40, %v2509_v58 }
 0x8c9   : > { %3174 = vmatprep.mubr.msk.bf16.mxu0 %vm1183_vm2, %v2512_v42 }
 0x8ca   : > { %3175 = vmatmul.mubr.msk.bf16.vlgmr.msra.gmra.mxu0 %vm1183_vm2, %v2513_v53 }
 0x98a   : > { %v3176_v44 = vpop.f32.mrf.mxu0 }
 0x98b   : > { %v2586_v50 = vadd.f32 %v3176_v44, %v2925_v43 }
 0x98c   : > { %v2577_v61 = vpop.f32.mrf.mxu0 }
 0x98d   : > { %v2593_v57 = vsub.f32 0.0, %v2586_v50  ;;  %v2578_v8 = vadd.f32 %v2925_v43, %v2577_v61 }
 0x98e   : > { %v3177_v2 = vpop.f32.mrf.mxu0 }
 0x98f   : > { %v2598_v55 = vmul.f32 1.442695, %v2593_v57  ;;  %v2591_v37 = vsub.f32 0.0, %v2578_v8 }
 0x990   : > { %v2580_v45 = vpop.f32.mrf.mxu0 }
 0x991   : > { %3321 = vpow2.f32 %v2598_v55  ;;  %v2594_v10 = vmul.f32 1.442695, %v2591_v37  ;;  %v2581_v49 = vadd.f32 %v2925_v43, %v2580_v45 }
 0x993   : > { %3323 = vpow2.f32 %v2594_v10  ;;  %v2592_v54 = vsub.f32 0.0, %v2581_v49 }
 0x995   : > { %v2596_v59 = vmul.f32 1.442695, %v2592_v54 }
 0x997   : > { %3325 = vpow2.f32 %v2596_v59 }
 0x99e   : > { %v3322_v41 = vpop.eup %3321 }
 0x99f   : > { %v2602_v51 = vadd.f32 1.0, %v3322_v41 }
 0x9a0   : > { %v3324_v15 = vpop.eup %3323 }
 0x9a1   : > { %3327 = vrcp.f32 %v2602_v51  ;;  %v2600_v46 = vadd.f32 1.0, %v3324_v15 }
 0x9a3   : > { %3329 = vrcp.f32 %v2600_v46 }
 0x9a4   : > { %v3326_v52 = vpop.eup %3325 }
 0x9a5   : > { %v2601_v47 = vadd.f32 1.0, %v3326_v52 }
 0x9a7   : > { %3331 = vrcp.f32 %v2601_v47 }
 0x9ae   : > { %v3328_v12 = vpop.eup %3327 }
 0x9af   : > { %v2621_v25 = vsel %vm2618_vm3, %v3328_v12, %v2614_v31 }
 0x9b0   : > { %v3330_v30 = vpop.eup %3329  ;;  %v2625_v63 = vsel %vm2622_vm4, %v2621_v25, 0.0 }
 0x9b1   : > { %v2619_v28 = vsel %vm2618_vm3, %v3330_v30, %v2610_v34  ;;  %2628 = vst [vmem:[%s520_s27 + $0x10] sm:$0xff] %v2625_v63 }
 0x9b2   : > { %v2623_v3 = vsel %vm2622_vm4, %v2619_v28, 0.0 }
 0x9b3   : > { %2626 = vst [vmem:[%s520_s27] sm:$0xff] %v2623_v3 }
 0x9b4   : > { %v3332_v1 = vpop.eup %3331 }
 0x9b5   : > { %v2620_v26 = vsel %vm2618_vm3, %v3332_v1, %v2612_v9 }
 0x9b6   : > { %v2624_v16 = vsel %vm2622_vm4, %v2620_v26, 0.0 }
 0x9b7   : > { %2627 = vst [vmem:[%s520_s27 + $0x8] sm:$0xff] %v2624_v16 }
 0x9b8   : > { %3346 = shalt.err (!%p3343_p3)
}
 0x9b9   : > { %s3347_s25 = scalar_lea.hbm %s4040_s15, 384  ;;  %s3351_s18 = scalar_lea.hbm %s4100_s14, 1536 }
 0x9ba   : > { %p3348_p4 = scmp.ne.s32.totalorder %s4040_s15, %s3347_s25  ;;  %p3352_p9 = scmp.lt.s32.totalorder %s4040_s15, %s4100_s14 }
 0x9bb   : > { %p3353_p10 = scmp.lt.s32.totalorder %s3351_s18, %s3347_s25 }
 0x9bc   : > { %p3349_p7 = pnand %p3348_p4, %p3513_p5 }
 0x9bd   : > { %p3354_p11 = por %p3353_p10, %p3352_p9 }
 0x9be   : > { %p3350_p8 = pneg %p3349_p7 }
 0x9c0   : > { %p3355_p12 = pnand %p3354_p11, %p3350_p8 }
 0x9c2   : > { %3358 = shalt.err (!%p3355_p12)
}
 0x9c3   : > { %s3398_s21 = smov 128   ;;  %s3399_s26 = smov 8  }
 0x9c4   : > { %3183 = dma.vmem_to_hbm [thread:$0]  (%p3513_p5), %s4042_s28, 384, %s4040_s15, %s4046_s17, %s3398_s21, %s3398_s21, %s3399_s26  }
 0x9c5 PF: > { %p3189_p13 = scmp.ge.s32.totalorder %s3393_s16, 2  ;;  %s2658_s22 = sand.u32 1, %s3381_s29  }
 0x9c6   : > { %s2659_s0 = scalar_lea.sflag [#allocation3], %s2658_s22 }
 0x9c7   : > { %p3186_p0 = pnand %p3189_p13, %p3517_p6 }
 0x9c9   : > { %p3187_p1 = pneg %p3186_p0 }
 0x9cb   : > { %3376 = dma.done.wait (%p3187_p1), %s2659_s0, 384  }
 0x9cc   : > { %3378 = vsyncadd (%p3187_p1), %s2659_s0, 4294966912  ;;  %s4149_s25 = sld [smem:[#allocation5_spill]]  ;;  %p24_p2 = scmp.ge.s32.totalorder %s3500_s19, 6  }
 0x9cd   : > { %s4150_s15 = sld [smem:[#allocation6_spill]]  ;;  %s4151_s29 = smov %s3385_s30 }
 0x9ce   : > { %s4153_s16 = smov %s3500_s19  ;;  %26 = sbr.rel (!%p24_p2) target bundleno = 6 (0x6), region = 123 }
 0x9d2   : > { %s4152_s30 = smov %s4149_s25 }
 0x9d3   :  { %2664 = vsyncpa [#allocation3], 1 }
 0x9d4   :  { %2666 = vsyncpa [#allocation3 + $0x1], 1 }

// kernel: tpu_custom_call.1
= control target key start
LH: loop header
LB: loop body
LE: loop exit
PB: predicated region body
PF: predicated region fallthrough
CT: control target
= control target key end

     0   :  { %s4086_s0 = inlined_call_operand.vmem [shape: bf16[4,128,32], index: 0, kind: input, shape index: {}]   ;;  %s4087_s1 = inlined_call_operand.vmem [shape: bf16[4,192,48], index: 1, kind: input, shape index: {}]   ;;  %s4088_s2 = inlined_call_operand.vmem [shape: bf16[4,192,192], index: 2, kind: input, shape index: {}]   ;;  %s4089_s3 = inlined_call_operand.vmem [shape: bf16[4,128,192], index: 3, kind: input, shape index: {}]   ;;  %s4090_s4 = inlined_call_operand.vmem [shape: bf16[4,24,128], index: 4, kind: input, shape index: {}]   ;;  %s4091_s5 = inlined_call_operand.vmem [shape: bf16[48,32], index: 5, kind: input, shape index: {}]   ;;  %s4092_s6 = inlined_call_operand.vmem [shape: bf16[32,32], index: 6, kind: input, shape index: {}]   ;;  %s4093_s7 = inlined_call_operand.vmem [shape: bf16[32,32], index: 7, kind: input, shape index: {}]   ;;  %s4094_s8 = inlined_call_operand.vmem [shape: bf16[32,32], index: 8, kind: input, shape index: {}]   ;;  %s4095_s9 = inlined_call_operand.vmem [shape: f32[1,32], index: 9, kind: input, shape index: {}]   ;;  %s4096_s10 = inlined_call_operand.vmem [shape: bf16[32,32], index: 10, kind: input, shape index: {}]   ;;  %s4097_s11 = inlined_call_operand.vmem [shape: f32[1,32], index: 11, kind: input, shape index: {}]   ;;  %s4098_s12 = inlined_call_operand.vmem [shape: bf16[32,4], index: 12, kind: input, shape index: {}]   ;;  %s4099_s13 = inlined_call_operand.vmem [shape: f32[1,4], index: 13, kind: input, shape index: {}]   ;;  %s4100_s14 = inlined_call_operand.hbm [shape: f32[4,24,128], index: 14, kind: output, shape index: {}]  }
   0x1   :  { %4116 = sst [smem:[#allocation19_spill]] %s4086_s0 }
   0x2   :  { %4117 = sst [smem:[#allocation20_spill]] %s4087_s1 }
   0x3   :  { %19 = vsyncpa [#allocation3], 0 }
   0x4   :  { %21 = vsyncpa [#allocation3 + $0x1], 0  ;;  %s3475_s29 = smov 0   ;;  %s3477_s30 = smov 0  }
   0x5   :  { %s3479_s15 = smov 0   ;;  %s3481_s16 = smov 0  }
   0x6 LB: > { %4118 = sst [smem:[#allocation5_spill]] %s3389_s15  ;;  %s3496_s17 = sadd.s32 4294967295, %s3393_s16   ;;  %s3393_s16 = sphi %s3481_s16, %s4153_s16   ;;  %s3389_s15 = sphi %s3479_s15, %s4150_s15   ;;  %s3385_s30 = sphi %s3477_s30, %s4152_s30   ;;  %s3381_s29 = sphi %s3475_s29, %s4151_s29  }
   0x7   : > { %s2753_s18 = sadd.s32 4294967294, %s3393_s16   ;;  %s3500_s19 = sadd.s32 1, %s3393_s16  }
   0x8   : > { %s353_s20 = sadd.s32 1, %s3389_s15  ;;  %s350_s21 = ssub.s32 %s3393_s16, %s3500_s19 }
   0x9   : > { %p363_p0 = scmp.ne.s32.totalorder %s3389_s15, %s3385_s30  ;;  %p351_p1 = scmp.eq.s32.totalorder %s350_s21, 0 }
   0xa   : > { %p364_p2 = scmp.eq.s32.totalorder %s3496_s17, 3  ;;  %p369_p3 = scmp.ne.s32.totalorder %s3385_s30, %s3381_s29 }
   0xb   : > { %p370_p4 = scmp.eq.s32.totalorder %s2753_s18, 3  ;;  %p2756_p7 = scmp.ge.s32.totalorder %s3393_s16, 1 }
   0xc   : > { %s3511_s22 = scalar_select %p351_p1, %s3389_s15, %s353_s20  }
   0xd   : > { %p3513_p5 = por %p364_p2, %p363_p0  ;;  %p3517_p6 = por %p370_p4, %p369_p3 }
   0xe   : > { %4119 = sst [smem:[#allocation6_spill]] %s3511_s22  ;;  %p455_p8 = scmp.lt.s32.totalorder %s3393_s16, 5 }
  0x10   : > { %p456_p9 = pnand %p2756_p7, %p455_p8 }
  0x12   : > { %459 = sbr.rel (%p456_p9) target bundleno = 2501 (0x9c5), region = 76 }
  0x17   : > { %v3226_v0 = vld [vmem:[%s4091_s5 + $0x10] sm:$0xff]   ;;  %p521_p10 = scmp.lt.s32.totalorder %s3496_s17, 3  ;;  %v3227_v1 = vld [vmem:[%s4091_s5 + $0x8] sm:$0xff]   ;;  %vm683_vm0 = vcmask 392192   ;;  %v3228_v2 = vld [vmem:[%s4091_s5] sm:$0xff]   ;;  %s4122_s1 = sld [smem:[#allocation20_spill]] }
  0x18   : > { %3016 = vmatprep.subr.bf16.mxu0 %v3226_v0  ;;  %v4102_v15 = vmov 0   ;;  %vm993_vm1 = vcmask 523264   ;;  %vm1183_vm2 = vcmask 261120   ;;  %s4148_s0 = sld [smem:[#allocation19_spill]]  ;;  %vm2618_vm3 = vcmask 31744  }
  0x19   : > { %s3531_s18 = scalar_select %p521_p10, %s3496_s17, 3  ;;  %3017 = vmatpush3.bf16.msra.mxu0 %v3226_v0  ;;  %1030 = vmatprep.subr.bf16.mxu1 %v4102_v15  ;;  %vm2622_vm4 = vcmask 293888  }
  0x1a   : > { %3018 = vmatprep.subr.bf16.mxu0 %v3227_v1 }
  0x1b   : > { %s3179_s25 = smul.u32 96, %s3531_s18  ;;  %s2933_s28 = sshll.u32 %s3531_s18, 6 }
  0x1c   : > { %s3180_s22 = smul.u32 192, %s3531_s18 }
  0x1d   : > { %s530_s15 = scalar_lea.vmem %s4122_s1, %s3179_s25  ;;  %3019 = vmatpush3.bf16.msra.mxu0 %v3227_v1  ;;  %s3181_s26 = smul.u32 12, %s3531_s18 }
  0x1e   : > { %v3229_v3 = vld [vmem:[%s530_s15] sm:$0xff]   ;;  %3020 = vmatprep.subr.bf16.mxu0 %v3228_v2  ;;  %v3230_v4 = vld [vmem:[%s530_s15 + $0x8] sm:$0xff]   ;;  %v3231_v5 = vld [vmem:[%s530_s15 + $0x10] sm:$0xff]   ;;  %s3557_s20 = scalar_lea.vmem %s4088_s2, %s3180_s22  ;;  %s2934_s22 = sshll.u32 %s3531_s18, 7 }
  0x1f   : > { %3022 = vmatprep.mubr.msk.bf16.mxu0 %vm683_vm0, %v3229_v3  ;;  %v3232_v6 = vld [vmem:[%s530_s15 + $0x18] sm:$0xff]   ;;  %v3233_v7 = vld [vmem:[%s530_s15 + $0x20] sm:$0xff]   ;;  %v3234_v8 = vld [vmem:[%s530_s15 + $0x28] sm:$0xff]   ;;  %s3937_s1 = scalar_lea.vmem %s4148_s0, %s2933_s28  ;;  %s3970_s28 = scalar_lea.vmem %s4090_s4, %s3181_s26 }
  0x20   : > { %v3235_v9 = vld [vmem:[%s530_s15 + $0x30] sm:$0xff]   ;;  %v3236_v10 = vld [vmem:[%s530_s15 + $0x38] sm:$0xff]   ;;  %v3237_v11 = vld [vmem:[%s530_s15 + $0x40] sm:$0xff]   ;;  %s3396_s26 = smov 4   ;;  %s518_s25 = sand.u32 1, %s3385_s30  }
  0x21   : > { %3021 = vmatpush3.bf16.msra.mxu0 %v3228_v2  ;;  %v3238_v12 = vld [vmem:[%s530_s15 + $0x48] sm:$0xff]   ;;  %v3239_v13 = vld [vmem:[%s530_s15 + $0x50] sm:$0xff]   ;;  %v3240_v14 = vld [vmem:[%s530_s15 + $0x58] sm:$0xff]  }
  0x22   : > { %v3560_v16 = vld [vmem:[%s3557_s20 + $0x4] ss:$8 sps:$4 sm:$0xff]  }
  0x23   : > { %2815 = vmatprep.mubr.msk.bf16.mxu1 %vm993_vm1, %v3560_v16 }
  0x24   : > { %3023 = vmatmul.mubr.msk.bf16.vlgmr.msra.gmra.mxu0 %vm683_vm0, %v3230_v4 }
  0x25   : > { %3026 = vmatprep.mubr.msk.bf16.mxu0 %vm683_vm0, %v3231_v5 }
  0x2c   : > { %3027 = vmatmul.mubr.msk.bf16.gmra.mxu0 %vm683_vm0, %v3232_v6 }
  0x2d   : > { %3030 = vmatprep.mubr.msk.bf16.mxu0 %vm683_vm0, %v3233_v7 }
  0x34   : > { %3031 = vmatmul.mubr.msk.bf16.gmra.mxu0 %vm683_vm0, %v3234_v8 }
  0x35   : > { %3034 = vmatprep.mubr.msk.bf16.mxu0 %vm683_vm0, %v3235_v9 }
  0x3c   : > { %3035 = vmatmul.mubr.msk.bf16.gmra.mxu0 %vm683_vm0, %v3236_v10 }
  0x3d   : > { %3038 = vmatprep.mubr.msk.bf16.mxu0 %vm683_vm0, %v3237_v11 }
  0x44   : > { %3039 = vmatmul.mubr.msk.bf16.gmra.mxu0 %vm683_vm0, %v3238_v12 }
  0x45   : > { %3042 = vmatprep.mubr.msk.bf16.mxu0 %vm683_vm0, %v3239_v13  ;;  %v3648_v13 = vld [vmem:[%s3557_s20] ss:$8 sps:$4 sm:$0xff]  }
  0x4c   : > { %3043 = vmatmul.mubr.msk.bf16.gmra.mxu0 %vm683_vm0, %v3240_v14  ;;  %v3651_v14 = vld [vmem:[%s3557_s20 + $0x14] ss:$8 sps:$4 sm:$0xff]  }
  0xe4   : > { %v3564_v17 = vpop.f32.mrf.mxu0 }
  0xe5   : > { %v851_v58 = vmax.f32 %v3564_v17, 0.0 }
  0xe6   : > { %v3566_v18 = vpop.f32.mrf.mxu0 }
  0xe7   : > { %v849_v62 = vmax.f32 %v3566_v18, 0.0 }
  0xe8   : > { %v3568_v19 = vpop.f32.mrf.mxu0 }
  0xe9   : > { %v852_v55 = vmax.f32 %v3568_v19, 0.0 }
  0xea   : > { %v3570_v20 = vpop.f32.mrf.mxu0 }
  0xeb   : > { %v850_v59 = vmax.f32 %v3570_v20, 0.0  ;;  %v874_v60 = vpack.c.bf16 %v852_v55, %v851_v58  ;;  %v3732_v55 = vld [vmem:[%s3557_s20 + $0xa4] ss:$8 sps:$4 sm:$0xff]  }
  0xec   : > { %v3572_v21 = vpop.f32.mrf.mxu0  ;;  %4131 = vst [vmem:[#allocation15_spill] sm:$0xff] %v3732_v55  ;;  %v3278_v58 = vld [vmem:[%s4092_s6] sm:$0xff]  }
  0xed   : > { %v855_v50 = vmax.f32 %v3572_v21, 0.0  ;;  %v873_v1 = vpack.c.bf16 %v850_v59, %v849_v62  ;;  %v3744_v59 = vld [vmem:[%s3557_s20 + $0xa0] ss:$8 sps:$4 sm:$0xff]   ;;  %v3755_v62 = vld [vmem:[%s3557_s20 + $0xb0] ss:$8 sps:$4 sm:$0xff]  }
  0xee   : > { %v3574_v22 = vpop.f32.mrf.mxu0  ;;  %4132 = vst [vmem:[#allocation16_spill] sm:$0xff] %v3744_v59  ;;  %4134 = vst [vmem:[#allocation18_spill] sm:$0xff] %v3755_v62 }
  0xef   : > { %v853_v54 = vmax.f32 %v3574_v22, 0.0 }
  0xf0   : > { %v3576_v23 = vpop.f32.mrf.mxu0 }
  0xf1   : > { %v856_v47 = vmax.f32 %v3576_v23, 0.0 }
  0xf2   : > { %v3578_v24 = vpop.f32.mrf.mxu0 }
  0xf3   : > { %v854_v51 = vmax.f32 %v3578_v24, 0.0  ;;  %v876_v52 = vpack.c.bf16 %v856_v47, %v855_v50  ;;  %v3705_v47 = vld [vmem:[%s3557_s20 + $0x74] ss:$8 sps:$4 sm:$0xff]   ;;  %v3714_v50 = vld [vmem:[%s3557_s20 + $0x84] ss:$8 sps:$4 sm:$0xff]  }
  0xf4   : > { %v3580_v25 = vpop.f32.mrf.mxu0  ;;  %4125 = vst [vmem:[#allocation9_spill] sm:$0xff] %v3705_v47  ;;  %4127 = vst [vmem:[#allocation11_spill] sm:$0xff] %v3714_v50 }
  0xf5   : > { %v859_v42 = vmax.f32 %v3580_v25, 0.0  ;;  %v875_v56 = vpack.c.bf16 %v854_v51, %v853_v54  ;;  %v3720_v51 = vld [vmem:[%s3557_s20 + $0x80] ss:$8 sps:$4 sm:$0xff]   ;;  %v3729_v54 = vld [vmem:[%s3557_s20 + $0x90] ss:$8 sps:$4 sm:$0xff]  }
  0xf6   : > { %v3582_v26 = vpop.f32.mrf.mxu0  ;;  %4128 = vst [vmem:[#allocation12_spill] sm:$0xff] %v3720_v51  ;;  %4130 = vst [vmem:[#allocation14_spill] sm:$0xff] %v3729_v54 }
  0xf7   : > { %v857_v46 = vmax.f32 %v3582_v26, 0.0 }
  0xf8   : > { %v3584_v27 = vpop.f32.mrf.mxu0 }
  0xf9   : > { %v860_v39 = vmax.f32 %v3584_v27, 0.0 }
  0xfa   : > { %v3586_v28 = vpop.f32.mrf.mxu0 }
  0xfb   : > { %v858_v43 = vmax.f32 %v3586_v28, 0.0  ;;  %v878_v44 = vpack.c.bf16 %v860_v39, %v859_v42  ;;  %v3678_v39 = vld [vmem:[%s3557_s20 + $0x44] ss:$8 sps:$4 sm:$0xff]   ;;  %v3687_v42 = vld [vmem:[%s3557_s20 + $0x54] ss:$8 sps:$4 sm:$0xff]  }
  0xfc   : > { %v3588_v29 = vpop.f32.mrf.mxu0 }
  0xfd   : > { %v863_v32 = vmax.f32 %v3588_v29, 0.0  ;;  %v877_v48 = vpack.c.bf16 %v858_v43, %v857_v46  ;;  %v3693_v43 = vld [vmem:[%s3557_s20 + $0x50] ss:$8 sps:$4 sm:$0xff]   ;;  %v3702_v46 = vld [vmem:[%s3557_s20 + $0x60] ss:$8 sps:$4 sm:$0xff]  }
  0xfe   : > { %v3590_v30 = vpop.f32.mrf.mxu0  ;;  %4124 = vst [vmem:[#allocation8_spill] sm:$0xff] %v3702_v46 }
  0xff   : > { %v861_v38 = vmax.f32 %v3590_v30, 0.0 }
 0x100   : > { %v3592_v31 = vpop.f32.mrf.mxu0 }
 0x101   : > { %4123 = vst [vmem:[#allocation7_spill] sm:$0xff] %v3592_v31  ;;  %v864_v33 = vmax.f32 %v3592_v31, 0.0 }
 0x102   : > { %v3596_v34 = vpop.f32.mrf.mxu0 }
 0x103   : > { %v862_v35 = vmax.f32 %v3596_v34, 0.0  ;;  %v880_v36 = vpack.c.bf16 %v864_v33, %v863_v32  ;;  %v3657_v32 = vld [vmem:[%s3557_s20 + $0x10] ss:$8 sps:$4 sm:$0xff]   ;;  %v3660_v33 = vld [vmem:[%s3557_s20 + $0x24] ss:$8 sps:$4 sm:$0xff]  }
 0x104   : > { %v3599_v37 = vpop.f32.mrf.mxu0 }
 0x105   : > { %1031 = vmatpush1.bf16.msra.mxu1 %v880_v36  ;;  %v879_v40 = vpack.c.bf16 %v862_v35, %v861_v38  ;;  %v867_v6 = vmax.f32 %v3599_v37, 0.0  ;;  %v3666_v35 = vld [vmem:[%s3557_s20 + $0x20] ss:$8 sps:$4 sm:$0xff]   ;;  %v3669_v36 = vld [vmem:[%s3557_s20 + $0x34] ss:$8 sps:$4 sm:$0xff]  }
 0x106   : > { %1032 = vmatprep.subr.bf16.mxu1 %v4102_v15  ;;  %v3604_v41 = vpop.f32.mrf.mxu0  ;;  %v3675_v38 = vld [vmem:[%s3557_s20 + $0x30] ss:$8 sps:$4 sm:$0xff]  }
 0x107   : > { %v865_v9 = vmax.f32 %v3604_v41, 0.0 }
 0x108   : > { %v3609_v45 = vpop.f32.mrf.mxu0 }
 0x109   : > { %1033 = vmatpush1.bf16.msra.mxu1 %v879_v40  ;;  %v868_v7 = vmax.f32 %v3609_v45, 0.0  ;;  %v3684_v40 = vld [vmem:[%s3557_s20 + $0x40] ss:$8 sps:$4 sm:$0xff]  }
 0x10a   : > { %1034 = vmatprep.subr.bf16.mxu1 %v4102_v15  ;;  %v3614_v49 = vpop.f32.mrf.mxu0 }
 0x10b   : > { %v866_v10 = vmax.f32 %v3614_v49, 0.0  ;;  %v882_v11 = vpack.c.bf16 %v868_v7, %v867_v6 }
 0x10c   : > { %v3619_v53 = vpop.f32.mrf.mxu0 }
 0x10d   : > { %1035 = vmatpush1.bf16.msra.mxu1 %v878_v44  ;;  %v871_v63 = vmax.f32 %v3619_v53, 0.0  ;;  %v881_v12 = vpack.c.bf16 %v866_v10, %v865_v9  ;;  %v3696_v44 = vld [vmem:[%s3557_s20 + $0x64] ss:$8 sps:$4 sm:$0xff]  }
 0x10e   : > { %1036 = vmatprep.subr.bf16.mxu1 %v4102_v15  ;;  %v3624_v57 = vpop.f32.mrf.mxu0 }
 0x10f   : > { %v869_v3 = vmax.f32 %v3624_v57, 0.0 }
 0x110   : > { %v3629_v61 = vpop.f32.mrf.mxu0 }
 0x111   : > { %1037 = vmatpush1.bf16.msra.mxu1 %v877_v48  ;;  %v872_v0 = vmax.f32 %v3629_v61, 0.0  ;;  %v3711_v48 = vld [vmem:[%s3557_s20 + $0x70] ss:$8 sps:$4 sm:$0xff]  }
 0x112   : > { %1038 = vmatprep.subr.bf16.mxu1 %v4102_v15  ;;  %v3635_v2 = vpop.f32.mrf.mxu0  ;;  %4126 = vst [vmem:[#allocation10_spill] sm:$0xff] %v3711_v48 }
 0x113   : > { %v870_v4 = vmax.f32 %v3635_v2, 0.0  ;;  %v884_v5 = vpack.c.bf16 %v872_v0, %v871_v63 }
 0x115   : > { %1039 = vmatpush1.bf16.msra.mxu1 %v876_v52  ;;  %v883_v8 = vpack.c.bf16 %v870_v4, %v869_v3  ;;  %v3723_v52 = vld [vmem:[%s3557_s20 + $0x94] ss:$8 sps:$4 sm:$0xff]  }
 0x116   : > { %1040 = vmatprep.subr.bf16.mxu1 %v4102_v15  ;;  %4129 = vst [vmem:[#allocation13_spill] sm:$0xff] %v3723_v52 }
 0x119   : > { %1041 = vmatpush1.bf16.msra.mxu1 %v875_v56  ;;  %v3277_v56 = vld [vmem:[%s4092_s6 + $0x8] sm:$0xff]  }
 0x11a   : > { %1042 = vmatprep.subr.bf16.mxu1 %v4102_v15  ;;  %3046 = vmatprep.subr.bf16.mxu0 %v3277_v56 }
 0x11b   : > { %3047 = vmatpush3.bf16.msra.mxu0 %v3277_v56 }
 0x11c   : > { %3048 = vmatprep.subr.bf16.mxu0 %v3278_v58 }
 0x11d   : > { %1043 = vmatpush1.bf16.msra.mxu1 %v874_v60  ;;  %v3747_v60 = vld [vmem:[%s3557_s20 + $0xb4] ss:$8 sps:$4 sm:$0xff]   ;;  %s3860_s20 = scalar_lea.vmem %s4089_s3, %s2934_s22  ;;  %s3182_s22 = smul.u32 384, %s3496_s17 }
 0x11e   : > { %1044 = vmatprep.subr.bf16.mxu1 %v4102_v15  ;;  %4133 = vst [vmem:[#allocation17_spill] sm:$0xff] %v3747_v60  ;;  %s4046_s17 = scalar_lea.sflag [#allocation3], %s518_s25 }
 0x11f   : > { %3049 = vmatpush3.bf16.msra.mxu0 %v3278_v58  ;;  %s4040_s15 = scalar_lea.hbm %s4100_s14, %s3182_s22 }
 0x120   : > { %1409 = vmatprep.subr.bf16.mxu0 %v4102_v15 }
 0x121   : > { %1045 = vmatpush1.bf16.msra.mxu1 %v873_v1 }
 0x122   : > { %1054 = vmatprep.subr.bf16.mxu1 %v4102_v15 }
 0x125   : > { %1055 = vmatpush2.bf16.msra.mxu1 %v884_v5 }
 0x126   : > { %1056 = vmatprep.subr.bf16.mxu1 %v4102_v15 }
 0x129   : > { %1057 = vmatpush2.bf16.msra.mxu1 %v883_v8 }
 0x12a   : > { %1058 = vmatprep.subr.bf16.mxu1 %v4102_v15 }
 0x12d   : > { %1059 = vmatpush2.bf16.msra.mxu1 %v882_v11 }
 0x12e   : > { %1060 = vmatprep.subr.bf16.mxu1 %v4102_v15 }
 0x131   : > { %1061 = vmatpush2.bf16.msra.mxu1 %v881_v12 }
 0x132   : > { %3074 = vmatprep.subr.bf16.mxu1 %v3277_v56 }
 0x134   : > { %1063 = vmatmul.mubr.bf16.vlgmr.msra.gmra.mxu1 %v3648_v13 }
 0x135   : > { %2816 = vmatprep.mubr.msk.bf16.mxu1 %vm993_vm1, %v3651_v14  ;;  %3075 = vmatpush3.bf16.msra.mxu1 %v3277_v56 }
 0x136   : > { %3076 = vmatprep.subr.bf16.mxu1 %v3278_v58 }
 0x139   : > { %3077 = vmatpush3.bf16.msra.mxu1 %v3278_v58 }
 0x13a   : > { %1887 = vmatprep.subr.bf16.mxu1 %v4102_v15 }
 0x13c   : > { %1071 = vmatmul.mubr.bf16.gmra.mxu1 %v3657_v32 }
 0x13d   : > { %2817 = vmatprep.mubr.msk.bf16.mxu1 %vm993_vm1, %v3660_v33 }
 0x144   : > { %1079 = vmatmul.mubr.bf16.gmra.mxu1 %v3666_v35 }
 0x145   : > { %2818 = vmatprep.mubr.msk.bf16.mxu1 %vm993_vm1, %v3669_v36 }
 0x14c   : > { %1087 = vmatmul.mubr.bf16.gmra.mxu1 %v3675_v38 }
 0x14d   : > { %2819 = vmatprep.mubr.msk.bf16.mxu1 %vm993_vm1, %v3678_v39 }
 0x154   : > { %1095 = vmatmul.mubr.bf16.gmra.mxu1 %v3684_v40 }
 0x155   : > { %2820 = vmatprep.mubr.msk.bf16.mxu1 %vm993_vm1, %v3687_v42 }
 0x15c   : > { %1103 = vmatmul.mubr.bf16.gmra.mxu1 %v3693_v43 }
 0x15d   : > { %2821 = vmatprep.mubr.msk.bf16.mxu1 %vm993_vm1, %v3696_v44 }
 0x164   : > { %1111 = vmatmul.mubr.bf16.gmra.mxu1 %v3702_v46  ;;  %v4135_v46 = vmov 0  }
 0x165   : > { %2822 = vmatprep.mubr.msk.bf16.mxu1 %vm993_vm1, %v3705_v47 }
 0x16c   : > { %1119 = vmatmul.mubr.bf16.gmra.mxu1 %v3711_v48 }
 0x16d   : > { %2823 = vmatprep.mubr.msk.bf16.mxu1 %vm993_vm1, %v3714_v50 }
 0x174   : > { %1127 = vmatmul.mubr.bf16.gmra.mxu1 %v3720_v51 }
 0x175   : > { %2824 = vmatprep.mubr.msk.bf16.mxu1 %vm993_vm1, %v3723_v52 }
 0x17c   : > { %1135 = vmatmul.mubr.bf16.gmra.mxu1 %v3729_v54 }
 0x17d   : > { %2825 = vmatprep.mubr.msk.bf16.mxu1 %vm993_vm1, %v3732_v55 }
 0x184   : > { %1143 = vmatmul.mubr.bf16.gmra.mxu1 %v3744_v59 }
 0x185   : > { %2826 = vmatprep.mubr.msk.bf16.mxu1 %vm993_vm1, %v3747_v60 }
 0x18c   : > { %1151 = vmatmul.mubr.bf16.gmra.mxu1 %v3755_v62 }
 0x1f4   : > { %v1064_v63 = vpop.f32.mrf.mxu1 }
 0x1f6   : > { %v1066_v0 = vpop.f32.mrf.mxu1 }
 0x1f8   : > { %v1067_v1 = vpop.f32.mrf.mxu1 }
 0x1f9   : > { %v1159_v3 = vpack.c.bf16 %v1067_v1, %v1064_v63 }
 0x1fa   : > { %v1069_v4 = vpop.f32.mrf.mxu1 }
 0x1fb   : > { %3050 = vmatprep.mubr.msk.bf16.mxu0 %vm1183_vm2, %v1159_v3 }
 0x1fc   : > { %v1072_v5 = vpop.f32.mrf.mxu1 }
 0x1fe   : > { %v1074_v6 = vpop.f32.mrf.mxu1 }
 0x200   : > { %v1075_v7 = vpop.f32.mrf.mxu1 }
 0x201   : > { %v1160_v8 = vpack.c.bf16 %v1075_v7, %v1072_v5 }
 0x202   : > { %v1077_v9 = vpop.f32.mrf.mxu1 }
 0x203   : > { %3051 = vmatmul.mubr.msk.bf16.vlgmr.msra.gmra.mxu0 %vm1183_vm2, %v1160_v8 }
 0x204   : > { %v1080_v10 = vpop.f32.mrf.mxu1 }
 0x206   : > { %v1082_v11 = vpop.f32.mrf.mxu1 }
 0x208   : > { %v1083_v12 = vpop.f32.mrf.mxu1 }
 0x209   : > { %v1161_v56 = vpack.c.bf16 %v1083_v12, %v1080_v10 }
 0x20a   : > { %v1085_v58 = vpop.f32.mrf.mxu1 }
 0x20b   : > { %3054 = vmatprep.mubr.msk.bf16.mxu0 %vm1183_vm2, %v1161_v56 }
 0x20c   : > { %v1088_v0 = vpop.f32.mrf.mxu1 }
 0x20e   : > { %v1090_v15 = vpop.f32.mrf.mxu1 }
 0x210   : > { %v1091_v63 = vpop.f32.mrf.mxu1 }
 0x211   : > { %v1162_v1 = vpack.c.bf16 %v1091_v63, %v1088_v0 }
 0x212   : > { %v1093_v4 = vpop.f32.mrf.mxu1 }
 0x213   : > { %3055 = vmatmul.mubr.msk.bf16.gmra.mxu0 %vm1183_vm2, %v1162_v1 }
 0x214   : > { %v1096_v3 = vpop.f32.mrf.mxu1 }
 0x216   : > { %v1098_v6 = vpop.f32.mrf.mxu1 }
 0x218   : > { %v1099_v5 = vpop.f32.mrf.mxu1 }
 0x219   : > { %v1163_v7 = vpack.c.bf16 %v1099_v5, %v1096_v3 }
 0x21a   : > { %v1101_v9 = vpop.f32.mrf.mxu1 }
 0x21b   : > { %3058 = vmatprep.mubr.msk.bf16.mxu0 %vm1183_vm2, %v1163_v7 }
 0x21c   : > { %v1104_v8 = vpop.f32.mrf.mxu1 }
 0x21e   : > { %v1106_v11 = vpop.f32.mrf.mxu1 }
 0x220   : > { %v1107_v10 = vpop.f32.mrf.mxu1 }
 0x221   : > { %v1164_v12 = vpack.c.bf16 %v1107_v10, %v1104_v8 }
 0x222   : > { %v1109_v58 = vpop.f32.mrf.mxu1 }
 0x223   : > { %3059 = vmatmul.mubr.msk.bf16.gmra.mxu0 %vm1183_vm2, %v1164_v12 }
 0x224   : > { %v1112_v15 = vpop.f32.mrf.mxu1 }
 0x226   : > { %v1114_v56 = vpop.f32.mrf.mxu1 }
 0x228   : > { %v1115_v0 = vpop.f32.mrf.mxu1 }
 0x229   : > { %v1165_v63 = vpack.c.bf16 %v1115_v0, %v1112_v15 }
 0x22a   : > { %v1117_v4 = vpop.f32.mrf.mxu1 }
 0x22b   : > { %3062 = vmatprep.mubr.msk.bf16.mxu0 %vm1183_vm2, %v1165_v63 }
 0x22c   : > { %v1120_v1 = vpop.f32.mrf.mxu1 }
 0x22e   : > { %v1122_v6 = vpop.f32.mrf.mxu1 }
 0x230   : > { %v1123_v3 = vpop.f32.mrf.mxu1 }
 0x231   : > { %v1166_v5 = vpack.c.bf16 %v1123_v3, %v1120_v1 }
 0x232   : > { %v1125_v9 = vpop.f32.mrf.mxu1 }
 0x233   : > { %3063 = vmatmul.mubr.msk.bf16.gmra.mxu0 %vm1183_vm2, %v1166_v5 }
 0x234   : > { %v1128_v7 = vpop.f32.mrf.mxu1 }
 0x236   : > { %v1130_v11 = vpop.f32.mrf.mxu1 }
 0x238   : > { %v1131_v8 = vpop.f32.mrf.mxu1 }
 0x239   : > { %v1167_v10 = vpack.c.bf16 %v1131_v8, %v1128_v7 }
 0x23a   : > { %v1133_v58 = vpop.f32.mrf.mxu1 }
 0x23b   : > { %3066 = vmatprep.mubr.msk.bf16.mxu0 %vm1183_vm2, %v1167_v10 }
 0x23c   : > { %v1136_v12 = vpop.f32.mrf.mxu1 }
 0x23e   : > { %v1138_v56 = vpop.f32.mrf.mxu1 }
 0x240   : > { %v1139_v15 = vpop.f32.mrf.mxu1 }
 0x241   : > { %v1168_v0 = vpack.c.bf16 %v1139_v15, %v1136_v12 }
 0x242   : > { %v1141_v4 = vpop.f32.mrf.mxu1 }
 0x243   : > { %3067 = vmatmul.mubr.msk.bf16.gmra.mxu0 %vm1183_vm2, %v1168_v0 }
 0x244   : > { %v1144_v63 = vpop.f32.mrf.mxu1 }
 0x246   : > { %v1146_v6 = vpop.f32.mrf.mxu1 }
 0x248   : > { %v1147_v1 = vpop.f32.mrf.mxu1 }
 0x249   : > { %v1169_v3 = vpack.c.bf16 %v1147_v1, %v1144_v63 }
 0x24a   : > { %v1149_v9 = vpop.f32.mrf.mxu1 }
 0x24b   : > { %3070 = vmatprep.mubr.msk.bf16.mxu0 %vm1183_vm2, %v1169_v3 }
 0x24c   : > { %v1152_v5 = vpop.f32.mrf.mxu1 }
 0x24e   : > { %v1154_v11 = vpop.f32.mrf.mxu1 }
 0x250   : > { %v1155_v7 = vpop.f32.mrf.mxu1 }
 0x251   : > { %v1170_v8 = vpack.c.bf16 %v1155_v7, %v1152_v5 }
 0x252   : > { %v1157_v58 = vpop.f32.mrf.mxu1 }
 0x253   : > { %3071 = vmatmul.mubr.msk.bf16.gmra.mxu0 %vm1183_vm2, %v1170_v8 }
 0x254   : > { %2841 = vmatprep.mubr.msk.bf16.mxu0 %vm993_vm1, %v3560_v16 }
 0x2c3   : > { %v3052_v10 = vpop.f32.mrf.mxu0 }
 0x2c5   : > { %v3772_v12 = vpop.f32.mrf.mxu0 }
 0x2c7   : > { %v3053_v56 = vpop.f32.mrf.mxu0 }
 0x2c9   : > { %v1257_v15 = vpop.f32.mrf.mxu0 }
 0x2d3   : > { %v3056_v0 = vpop.f32.mrf.mxu0 }
 0x2d5   : > { %v1270_v4 = vpop.f32.mrf.mxu0 }
 0x2d7   : > { %v3057_v63 = vpop.f32.mrf.mxu0 }
 0x2d9   : > { %v1273_v6 = vpop.f32.mrf.mxu0 }
 0x2e3   : > { %v3060_v1 = vpop.f32.mrf.mxu0 }
 0x2e4   : > { %v1359_v48 = vadd.f32 %v3060_v1, %v3580_v25 }
 0x2e5   : > { %v1286_v3 = vpop.f32.mrf.mxu0 }
 0x2e7   : > { %v3061_v9 = vpop.f32.mrf.mxu0 }
 0x2e8   : > { %v1360_v52 = vadd.f32 %v3061_v9, %v3584_v27 }
 0x2e9   : > { %v1289_v11 = vpop.f32.mrf.mxu0 }
 0x2f3   : > { %v3064_v5 = vpop.f32.mrf.mxu0 }
 0x2f4   : > { %v1363_v8 = vadd.f32 %v3064_v5, %v3588_v29  ;;  %v1384_v5 = vmax.f32 %v1360_v52, 0.0 }
 0x2f5   : > { %v1302_v7 = vpop.f32.mrf.mxu0 }
 0x2f6   : > { %v1387_v60 = vmax.f32 %v1363_v8, 0.0  ;;  %v1361_v59 = vadd.f32 %v1302_v7, %v3590_v30  ;;  %v1383_v8 = vmax.f32 %v1359_v48, 0.0  ;;  %v1357_v7 = vadd.f32 %v1286_v3, %v3582_v26 }
 0x2f7   : > { %v3065_v58 = vpop.f32.mrf.mxu0 }
 0x2f8   : > { %v1364_v16 = vadd.f32 %v3065_v58, %v3592_v31  ;;  %v1385_v47 = vmax.f32 %v1361_v59, 0.0  ;;  %v1358_v58 = vadd.f32 %v1289_v11, %v3586_v28  ;;  %v1355_v59 = vadd.f32 %v3056_v0, %v3572_v21 }
 0x2f9   : > { %v1305_v62 = vpop.f32.mrf.mxu0  ;;  %v1351_v11 = vadd.f32 %v3052_v10, %v3564_v17 }
 0x2fa   : > { %v1388_v55 = vmax.f32 %v1364_v16, 0.0  ;;  %v1362_v54 = vadd.f32 %v1305_v62, %v3596_v34  ;;  %v1356_v62 = vadd.f32 %v3057_v63, %v3576_v23  ;;  %v1379_v1 = vmax.f32 %v1355_v59, 0.0 }
 0x2fb   : > { %v1352_v63 = vadd.f32 %v3053_v56, %v3568_v19 }
 0x2fc   : > { %v1404_v51 = vpack.c.bf16 %v1388_v55, %v1387_v60  ;;  %v1386_v50 = vmax.f32 %v1362_v54, 0.0  ;;  %v1402_v55 = vpack.c.bf16 %v1384_v5, %v1383_v8  ;;  %v1382_v54 = vmax.f32 %v1358_v58, 0.0 }
 0x2fd   : > { %v1380_v52 = vmax.f32 %v1356_v62, 0.0  ;;  %v1350_v5 = vadd.f32 %v1257_v15, %v3570_v20 }
 0x2fe   : > { %1410 = vmatpush1.bf16.msra.mxu0 %v1404_v51  ;;  %v1403_v31 = vpack.c.bf16 %v1386_v50, %v1385_v47  ;;  %v1381_v51 = vmax.f32 %v1357_v7, 0.0  ;;  %v1354_v47 = vadd.f32 %v1273_v6, %v3578_v24  ;;  %v1376_v6 = vmax.f32 %v1352_v63, 0.0 }
 0x2ff   : > { %1411 = vmatprep.subr.bf16.mxu0 %v4135_v46  ;;  %v1400_v3 = vpack.c.bf16 %v1380_v52, %v1379_v1  ;;  %v1349_v7 = vadd.f32 %v3772_v12, %v3566_v18 }
 0x300   : > { %v1401_v48 = vpack.c.bf16 %v1382_v54, %v1381_v51  ;;  %v1378_v9 = vmax.f32 %v1354_v47, 0.0 }
 0x301   : > { %v1373_v54 = vmax.f32 %v1349_v7, 0.0 }
 0x302   : > { %1412 = vmatpush1.bf16.msra.mxu0 %v1403_v31  ;;  %v1353_v31 = vadd.f32 %v1270_v4, %v3574_v22  ;;  %v1375_v4 = vmax.f32 %v1351_v11, 0.0 }
 0x303   : > { %1413 = vmatprep.subr.bf16.mxu0 %v4135_v46  ;;  %v3068_v60 = vpop.f32.mrf.mxu0 }
 0x304   : > { %v1377_v16 = vmax.f32 %v1353_v31, 0.0  ;;  %v1398_v62 = vpack.c.bf16 %v1376_v6, %v1375_v4  ;;  %v1367_v11 = vadd.f32 %v3068_v60, %v3599_v37 }
 0x305   : > { %v1318_v50 = vpop.f32.mrf.mxu0 }
 0x306   : > { %1414 = vmatpush1.bf16.msra.mxu0 %v1402_v55  ;;  %v1399_v58 = vpack.c.bf16 %v1378_v9, %v1377_v16  ;;  %v1374_v55 = vmax.f32 %v1350_v5, 0.0  ;;  %v1391_v4 = vmax.f32 %v1367_v11, 0.0  ;;  %v1365_v7 = vadd.f32 %v1318_v50, %v3604_v41 }
 0x307   : > { %1415 = vmatprep.subr.bf16.mxu0 %v4135_v46  ;;  %v3069_v0 = vpop.f32.mrf.mxu0 }
 0x308   : > { %v1397_v15 = vpack.c.bf16 %v1374_v55, %v1373_v54  ;;  %v1368_v63 = vadd.f32 %v3069_v0, %v3609_v45 }
 0x309   : > { %v1321_v8 = vpop.f32.mrf.mxu0 }
 0x30a   : > { %1416 = vmatpush1.bf16.msra.mxu0 %v1401_v48  ;;  %v1392_v6 = vmax.f32 %v1368_v63, 0.0  ;;  %v1366_v5 = vadd.f32 %v1321_v8, %v3614_v49 }
 0x30b   : > { %1417 = vmatprep.subr.bf16.mxu0 %v4135_v46 }
 0x30c   : > { %v1390_v0 = vmax.f32 %v1366_v5, 0.0 }
 0x30e   : > { %1418 = vmatpush1.bf16.msra.mxu0 %v1400_v3 }
 0x30f   : > { %1419 = vmatprep.subr.bf16.mxu0 %v4135_v46 }
 0x312   : > { %1420 = vmatpush1.bf16.msra.mxu0 %v1399_v58 }
 0x313   : > { %v3072_v56 = vpop.f32.mrf.mxu0  ;;  %1421 = vmatprep.subr.bf16.mxu0 %v4135_v46 }
 0x314   : > { %v1371_v59 = vadd.f32 %v3072_v56, %v3619_v53  ;;  %v1406_v56 = vpack.c.bf16 %v1392_v6, %v1391_v4 }
 0x315   : > { %v1334_v10 = vpop.f32.mrf.mxu0 }
 0x316   : > { %1422 = vmatpush1.bf16.msra.mxu0 %v1398_v62  ;;  %v1395_v48 = vmax.f32 %v1371_v59, 0.0  ;;  %v1369_v12 = vadd.f32 %v1334_v10, %v3624_v57  ;;  %v1389_v62 = vmax.f32 %v1365_v7, 0.0 }
 0x317   : > { %v3073_v51 = vpop.f32.mrf.mxu0  ;;  %1423 = vmatprep.subr.bf16.mxu0 %v4135_v46 }
 0x318   : > { %v1372_v52 = vadd.f32 %v3073_v51, %v3629_v61  ;;  %v1393_v16 = vmax.f32 %v1369_v12, 0.0  ;;  %v1405_v60 = vpack.c.bf16 %v1390_v0, %v1389_v62 }
 0x319   : > { %v1337_v47 = vpop.f32.mrf.mxu0 }
 0x31a   : > { %v1396_v1 = vmax.f32 %v1372_v52, 0.0  ;;  %v1370_v31 = vadd.f32 %v1337_v47, %v3635_v2  ;;  %1424 = vmatpush1.bf16.msra.mxu0 %v1397_v15 }
 0x31b   : > { %1433 = vmatprep.subr.bf16.mxu0 %v4135_v46 }
 0x31c   : > { %v1408_v3 = vpack.c.bf16 %v1396_v1, %v1395_v48  ;;  %v1394_v9 = vmax.f32 %v1370_v31, 0.0 }
 0x31e   : > { %1434 = vmatpush2.bf16.msra.mxu0 %v1408_v3  ;;  %v1407_v58 = vpack.c.bf16 %v1394_v9, %v1393_v16 }
 0x31f   : > { %1435 = vmatprep.subr.bf16.mxu0 %v4135_v46 }
 0x322   : > { %1436 = vmatpush2.bf16.msra.mxu0 %v1407_v58 }
 0x323   : > { %1437 = vmatprep.subr.bf16.mxu0 %v4135_v46 }
 0x326   : > { %1438 = vmatpush2.bf16.msra.mxu0 %v1406_v56 }
 0x327   : > { %1439 = vmatprep.subr.bf16.mxu0 %v4135_v46 }
 0x32a   : > { %1440 = vmatpush2.bf16.msra.mxu0 %v1405_v60 }
 0x32d   : > { %1442 = vmatmul.mubr.bf16.vlgmr.msra.gmra.mxu0 %v3648_v13  ;;  %v4136_v13 = vld [vmem:[#allocation8_spill] sm:$0xff] }
 0x32e   : > { %2842 = vmatprep.mubr.msk.bf16.mxu0 %vm993_vm1, %v3651_v14  ;;  %v4137_v14 = vld [vmem:[#allocation9_spill] sm:$0xff] }
 0x335   : > { %1450 = vmatmul.mubr.bf16.gmra.mxu0 %v3657_v32  ;;  %v4138_v32 = vld [vmem:[#allocation10_spill] sm:$0xff] }
 0x336   : > { %2843 = vmatprep.mubr.msk.bf16.mxu0 %vm993_vm1, %v3660_v33  ;;  %v4139_v33 = vld [vmem:[#allocation11_spill] sm:$0xff] }
 0x33d   : > { %1458 = vmatmul.mubr.bf16.gmra.mxu0 %v3666_v35  ;;  %v4140_v35 = vld [vmem:[#allocation12_spill] sm:$0xff] }
 0x33e   : > { %2844 = vmatprep.mubr.msk.bf16.mxu0 %vm993_vm1, %v3669_v36  ;;  %v4141_v36 = vld [vmem:[#allocation13_spill] sm:$0xff] }
 0x345   : > { %1466 = vmatmul.mubr.bf16.gmra.mxu0 %v3675_v38  ;;  %v4142_v38 = vld [vmem:[#allocation14_spill] sm:$0xff] }
 0x346   : > { %2845 = vmatprep.mubr.msk.bf16.mxu0 %vm993_vm1, %v3678_v39  ;;  %v4143_v39 = vld [vmem:[#allocation15_spill] sm:$0xff] }
 0x34d   : > { %1474 = vmatmul.mubr.bf16.gmra.mxu0 %v3684_v40  ;;  %v4144_v40 = vld [vmem:[#allocation16_spill] sm:$0xff] }
 0x34e   : > { %2846 = vmatprep.mubr.msk.bf16.mxu0 %vm993_vm1, %v3687_v42  ;;  %v4145_v42 = vld [vmem:[#allocation17_spill] sm:$0xff] }
 0x355   : > { %1482 = vmatmul.mubr.bf16.gmra.mxu0 %v3693_v43  ;;  %v4146_v43 = vld [vmem:[#allocation18_spill] sm:$0xff] }
 0x356   : > { %2847 = vmatprep.mubr.msk.bf16.mxu0 %vm993_vm1, %v3696_v44 }
 0x35d   : > { %1490 = vmatmul.mubr.bf16.gmra.mxu0 %v4136_v13 }
 0x35e   : > { %2848 = vmatprep.mubr.msk.bf16.mxu0 %vm993_vm1, %v4137_v14 }
 0x365   : > { %1498 = vmatmul.mubr.bf16.gmra.mxu0 %v4138_v32 }
 0x366   : > { %2849 = vmatprep.mubr.msk.bf16.mxu0 %vm993_vm1, %v4139_v33 }
 0x36d   : > { %1506 = vmatmul.mubr.bf16.gmra.mxu0 %v4140_v35 }
 0x36e   : > { %2850 = vmatprep.mubr.msk.bf16.mxu0 %vm993_vm1, %v4141_v36 }
 0x375   : > { %1514 = vmatmul.mubr.bf16.gmra.mxu0 %v4142_v38 }
 0x376   : > { %2851 = vmatprep.mubr.msk.bf16.mxu0 %vm993_vm1, %v4143_v39 }
 0x37d   : > { %1522 = vmatmul.mubr.bf16.gmra.mxu0 %v4144_v40 }
 0x37e   : > { %2852 = vmatprep.mubr.msk.bf16.mxu0 %vm993_vm1, %v4145_v42 }
 0x385   : > { %1530 = vmatmul.mubr.bf16.gmra.mxu0 %v4146_v43 }
 0x3ed   : > { %v1443_v44 = vpop.f32.mrf.mxu0 }
 0x3ef   : > { %v1445_v50 = vpop.f32.mrf.mxu0 }
 0x3f1   : > { %v1446_v8 = vpop.f32.mrf.mxu0 }
 0x3f2   : > { %v1538_v55 = vpack.c.bf16 %v1446_v8, %v1443_v44 }
 0x3f3   : > { %v1448_v10 = vpop.f32.mrf.mxu0 }
 0x3f4   : > { %3078 = vmatprep.mubr.msk.bf16.mxu1 %vm1183_vm2, %v1538_v55 }
 0x3f5   : > { %v1451_v54 = vpop.f32.mrf.mxu0 }
 0x3f7   : > { %v1453_v59 = vpop.f32.mrf.mxu0 }
 0x3f9   : > { %v1454_v51 = vpop.f32.mrf.mxu0 }
 0x3fa   : > { %v1539_v15 = vpack.c.bf16 %v1454_v51, %v1451_v54 }
 0x3fb   : > { %v1456_v52 = vpop.f32.mrf.mxu0 }
 0x3fc   : > { %3079 = vmatmul.mubr.msk.bf16.vlgmr.msra.gmra.mxu1 %vm1183_vm2, %v1539_v15 }
 0x3fd   : > { %v1459_v47 = vpop.f32.mrf.mxu0 }
 0x3ff   : > { %v1461_v48 = vpop.f32.mrf.mxu0 }
 0x401   : > { %v1462_v12 = vpop.f32.mrf.mxu0 }
 0x402   : > { %v1540_v1 = vpack.c.bf16 %v1462_v12, %v1459_v47 }
 0x403   : > { %v1464_v31 = vpop.f32.mrf.mxu0 }
 0x404   : > { %3082 = vmatprep.mubr.msk.bf16.mxu1 %vm1183_vm2, %v1540_v1 }
 0x405   : > { %v1467_v63 = vpop.f32.mrf.mxu0 }
 0x407   : > { %v1469_v3 = vpop.f32.mrf.mxu0 }
 0x409   : > { %v1470_v9 = vpop.f32.mrf.mxu0 }
 0x40a   : > { %v1541_v11 = vpack.c.bf16 %v1470_v9, %v1467_v63 }
 0x40b   : > { %v1472_v16 = vpop.f32.mrf.mxu0 }
 0x40c   : > { %3083 = vmatmul.mubr.msk.bf16.gmra.mxu1 %vm1183_vm2, %v1541_v11 }
 0x40d   : > { %v1475_v6 = vpop.f32.mrf.mxu0 }
 0x40f   : > { %v1477_v5 = vpop.f32.mrf.mxu0 }
 0x411   : > { %v1478_v58 = vpop.f32.mrf.mxu0 }
 0x412   : > { %v1542_v4 = vpack.c.bf16 %v1478_v58, %v1475_v6  ;;  %v3281_v6 = vld [vmem:[%s3860_s20 + $0x4] ss:$8 sps:$4 sm:$0xff]  }
 0x413   : > { %v1480_v7 = vpop.f32.mrf.mxu0 }
 0x414   : > { %3086 = vmatprep.mubr.msk.bf16.mxu1 %vm1183_vm2, %v1542_v4 }
 0x415   : > { %v1483_v56 = vpop.f32.mrf.mxu0 }
 0x417   : > { %v1485_v0 = vpop.f32.mrf.mxu0 }
 0x419   : > { %v1486_v62 = vpop.f32.mrf.mxu0 }
 0x41a   : > { %v1543_v60 = vpack.c.bf16 %v1486_v62, %v1483_v56 }
 0x41b   : > { %v1488_v13 = vpop.f32.mrf.mxu0 }
 0x41c   : > { %3087 = vmatmul.mubr.msk.bf16.gmra.mxu1 %vm1183_vm2, %v1543_v60 }
 0x41d   : > { %v1491_v14 = vpop.f32.mrf.mxu0 }
 0x41f   : > { %v1493_v32 = vpop.f32.mrf.mxu0 }
 0x421   : > { %v1494_v33 = vpop.f32.mrf.mxu0 }
 0x422   : > { %v1544_v35 = vpack.c.bf16 %v1494_v33, %v1491_v14  ;;  %v3303_v14 = vld [vmem:[%s4094_s8 + $0x8] sm:$0xff]  }
 0x423   : > { %v1496_v36 = vpop.f32.mrf.mxu0  ;;  %3102 = vmatprep.subr.bf16.mxu0 %v3303_v14 }
 0x424   : > { %3090 = vmatprep.mubr.msk.bf16.mxu1 %vm1183_vm2, %v1544_v35  ;;  %3103 = vmatpush3.bf16.msra.mxu0 %v3303_v14 }
 0x425   : > { %v1499_v38 = vpop.f32.mrf.mxu0 }
 0x427   : > { %v1501_v39 = vpop.f32.mrf.mxu0 }
 0x429   : > { %v1502_v40 = vpop.f32.mrf.mxu0 }
 0x42a   : > { %v1545_v42 = vpack.c.bf16 %v1502_v40, %v1499_v38 }
 0x42b   : > { %v1504_v43 = vpop.f32.mrf.mxu0 }
 0x42c   : > { %3091 = vmatmul.mubr.msk.bf16.gmra.mxu1 %vm1183_vm2, %v1545_v42  ;;  %v4147_v42 = vld [vmem:[#allocation7_spill] sm:$0xff] }
 0x42d   : > { %v1507_v44 = vpop.f32.mrf.mxu0 }
 0x42f   : > { %v1509_v50 = vpop.f32.mrf.mxu0 }
 0x431   : > { %v1510_v8 = vpop.f32.mrf.mxu0 }
 0x432   : > { %v1546_v55 = vpack.c.bf16 %v1510_v8, %v1507_v44 }
 0x433   : > { %v1512_v10 = vpop.f32.mrf.mxu0 }
 0x434   : > { %3094 = vmatprep.mubr.msk.bf16.mxu1 %vm1183_vm2, %v1546_v55 }
 0x435   : > { %v1515_v54 = vpop.f32.mrf.mxu0 }
 0x437   : > { %v1517_v59 = vpop.f32.mrf.mxu0 }
 0x439   : > { %v1518_v51 = vpop.f32.mrf.mxu0 }
 0x43a   : > { %v1547_v15 = vpack.c.bf16 %v1518_v51, %v1515_v54 }
 0x43b   : > { %v1520_v52 = vpop.f32.mrf.mxu0 }
 0x43c   : > { %3095 = vmatmul.mubr.msk.bf16.gmra.mxu1 %vm1183_vm2, %v1547_v15 }
 0x43d   : > { %v1523_v47 = vpop.f32.mrf.mxu0 }
 0x43f   : > { %v1525_v48 = vpop.f32.mrf.mxu0 }
 0x441   : > { %v1526_v12 = vpop.f32.mrf.mxu0 }
 0x442   : > { %v1548_v1 = vpack.c.bf16 %v1526_v12, %v1523_v47 }
 0x443   : > { %v1528_v31 = vpop.f32.mrf.mxu0 }
 0x444   : > { %3098 = vmatprep.mubr.msk.bf16.mxu1 %vm1183_vm2, %v1548_v1 }
 0x445   : > { %v1531_v63 = vpop.f32.mrf.mxu0 }
 0x447   : > { %v1533_v3 = vpop.f32.mrf.mxu0 }
 0x449   : > { %v1534_v9 = vpop.f32.mrf.mxu0 }
 0x44a   : > { %v1549_v11 = vpack.c.bf16 %v1534_v9, %v1531_v63 }
 0x44b   : > { %v1536_v16 = vpop.f32.mrf.mxu0 }
 0x44c   : > { %3099 = vmatmul.mubr.msk.bf16.gmra.mxu1 %vm1183_vm2, %v1549_v11 }
 0x44d   : > { %2881 = vmatprep.mubr.msk.bf16.mxu1 %vm993_vm1, %v3281_v6 }
 0x4bc   : > { %v3080_v5 = vpop.f32.mrf.mxu1 }
 0x4be   : > { %v3864_v58 = vpop.f32.mrf.mxu1 }
 0x4c0   : > { %v3081_v4 = vpop.f32.mrf.mxu1 }
 0x4c2   : > { %v1623_v7 = vpop.f32.mrf.mxu1 }
 0x4cc   : > { %v3084_v56 = vpop.f32.mrf.mxu1 }
 0x4ce   : > { %v1636_v0 = vpop.f32.mrf.mxu1 }
 0x4cf   : > { %v1719_v16 = vadd.f32 %v1636_v0, %v3574_v22  ;;  %v1715_v0 = vadd.f32 %v3864_v58, %v3566_v18 }
 0x4d0   : > { %v3085_v62 = vpop.f32.mrf.mxu1 }
 0x4d2   : > { %v1639_v60 = vpop.f32.mrf.mxu1 }
 0x4dc   : > { %v3088_v13 = vpop.f32.mrf.mxu1 }
 0x4dd   : > { %v1725_v15 = vadd.f32 %v3088_v13, %v3580_v25  ;;  %v1721_v25 = vadd.f32 %v3084_v56, %v3572_v21  ;;  %v1717_v56 = vadd.f32 %v3080_v5, %v3564_v17  ;;  %v1743_v13 = vmax.f32 %v1719_v16, 0.0 }
 0x4de   : > { %v1652_v32 = vpop.f32.mrf.mxu1  ;;  %v1739_v5 = vmax.f32 %v1715_v0, 0.0 }
 0x4df   : > { %v1749_v12 = vmax.f32 %v1725_v15, 0.0  ;;  %v1741_v22 = vmax.f32 %v1717_v56, 0.0  ;;  %v3287_v15 = vld [vmem:[%s3860_s20 + $0x20] ss:$8 sps:$4 sm:$0xff]  }
 0x4e0   : > { %v3089_v33 = vpop.f32.mrf.mxu1 }
 0x4e1   : > { %v1726_v54 = vadd.f32 %v3089_v33, %v3584_v27  ;;  %v1722_v27 = vadd.f32 %v3085_v62, %v3576_v23  ;;  %v1718_v23 = vadd.f32 %v3081_v4, %v3568_v19 }
 0x4e2   : > { %v1655_v35 = vpop.f32.mrf.mxu1 }
 0x4e3   : > { %v1724_v47 = vadd.f32 %v1655_v35, %v3586_v28  ;;  %v1746_v3 = vmax.f32 %v1722_v27, 0.0  ;;  %v1720_v28 = vadd.f32 %v1639_v60, %v3578_v24  ;;  %v1742_v24 = vmax.f32 %v1718_v23, 0.0  ;;  %v3299_v27 = vld [vmem:[%s3860_s20 + $0x60] ss:$8 sps:$4 sm:$0xff]  }
 0x4e4   : > { %v1716_v60 = vadd.f32 %v1623_v7, %v3570_v20 }
 0x4e5   : > { %v1748_v1 = vmax.f32 %v1724_v47, 0.0  ;;  %v1744_v62 = vmax.f32 %v1720_v28, 0.0  ;;  %v1780_v4 = vpack.c.bf16 %v1742_v24, %v1741_v22  ;;  %v3293_v47 = vld [vmem:[%s3860_s20 + $0x40] ss:$8 sps:$4 sm:$0xff]  }
 0x4e6   : > { %v1740_v33 = vmax.f32 %v1716_v60, 0.0 }
 0x4e7   : > { %v1781_v14 = vpack.c.bf16 %v1744_v62, %v1743_v13  ;;  %v3306_v62 = vld [vmem:[%s4093_s7] sm:$0xff]  }
 0x4e8   : > { %v1779_v20 = vpack.c.bf16 %v1740_v33, %v1739_v5 }
 0x4ec   : > { %v3092_v36 = vpop.f32.mrf.mxu1 }
 0x4ed   : > { %v1729_v39 = vadd.f32 %v3092_v36, %v3588_v29  ;;  %v1750_v29 = vmax.f32 %v1726_v54, 0.0  ;;  %v3279_v54 = vld [vmem:[%s3860_s20] ss:$8 sps:$4 sm:$0xff]  }
 0x4ee   : > { %v1668_v38 = vpop.f32.mrf.mxu1 }
 0x4ef   : > { %v1753_v50 = vmax.f32 %v1729_v39, 0.0  ;;  %v1727_v8 = vadd.f32 %v1668_v38, %v3590_v30  ;;  %v1723_v30 = vadd.f32 %v1652_v32, %v3582_v26  ;;  %v1745_v26 = vmax.f32 %v1721_v25, 0.0  ;;  %v3305_v25 = vld [vmem:[%s4093_s7 + $0x8] sm:$0xff]  }
 0x4f0   : > { %v3093_v40 = vpop.f32.mrf.mxu1 }
 0x4f1   : > { %v1730_v43 = vadd.f32 %v3093_v40, %v4147_v42  ;;  %v1751_v52 = vmax.f32 %v1727_v8, 0.0  ;;  %v1747_v63 = vmax.f32 %v1723_v30, 0.0  ;;  %v1782_v6 = vpack.c.bf16 %v1746_v3, %v1745_v26  ;;  %v3297_v30 = vld [vmem:[%s3860_s20 + $0x64] ss:$8 sps:$4 sm:$0xff]  }
 0x4f2   : > { %v1671_v44 = vpop.f32.mrf.mxu1 }
 0x4f3   : > { %v1754_v55 = vmax.f32 %v1730_v43, 0.0  ;;  %v1728_v10 = vadd.f32 %v1671_v44, %v3596_v34  ;;  %v1784_v34 = vpack.c.bf16 %v1750_v29, %v1749_v12  ;;  %v1783_v9 = vpack.c.bf16 %v1748_v1, %v1747_v63  ;;  %v3291_v29 = vld [vmem:[%s3860_s20 + $0x44] ss:$8 sps:$4 sm:$0xff]   ;;  %v3296_v12 = vld [vmem:[%s3860_s20 + $0x50] ss:$8 sps:$4 sm:$0xff]  }
 0x4f4   : > { %v3302_v1 = vld [vmem:[%s3860_s20 + $0x70] ss:$8 sps:$4 sm:$0xff]  }
 0x4f5   : > { %v1786_v59 = vpack.c.bf16 %v1754_v55, %v1753_v50  ;;  %v1752_v51 = vmax.f32 %v1728_v10, 0.0 }
 0x4f7   : > { %1888 = vmatpush1.bf16.msra.mxu1 %v1786_v59  ;;  %v1785_v48 = vpack.c.bf16 %v1752_v51, %v1751_v52  ;;  %v3282_v59 = vld [vmem:[%s3860_s20 + $0x14] ss:$8 sps:$4 sm:$0xff]   ;;  %v3285_v51 = vld [vmem:[%s3860_s20 + $0x24] ss:$8 sps:$4 sm:$0xff]   ;;  %v3290_v52 = vld [vmem:[%s3860_s20 + $0x30] ss:$8 sps:$4 sm:$0xff]  }
 0x4f8   : > { %1889 = vmatprep.subr.bf16.mxu1 %v4135_v46 }
 0x4fb   : > { %1890 = vmatpush1.bf16.msra.mxu1 %v1785_v48  ;;  %v3294_v48 = vld [vmem:[%s3860_s20 + $0x54] ss:$8 sps:$4 sm:$0xff]  }
 0x4fc   : > { %1891 = vmatprep.subr.bf16.mxu1 %v4135_v46  ;;  %v3096_v31 = vpop.f32.mrf.mxu1 }
 0x4fd   : > { %v1733_v44 = vadd.f32 %v3096_v31, %v3599_v37  ;;  %v3304_v31 = vld [vmem:[%s4094_s8] sm:$0xff]  }
 0x4fe   : > { %v1684_v11 = vpop.f32.mrf.mxu1  ;;  %3104 = vmatprep.subr.bf16.mxu0 %v3304_v31 }
 0x4ff   : > { %1892 = vmatpush1.bf16.msra.mxu1 %v1784_v34  ;;  %v1731_v55 = vadd.f32 %v1684_v11, %v3604_v41  ;;  %v3284_v41 = vld [vmem:[%s3860_s20 + $0x10] ss:$8 sps:$4 sm:$0xff]   ;;  %v3300_v34 = vld [vmem:[%s3860_s20 + $0x74] ss:$8 sps:$4 sm:$0xff]   ;;  %3105 = vmatpush3.bf16.msra.mxu0 %v3304_v31 }
 0x500   : > { %1893 = vmatprep.subr.bf16.mxu1 %v4135_v46  ;;  %v3097_v21 = vpop.f32.mrf.mxu1  ;;  %3122 = vmatprep.subr.bf16.mxu0 %v3305_v25 }
 0x501   : > { %v1734_v42 = vadd.f32 %v3097_v21, %v3609_v45  ;;  %v1755_v10 = vmax.f32 %v1731_v55, 0.0  ;;  %v3308_v55 = vld [vmem:[%s3937_s1 + $0x8] sm:$0xff]  }
 0x502   : > { %v1687_v32 = vpop.f32.mrf.mxu1 }
 0x503   : > { %1894 = vmatpush1.bf16.msra.mxu1 %v1783_v9 }
 0x504   : > { %1895 = vmatprep.subr.bf16.mxu1 %v4135_v46 }
 0x507   : > { %1896 = vmatpush1.bf16.msra.mxu1 %v1782_v6 }
 0x508   : > { %1897 = vmatprep.subr.bf16.mxu1 %v4135_v46 }
 0x50b   : > { %1898 = vmatpush1.bf16.msra.mxu1 %v1781_v14 }
 0x50c   : > { %v3100_v19 = vpop.f32.mrf.mxu1  ;;  %1899 = vmatprep.subr.bf16.mxu1 %v4135_v46 }
 0x50d   : > { %v1737_v35 = vadd.f32 %v3100_v19, %v3619_v53 }
 0x50e   : > { %v1700_v17 = vpop.f32.mrf.mxu1 }
 0x50f   : > { %1900 = vmatpush1.bf16.msra.mxu1 %v1780_v4  ;;  %v1761_v39 = vmax.f32 %v1737_v35, 0.0  ;;  %v1735_v18 = vadd.f32 %v1700_v17, %v3624_v57  ;;  %v1732_v57 = vadd.f32 %v1687_v32, %v3614_v49 }
 0x510   : > { %v3101_v36 = vpop.f32.mrf.mxu1  ;;  %1901 = vmatprep.subr.bf16.mxu1 %v4135_v46 }
 0x511   : > { %v1738_v7 = vadd.f32 %v3101_v36, %v3629_v61  ;;  %v1759_v50 = vmax.f32 %v1735_v18, 0.0  ;;  %v1758_v61 = vmax.f32 %v1734_v42, 0.0  ;;  %v1756_v45 = vmax.f32 %v1732_v57, 0.0  ;;  %v3307_v57 = vld [vmem:[%s3937_s1] sm:$0xff]  }
 0x512   : > { %v1703_v38 = vpop.f32.mrf.mxu1 }
 0x513   : > { %v1762_v58 = vmax.f32 %v1738_v7, 0.0  ;;  %v1736_v40 = vadd.f32 %v1703_v38, %v3635_v2  ;;  %1902 = vmatpush1.bf16.msra.mxu1 %v1779_v20  ;;  %v1757_v2 = vmax.f32 %v1733_v44, 0.0  ;;  %v1787_v49 = vpack.c.bf16 %v1756_v45, %v1755_v10  ;;  %v3310_v45 = vld [vmem:[%s3937_s1 + $0x18] sm:$0xff]   ;;  %v3311_v10 = vld [vmem:[%s3937_s1 + $0x20] sm:$0xff]  }
 0x514   : > { %1911 = vmatprep.subr.bf16.mxu1 %v4135_v46 }
 0x515   : > { %v1790_v53 = vpack.c.bf16 %v1762_v58, %v1761_v39  ;;  %v1760_v43 = vmax.f32 %v1736_v40, 0.0  ;;  %v1788_v37 = vpack.c.bf16 %v1758_v61, %v1757_v2 }
 0x517   : > { %1912 = vmatpush2.bf16.msra.mxu1 %v1790_v53  ;;  %v1789_v8 = vpack.c.bf16 %v1760_v43, %v1759_v50 }
 0x518   : > { %1913 = vmatprep.subr.bf16.mxu1 %v4135_v46 }
 0x51b   : > { %1914 = vmatpush2.bf16.msra.mxu1 %v1789_v8 }
 0x51c   : > { %1915 = vmatprep.subr.bf16.mxu1 %v4135_v46 }
 0x51f   : > { %1916 = vmatpush2.bf16.msra.mxu1 %v1788_v37  ;;  %v3309_v37 = vld [vmem:[%s3937_s1 + $0x10] sm:$0xff]  }
 0x520   : > { %1917 = vmatprep.subr.bf16.mxu1 %v4135_v46  ;;  %v3288_v46 = vld [vmem:[%s3860_s20 + $0x34] ss:$8 sps:$4 sm:$0xff]   ;;  %s3397_s20 = smov [#allocation2]  }
 0x523   : > { %1918 = vmatpush2.bf16.msra.mxu1 %v1787_v49  ;;  %v3312_v49 = vld [vmem:[%s3937_s1 + $0x28] sm:$0xff]  }
 0x526   : > { %1920 = vmatmul.mubr.bf16.vlgmr.msra.gmra.mxu1 %v3279_v54  ;;  %v3313_v54 = vld [vmem:[%s3937_s1 + $0x30] sm:$0xff]  }
 0x527   : > { %2882 = vmatprep.mubr.msk.bf16.mxu1 %vm993_vm1, %v3282_v59  ;;  %v3314_v59 = vld [vmem:[%s3937_s1 + $0x38] sm:$0xff]  }
 0x52e   : > { %1928 = vmatmul.mubr.bf16.gmra.mxu1 %v3284_v41  ;;  %v3315_v41 = vld [vmem:[%s3970_s28] sm:$0xff]  }
 0x52f   : > { %2883 = vmatprep.mubr.msk.bf16.mxu1 %vm993_vm1, %v3285_v51 }
 0x536   : > { %1936 = vmatmul.mubr.bf16.gmra.mxu1 %v3287_v15 }
 0x537   : > { %2884 = vmatprep.mubr.msk.bf16.mxu1 %vm993_vm1, %v3288_v46 }
 0x53e   : > { %1944 = vmatmul.mubr.bf16.gmra.mxu1 %v3290_v52 }
 0x53f   : > { %2885 = vmatprep.mubr.msk.bf16.mxu1 %vm993_vm1, %v3291_v29 }
 0x546   : > { %1952 = vmatmul.mubr.bf16.gmra.mxu1 %v3293_v47 }
 0x547   : > { %2886 = vmatprep.mubr.msk.bf16.mxu1 %vm993_vm1, %v3294_v48 }
 0x54e   : > { %1960 = vmatmul.mubr.bf16.gmra.mxu1 %v3296_v12 }
 0x54f   : > { %2887 = vmatprep.mubr.msk.bf16.mxu1 %vm993_vm1, %v3297_v30 }
 0x556   : > { %1968 = vmatmul.mubr.bf16.gmra.mxu1 %v3299_v27 }
 0x557   : > { %2888 = vmatprep.mubr.msk.bf16.mxu1 %vm993_vm1, %v3300_v34 }
 0x55e   : > { %1976 = vmatmul.mubr.bf16.gmra.mxu1 %v3302_v1 }
 0x55f   : > { %3158 = vmatprep.mubr.bf16.mxu1 %v3315_v41 }
 0x5e6   : > { %v1921_v63 = vpop.f32.mrf.mxu1 }
 0x5e8   : > { %v1923_v3 = vpop.f32.mrf.mxu1 }
 0x5ea   : > { %v1924_v28 = vpop.f32.mrf.mxu1 }
 0x5eb   : > { %v2004_v9 = vpack.c.bf16 %v1924_v28, %v1921_v63 }
 0x5ec   : > { %v1926_v11 = vpop.f32.mrf.mxu1 }
 0x5ed   : > { %3106 = vmatprep.mubr.msk.bf16.mxu0 %vm1183_vm2, %v2004_v9  ;;  %v3980_v11 = vld [vmem:[%s4095_s9] ss:$0 sm:$0xff] }
 0x5ee   : > { %v1929_v26 = vpop.f32.mrf.mxu1 }
 0x5f0   : > { %v1931_v16 = vpop.f32.mrf.mxu1 }
 0x5f2   : > { %v1932_v23 = vpop.f32.mrf.mxu1 }
 0x5f3   : > { %v2005_v6 = vpack.c.bf16 %v1932_v23, %v1929_v26 }
 0x5f4   : > { %v1934_v21 = vpop.f32.mrf.mxu1 }
 0x5f5   : > { %3107 = vmatmul.mubr.msk.bf16.vlgmr.msra.gmra.mxu0 %vm1183_vm2, %v2005_v6 }
 0x5f6   : > { %v1937_v56 = vpop.f32.mrf.mxu1  ;;  %3123 = vmatpush3.bf16.msra.mxu0 %v3305_v25 }
 0x5f7   : > { %3124 = vmatprep.subr.bf16.mxu0 %v3306_v62 }
 0x5f8   : > { %v1939_v13 = vpop.f32.mrf.mxu1 }
 0x5fa   : > { %v1940_v24 = vpop.f32.mrf.mxu1  ;;  %3125 = vmatpush3.bf16.msra.mxu0 %v3306_v62 }
 0x5fb   : > { %v2006_v60 = vpack.c.bf16 %v1940_v24, %v1937_v56 }
 0x5fc   : > { %v1942_v14 = vpop.f32.mrf.mxu1 }
 0x5fd   : > { %3110 = vmatprep.mubr.msk.bf16.mxu0 %vm1183_vm2, %v2006_v60 }
 0x5fe   : > { %v1945_v32 = vpop.f32.mrf.mxu1 }
 0x600   : > { %v1947_v22 = vpop.f32.mrf.mxu1 }
 0x602   : > { %v1948_v0 = vpop.f32.mrf.mxu1 }
 0x603   : > { %v2007_v19 = vpack.c.bf16 %v1948_v0, %v1945_v32 }
 0x604   : > { %v1950_v4 = vpop.f32.mrf.mxu1 }
 0x605   : > { %3111 = vmatmul.mubr.msk.bf16.gmra.mxu0 %vm1183_vm2, %v2007_v19 }
 0x606   : > { %v1953_v33 = vpop.f32.mrf.mxu1 }
 0x608   : > { %v1955_v17 = vpop.f32.mrf.mxu1 }
 0x60a   : > { %v1956_v5 = vpop.f32.mrf.mxu1 }
 0x60b   : > { %v2008_v35 = vpack.c.bf16 %v1956_v5, %v1953_v33 }
 0x60c   : > { %v1958_v36 = vpop.f32.mrf.mxu1 }
 0x60d   : > { %3114 = vmatprep.mubr.msk.bf16.mxu0 %vm1183_vm2, %v2008_v35 }
 0x60e   : > { %v1961_v20 = vpop.f32.mrf.mxu1 }
 0x610   : > { %v1963_v7 = vpop.f32.mrf.mxu1 }
 0x612   : > { %v1964_v38 = vpop.f32.mrf.mxu1 }
 0x613   : > { %v2009_v39 = vpack.c.bf16 %v1964_v38, %v1961_v20 }
 0x614   : > { %v1966_v18 = vpop.f32.mrf.mxu1 }
 0x615   : > { %3115 = vmatmul.mubr.msk.bf16.gmra.mxu0 %vm1183_vm2, %v2009_v39 }
 0x616   : > { %v1969_v58 = vpop.f32.mrf.mxu1 }
 0x618   : > { %v1971_v40 = vpop.f32.mrf.mxu1 }
 0x61a   : > { %v1972_v42 = vpop.f32.mrf.mxu1 }
 0x61b   : > { %v2010_v53 = vpack.c.bf16 %v1972_v42, %v1969_v58 }
 0x61c   : > { %v1974_v43 = vpop.f32.mrf.mxu1 }
 0x61d   : > { %3118 = vmatprep.mubr.msk.bf16.mxu0 %vm1183_vm2, %v2010_v53 }
 0x61e   : > { %v1977_v44 = vpop.f32.mrf.mxu1 }
 0x620   : > { %v1979_v50 = vpop.f32.mrf.mxu1 }
 0x622   : > { %v1980_v61 = vpop.f32.mrf.mxu1 }
 0x623   : > { %v2011_v8 = vpack.c.bf16 %v1980_v61, %v1977_v44 }
 0x624   : > { %v1982_v2 = vpop.f32.mrf.mxu1 }
 0x625   : > { %3119 = vmatmul.mubr.msk.bf16.gmra.mxu0 %vm1183_vm2, %v2011_v8 }
 0x626   : > { %3126 = vmatprep.mubr.msk.bf16.mxu0 %vm1183_vm2, %v3307_v57 }
 0x62d   : > { %3127 = vmatmul.mubr.msk.bf16.vlgmr.msra.gmra.mxu0 %vm1183_vm2, %v3308_v55 }
 0x62e   : > { %3130 = vmatprep.mubr.msk.bf16.mxu0 %vm1183_vm2, %v3309_v37 }
 0x635   : > { %3131 = vmatmul.mubr.msk.bf16.gmra.mxu0 %vm1183_vm2, %v3310_v45 }
 0x636   : > { %3134 = vmatprep.mubr.msk.bf16.mxu0 %vm1183_vm2, %v3311_v10 }
 0x63d   : > { %3135 = vmatmul.mubr.msk.bf16.gmra.mxu0 %vm1183_vm2, %v3312_v49 }
 0x63e   : > { %3138 = vmatprep.mubr.msk.bf16.mxu0 %vm1183_vm2, %v3313_v54 }
 0x645   : > { %3139 = vmatmul.mubr.msk.bf16.gmra.mxu0 %vm1183_vm2, %v3314_v59 }
 0x6b5   : > { %v3108_v51 = vpop.f32.mrf.mxu0 }
 0x6b7   : > { %v2086_v15 = vpop.f32.mrf.mxu0 }
 0x6b9   : > { %v3109_v46 = vpop.f32.mrf.mxu0 }
 0x6bb   : > { %v2089_v52 = vpop.f32.mrf.mxu0 }
 0x6c5   : > { %v3973_v29 = vpop.f32.mrf.mxu0 }
 0x6c7   : > { %v2102_v47 = vpop.f32.mrf.mxu0 }
 0x6c9   : > { %v3975_v48 = vpop.f32.mrf.mxu0 }
 0x6cb   : > { %v2105_v12 = vpop.f32.mrf.mxu0 }
 0x6d5   : > { %v3116_v30 = vpop.f32.mrf.mxu0 }
 0x6d7   : > { %v2118_v27 = vpop.f32.mrf.mxu0 }
 0x6d9   : > { %v3117_v34 = vpop.f32.mrf.mxu0 }
 0x6db   : > { %v2121_v1 = vpop.f32.mrf.mxu0 }
 0x6e5   : > { %v3120_v31 = vpop.f32.mrf.mxu0 }
 0x6e7   : > { %v2134_v25 = vpop.f32.mrf.mxu0 }
 0x6e9   : > { %v3121_v63 = vpop.f32.mrf.mxu0 }
 0x6eb   : > { %v2137_v3 = vpop.f32.mrf.mxu0 }
 0x6ed   : > { %v3128_v28 = vpop.f32.mrf.mxu0 }
 0x6ee   : > { %v2268_v9 = vadd.f32 %v3128_v28, %v3108_v51 }
 0x6ef   : > { %v2259_v26 = vpop.f32.mrf.mxu0 }
 0x6f0   : > { %v2260_v16 = vadd.f32 %v2259_v26, %v2086_v15  ;;  %v2331_v6 = vadd.f32 %v3980_v11, %v2268_v9 }
 0x6f1   : > { %v3129_v23 = vpop.f32.mrf.mxu0 }
 0x6f2   : > { %v2271_v62 = vadd.f32 %v3129_v23, %v3109_v46  ;;  %v2329_v56 = vadd.f32 %v3980_v11, %v2260_v16  ;;  %v2347_v14 = vmax.f32 %v2331_v6, 0.0 }
 0x6f3   : > { %v2262_v21 = vpop.f32.mrf.mxu0 }
 0x6f4   : > { %v2332_v13 = vadd.f32 %v3980_v11, %v2271_v62  ;;  %v2263_v24 = vadd.f32 %v2262_v21, %v2089_v52  ;;  %v2345_v19 = vmax.f32 %v2329_v56, 0.0 }
 0x6f5   : > { %v3132_v60 = vpop.f32.mrf.mxu0 }
 0x6f6   : > { %v2348_v32 = vmax.f32 %v2332_v13, 0.0  ;;  %v2330_v22 = vadd.f32 %v3980_v11, %v2263_v24  ;;  %v3317_v13 = vld [vmem:[%s4096_s10 + $0x8] sm:$0xff]   ;;  %v3318_v24 = vld [vmem:[%s4096_s10] sm:$0xff]  }
 0x6f7   : > { %v2275_v0 = vpop.f32.mrf.mxu0 }
 0x6f8   : > { %v2346_v4 = vmax.f32 %v2330_v22, 0.0  ;;  %v2276_v33 = vadd.f32 %v2275_v0, %v2102_v47  ;;  %v3986_v17 = vpack.c.bf16 %v2348_v32, %v2347_v14 }
 0x6f9   : > { %v3133_v5 = vpop.f32.mrf.mxu0 }
 0x6fa   : > { %v3988_v35 = vpack.c.bf16 %v2346_v4, %v2345_v19  ;;  %v2333_v20 = vadd.f32 %v3980_v11, %v2276_v33  ;;  %v3319_v4 = vld [vmem:[%s4098_s12 + $0x8] sm:$0xff]   ;;  %v3320_v33 = vld [vmem:[%s4098_s12] sm:$0xff]  }
 0x6fb   : > { %v2278_v36 = vpop.f32.mrf.mxu0  ;;  %3170 = vmatprep.subr.bf16.mxu0 %v3319_v4 }
 0x6fc   : > { %v2279_v7 = vadd.f32 %v2278_v36, %v2105_v12  ;;  %v2349_v58 = vmax.f32 %v2333_v20, 0.0  ;;  %3171 = vmatpush3.bf16.msra.mxu0 %v3319_v4 }
 0x6fd   : > { %v3136_v38 = vpop.f32.mrf.mxu0  ;;  %3172 = vmatprep.subr.bf16.mxu0 %v3320_v33 }
 0x6fe   : > { %v2334_v39 = vadd.f32 %v3980_v11, %v2279_v7  ;;  %v2300_v45 = vadd.f32 %v3136_v38, %v3116_v30  ;;  %v2287_v30 = vadd.f32 %v3133_v5, %v3975_v48  ;;  %v2920_v5 = vld [vmem:[%s4097_s11] ss:$0 sm:$0xff] }
 0x6ff   : > { %v2291_v18 = vpop.f32.mrf.mxu0 }
 0x700   : > { %v2350_v40 = vmax.f32 %v2334_v39, 0.0  ;;  %v2339_v47 = vadd.f32 %v3980_v11, %v2300_v45  ;;  %v2292_v12 = vadd.f32 %v2291_v18, %v2118_v27  ;;  %v2336_v16 = vadd.f32 %v3980_v11, %v2287_v30  ;;  %3173 = vmatpush3.bf16.msra.mxu0 %v3320_v33 }
 0x701   : > { %v3137_v42 = vpop.f32.mrf.mxu0 }
 0x702   : > { %v2366_v53 = vpack.c.bf16 %v2350_v40, %v2349_v58  ;;  %v2303_v8 = vadd.f32 %v3137_v42, %v3117_v34  ;;  %v2355_v9 = vmax.f32 %v2339_v47, 0.0  ;;  %v2337_v26 = vadd.f32 %v3980_v11, %v2292_v12 }
 0x703   : > { %v2294_v43 = vpop.f32.mrf.mxu0  ;;  %v2352_v62 = vmax.f32 %v2336_v16, 0.0 }
 0x704   : > { %v2340_v41 = vadd.f32 %v3980_v11, %v2303_v8  ;;  %v2295_v51 = vadd.f32 %v2294_v43, %v2121_v1  ;;  %v2284_v1 = vadd.f32 %v3132_v60, %v3973_v29  ;;  %v2353_v48 = vmax.f32 %v2337_v26, 0.0  ;;  %v2925_v43 = vld [vmem:[%s4099_s13] ss:$0 sm:$0xff] }
 0x705   : > { %v3140_v44 = vpop.f32.mrf.mxu0 }
 0x706   : > { %v2316_v50 = vadd.f32 %v3140_v44, %v3120_v31  ;;  %v2338_v28 = vadd.f32 %v3980_v11, %v2295_v51  ;;  %v2335_v6 = vadd.f32 %v3980_v11, %v2284_v1 }
 0x707   : > { %v2307_v61 = vpop.f32.mrf.mxu0 }
 0x708   : > { %v2308_v57 = vadd.f32 %v2307_v61, %v2134_v25  ;;  %v2343_v55 = vadd.f32 %v3980_v11, %v2316_v50  ;;  %v2354_v27 = vmax.f32 %v2338_v28, 0.0  ;;  %v2351_v56 = vmax.f32 %v2335_v6, 0.0 }
 0x709   : > { %v3141_v2 = vpop.f32.mrf.mxu0 }
 0x70a   : > { %v2319_v37 = vadd.f32 %v3141_v2, %v3121_v63  ;;  %v2341_v49 = vadd.f32 %v3980_v11, %v2308_v57  ;;  %v2359_v15 = vmax.f32 %v2343_v55, 0.0  ;;  %v2356_v63 = vmax.f32 %v2340_v41, 0.0 }
 0x70b   : > { %v2310_v10 = vpop.f32.mrf.mxu0  ;;  %v2368_v21 = vpack.c.bf16 %v2354_v27, %v2353_v48  ;;  %v2367_v29 = vpack.c.bf16 %v2352_v62, %v2351_v56 }
 0x70c   : > { %v2344_v54 = vadd.f32 %v3980_v11, %v2319_v37  ;;  %v2311_v59 = vadd.f32 %v2310_v10, %v2137_v3  ;;  %v2357_v34 = vmax.f32 %v2341_v49, 0.0  ;;  %v2369_v23 = vpack.c.bf16 %v2356_v63, %v2355_v9 }
 0x70e   : > { %v2360_v46 = vmax.f32 %v2344_v54, 0.0  ;;  %v2342_v52 = vadd.f32 %v3980_v11, %v2311_v59  ;;  %v3316_v11 = vld [vmem:[%s3970_s28 + $0x8] ss:$0 sps:$4 sm:$0xff]  }
 0x710   : > { %v2358_v31 = vmax.f32 %v2342_v52, 0.0  ;;  %v2371_v25 = vpack.c.bf16 %v2360_v46, %v2359_v15 }
 0x712   : > { %3142 = vmatprep.subr.bf16.mxu1 %v2371_v25  ;;  %v2370_v3 = vpack.c.bf16 %v2358_v31, %v2357_v34 }
 0x713   : > { %3143 = vmatpush3.bf16.msra.mxu1 %v2371_v25 }
 0x714   : > { %3144 = vmatprep.subr.bf16.mxu1 %v2370_v3 }
 0x717   : > { %3145 = vmatpush3.bf16.msra.mxu1 %v2370_v3 }
 0x718   : > { %3146 = vmatprep.subr.bf16.mxu1 %v2369_v23 }
 0x71b   : > { %3147 = vmatpush3.bf16.msra.mxu1 %v2369_v23 }
 0x71c   : > { %3148 = vmatprep.subr.bf16.mxu1 %v2368_v21 }
 0x71f   : > { %3149 = vmatpush3.bf16.msra.mxu1 %v2368_v21 }
 0x720   : > { %3150 = vmatprep.subr.bf16.mxu1 %v2367_v29 }
 0x723   : > { %3151 = vmatpush3.bf16.msra.mxu1 %v2367_v29 }
 0x724   : > { %3152 = vmatprep.subr.bf16.mxu1 %v2366_v53 }
 0x727   : > { %3153 = vmatpush3.bf16.msra.mxu1 %v2366_v53 }
 0x728   : > { %3154 = vmatprep.subr.bf16.mxu1 %v3986_v17 }
 0x72b   : > { %3155 = vmatpush3.bf16.msra.mxu1 %v3986_v17 }
 0x72c   : > { %3156 = vmatprep.subr.bf16.mxu1 %v3988_v35 }
 0x72f   : > { %3157 = vmatpush3.bf16.msra.mxu1 %v3988_v35 }
 0x730   : > { %3162 = vmatprep.subr.bf16.mxu1 %v3317_v13 }
 0x732   : > { %3159 = vmatmul.mubr.bf16.vlgmr.msra.gmra.mxu1 %v3316_v11 }
 0x733   : > { %3163 = vmatpush3.bf16.msra.mxu1 %v3317_v13 }
 0x734   : > { %3164 = vmatprep.subr.bf16.mxu1 %v3318_v24 }
 0x737   : > { %3165 = vmatpush3.bf16.msra.mxu1 %v3318_v24 }
 0x7f2   : > { %v3160_v60 = vpop.f32.mrf.mxu1 }
 0x7f3   : > { %2613 = vrot.lane.b32.xlu1 %v3160_v60, %s3396_s26  ;;  %v2431_v19 = vpack.c.bf16 %v3160_v60, %v3160_v60 }
 0x7f4   : > { %v2416_v14 = vpop.f32.mrf.mxu1 }
 0x7f5   : > { %2609 = vrot.lane.b32.xlu0 %v2416_v14, %s3396_s26 }
 0x7f6   : > { %v3161_v32 = vpop.f32.mrf.mxu1 }
 0x7f8   : > { %v2419_v22 = vpop.f32.mrf.mxu1 }
 0x7f9   : > { %v2430_v0 = vpack.c.bf16 %v2419_v22, %v2416_v14  ;;  %2611 = vrot.lane.b32.xlu0 %v2419_v22, %s3396_s26  ;;  %s3178_s26 = smul.u32 24, %s518_s25 }
 0x7fb   : > { %3166 = vmatprep.mubr.msk.bf16.mxu1 %vm1183_vm2, %v2430_v0  ;;  %s520_s27 = scalar_lea.vmem [#allocation2], %s3178_s26  ;;  %s3337_s26 = sshll.u32 %s3397_s20, 4  ;;  %s3338_s26 = int_to_ptr.vmem [resolvable:$false] %s3337_s26 }
 0x7fc   : > { %3167 = vmatmul.mubr.msk.bf16.vlgmr.msra.gmra.mxu1 %vm1183_vm2, %v2431_v19  ;;  %s2643_s28 = sshll.u32 %s520_s27, 4  ;;  %s3339_s22 = scalar_lea.vmem %s3338_s26, 768  ;;  %s4042_s28 = int_to_ptr.vmem [resolvable:$true] %s2643_s28 }
 0x7fd   : > { %s3333_s21 = scalar_lea.vmem %s4042_s28, 384  ;;  %p3340_p0 = scmp.lt.s32.totalorder %s4042_s28, %s3338_s26 }
 0x7fe   : > { %p3334_p11 = scmp.ne.s32.totalorder %s4042_s28, %s3333_s21  ;;  %p3341_p1 = scmp.lt.s32.totalorder %s3339_s22, %s3333_s21 }
 0x800   : > { %p3335_p12 = pnand %p3334_p11, %p3513_p5  ;;  %p3342_p2 = por %p3341_p1, %p3340_p0 }
 0x802   : > { %p3336_p13 = pneg %p3335_p12 }
 0x804   : > { %p3343_p3 = pnand %p3342_p2, %p3336_p13 }
 0x865   : > { %v2614_v31 = vpop.permute.xlu1 %2613 }
 0x867   : > { %v2610_v34 = vpop.permute.xlu0 %2609 }
 0x86b   : > { %v2612_v9 = vpop.permute.xlu0 %2611 }
 0x8bc   : > { %v3168_v17 = vpop.f32.mrf.mxu1 }
 0x8bd   : > { %v2504_v36 = vadd.f32 %v3168_v17, %v2920_v5 }
 0x8be   : > { %v2495_v35 = vpop.f32.mrf.mxu1 }
 0x8bf   : > { %v2496_v7 = vadd.f32 %v2920_v5, %v2495_v35  ;;  %v2511_v18 = vmax.f32 %v2504_v36, 0.0 }
 0x8c0   : > { %v3169_v20 = vpop.f32.mrf.mxu1 }
 0x8c1   : > { %v2509_v58 = vmax.f32 %v2496_v7, 0.0  ;;  %v2513_v53 = vpack.c.bf16 %v2511_v18, %v2511_v18 }
 0x8c2   : > { %v2498_v38 = vpop.f32.mrf.mxu1 }
 0x8c3   : > { %v2499_v39 = vadd.f32 %v2920_v5, %v2498_v38 }
 0x8c5   : > { %v2510_v40 = vmax.f32 %v2499_v39, 0.0 }
 0x8c7   : > { %v2512_v42 = vpack.c.bf16 %v2510_v40, %v2509_v58 }
 0x8c9   : > { %3174 = vmatprep.mubr.msk.bf16.mxu0 %vm1183_vm2, %v2512_v42 }
 0x8ca   : > { %3175 = vmatmul.mubr.msk.bf16.vlgmr.msra.gmra.mxu0 %vm1183_vm2, %v2513_v53 }
 0x98a   : > { %v3176_v44 = vpop.f32.mrf.mxu0 }
 0x98b   : > { %v2586_v50 = vadd.f32 %v3176_v44, %v2925_v43 }
 0x98c   : > { %v2577_v61 = vpop.f32.mrf.mxu0 }
 0x98d   : > { %v2593_v57 = vsub.f32 0.0, %v2586_v50  ;;  %v2578_v8 = vadd.f32 %v2925_v43, %v2577_v61 }
 0x98e   : > { %v3177_v2 = vpop.f32.mrf.mxu0 }
 0x98f   : > { %v2598_v55 = vmul.f32 1.442695, %v2593_v57  ;;  %v2591_v37 = vsub.f32 0.0, %v2578_v8 }
 0x990   : > { %v2580_v45 = vpop.f32.mrf.mxu0 }
 0x991   : > { %3321 = vpow2.f32 %v2598_v55  ;;  %v2594_v10 = vmul.f32 1.442695, %v2591_v37  ;;  %v2581_v49 = vadd.f32 %v2925_v43, %v2580_v45 }
 0x993   : > { %3323 = vpow2.f32 %v2594_v10  ;;  %v2592_v54 = vsub.f32 0.0, %v2581_v49 }
 0x995   : > { %v2596_v59 = vmul.f32 1.442695, %v2592_v54 }
 0x997   : > { %3325 = vpow2.f32 %v2596_v59 }
 0x99e   : > { %v3322_v41 = vpop.eup %3321 }
 0x99f   : > { %v2602_v51 = vadd.f32 1.0, %v3322_v41 }
 0x9a0   : > { %v3324_v15 = vpop.eup %3323 }
 0x9a1   : > { %3327 = vrcp.f32 %v2602_v51  ;;  %v2600_v46 = vadd.f32 1.0, %v3324_v15 }
 0x9a3   : > { %3329 = vrcp.f32 %v2600_v46 }
 0x9a4   : > { %v3326_v52 = vpop.eup %3325 }
 0x9a5   : > { %v2601_v47 = vadd.f32 1.0, %v3326_v52 }
 0x9a7   : > { %3331 = vrcp.f32 %v2601_v47 }
 0x9ae   : > { %v3328_v12 = vpop.eup %3327 }
 0x9af   : > { %v2621_v25 = vsel %vm2618_vm3, %v3328_v12, %v2614_v31 }
 0x9b0   : > { %v3330_v30 = vpop.eup %3329  ;;  %v2625_v63 = vsel %vm2622_vm4, %v2621_v25, 0.0 }
 0x9b1   : > { %v2619_v28 = vsel %vm2618_vm3, %v3330_v30, %v2610_v34  ;;  %2628 = vst [vmem:[%s520_s27 + $0x10] sm:$0xff] %v2625_v63 }
 0x9b2   : > { %v2623_v3 = vsel %vm2622_vm4, %v2619_v28, 0.0 }
 0x9b3   : > { %2626 = vst [vmem:[%s520_s27] sm:$0xff] %v2623_v3 }
 0x9b4   : > { %v3332_v1 = vpop.eup %3331 }
 0x9b5   : > { %v2620_v26 = vsel %vm2618_vm3, %v3332_v1, %v2612_v9 }
 0x9b6   : > { %v2624_v16 = vsel %vm2622_vm4, %v2620_v26, 0.0 }
 0x9b7   : > { %2627 = vst [vmem:[%s520_s27 + $0x8] sm:$0xff] %v2624_v16 }
 0x9b8   : > { %3346 = shalt.err (!%p3343_p3)
}
 0x9b9   : > { %s3347_s25 = scalar_lea.hbm %s4040_s15, 384  ;;  %s3351_s18 = scalar_lea.hbm %s4100_s14, 1536 }
 0x9ba   : > { %p3348_p4 = scmp.ne.s32.totalorder %s4040_s15, %s3347_s25  ;;  %p3352_p9 = scmp.lt.s32.totalorder %s4040_s15, %s4100_s14 }
 0x9bb   : > { %p3353_p10 = scmp.lt.s32.totalorder %s3351_s18, %s3347_s25 }
 0x9bc   : > { %p3349_p7 = pnand %p3348_p4, %p3513_p5 }
 0x9bd   : > { %p3354_p11 = por %p3353_p10, %p3352_p9 }
 0x9be   : > { %p3350_p8 = pneg %p3349_p7 }
 0x9c0   : > { %p3355_p12 = pnand %p3354_p11, %p3350_p8 }
 0x9c2   : > { %3358 = shalt.err (!%p3355_p12)
}
 0x9c3   : > { %s3398_s21 = smov 128   ;;  %s3399_s26 = smov 8  }
 0x9c4   : > { %3183 = dma.vmem_to_hbm [thread:$0]  (%p3513_p5), %s4042_s28, 384, %s4040_s15, %s4046_s17, %s3398_s21, %s3398_s21, %s3399_s26  }
 0x9c5 PF: > { %p3189_p13 = scmp.ge.s32.totalorder %s3393_s16, 2  ;;  %s2658_s22 = sand.u32 1, %s3381_s29  }
 0x9c6   : > { %s2659_s0 = scalar_lea.sflag [#allocation3], %s2658_s22 }
 0x9c7   : > { %p3186_p0 = pnand %p3189_p13, %p3517_p6 }
 0x9c9   : > { %p3187_p1 = pneg %p3186_p0 }
 0x9cb   : > { %3376 = dma.done.wait (%p3187_p1), %s2659_s0, 384  }
 0x9cc   : > { %3378 = vsyncadd (%p3187_p1), %s2659_s0, 4294966912  ;;  %s4149_s25 = sld [smem:[#allocation5_spill]]  ;;  %p24_p2 = scmp.ge.s32.totalorder %s3500_s19, 6  }
 0x9cd   : > { %s4150_s15 = sld [smem:[#allocation6_spill]]  ;;  %s4151_s29 = smov %s3385_s30 }
 0x9ce   : > { %s4153_s16 = smov %s3500_s19  ;;  %26 = sbr.rel (!%p24_p2) target bundleno = 6 (0x6), region = 123 }
 0x9d2   : > { %s4152_s30 = smov %s4149_s25 }
 0x9d3   :  { %2664 = vsyncpa [#allocation3], 1 }
 0x9d4   :  { %2666 = vsyncpa [#allocation3 + $0x1], 1 }

</bundles_post_ra>
